<compile_context>
chip_gen: v5e
topology: v5e:2x2
jax: 0.10.0
libtpu: 0.0.40
codegen_flags: <defaults>
</compile_context>

<pallas_src>
import jax
import jax.numpy as jnp
from jax.experimental import pallas as pl
from jax.experimental.pallas import tpu as pltpu


def _round_up(x, m):
    return ((x + m - 1) // m) * m


def _tpu_generation():
    """Best-effort TPU generation from device_kind; defaults to 6."""
    try:
        kind = jax.devices()[0].device_kind.lower()
    except Exception:
        return 6
    for g in (7, 6, 5, 4, 3):
        if f"v{g}" in kind:
            return g
    return 6


def mlp_kernel(x_ref,
               w1_ref, b1_ref,
               w2_ref, b2_ref,
               w3_ref, b3_ref,
               w4_ref, b4_ref,
               w5_ref, b5_ref,
               o_ref):
    # x tile is (5, TILE_B) f32; cast to bf16 in-kernel (hidden under matmul).
    x = x_ref[...].astype(jnp.bfloat16)

    def hidden(w_ref, b_ref, h):
        # MXU matmul with f32 accumulation; bias-add + ReLU run in the dtype
        # the bias was passed in (bf16 on v6e/v7x, f32 on v5e), then the
        # activation is handed to the next MXU pass as bf16.
        acc = jnp.dot(w_ref[...], h, preferred_element_type=jnp.float32)
        a = jnp.maximum(acc.astype(b_ref.dtype) + b_ref[...], 0)
        return a.astype(jnp.bfloat16)

    h = hidden(w1_ref, b1_ref, x)        # (512, T)
    h = hidden(w2_ref, b2_ref, h)        # (128, T)
    h = hidden(w3_ref, b3_ref, h)        # (32, T)

    # Layer 4 kept in f32 (small, feeds the output reduce).
    h = jnp.dot(w4_ref[...], h, preferred_element_type=jnp.float32) + b4_ref[...]
    h = jnp.maximum(h, 0.0)              # (16, T) f32

    # Output layer 16->1 as a VPU multiply + 16-row sublane reduce: produces a
    # lane-dense (1, T) row directly. b5 is a scalar kept in SMEM.
    logits = jnp.sum(h * w5_ref[...], axis=0, keepdims=True) + b5_ref[0, 0]
    o_ref[...] = jax.nn.sigmoid(logits).astype(o_ref.dtype)


def init_params(key):
    """Deterministic synthetic params in nn.Linear layout: W (out, in), b (out,)."""
    dims = [(5, 512), (512, 128), (128, 32), (32, 16), (16, 1)]
    params = []
    for i, (din, dout) in enumerate(dims):
        kw, kb = jax.random.split(jax.random.fold_in(key, i))
        bound = 1.0 / (din ** 0.5)
        w = jax.random.uniform(kw, (dout, din), jnp.float32, -bound, bound)
        b = jax.random.uniform(kb, (dout,), jnp.float32, -bound, bound)
        params.append((w, b))
    return params


def neural_network_forward(x, params, *, tile_b=None):
    batch = x.shape[0]
    gen = _tpu_generation()

    # bf16 elementwise only where the VPU has bf16 VALU (v6e / v7x).
    bf16_elementwise = gen >= 6

    # Generation-aware tile defaults (kernel is per-step-overhead bound, so
    # bigger is better, subject to each generation's VMEM budget).
    if tile_b is None:
        tile_b = {5: 2048, 6: 8192, 7: 4096}.get(gen, 4096)

    # Don't massively over-pad tiny batches.
    tile_b = max(256, min(tile_b, _round_up(batch, 256)))

    # v7x: make sure there are >= 2 grid steps so both TensorCores get work.
    if gen >= 7:
        padded0 = _round_up(batch, 256)
        if padded0 >= 512:
            tile_b = min(tile_b, max(256, (padded0 // 2) // 256 * 256))

    padded = _round_up(batch, tile_b)
    num_tiles = padded // tile_b

    (w1, b1), (w2, b2), (w3, b3), (w4, b4), (w5, b5) = params

    # Batch on the lane axis: x -> (5, padded), kept f32 (cast in-kernel).
    if padded != batch:
        x = jnp.pad(x, ((0, padded - batch), (0, 0)))
    x_t = x.T                                           # (5, padded) f32

    elem_dt = jnp.bfloat16 if bf16_elementwise else jnp.float32
    w1b, w2b, w3b, w4b = (w.astype(jnp.bfloat16) for w in (w1, w2, w3, w4))
    b1c = b1.reshape(-1, 1).astype(elem_dt)             # (512, 1)
    b2c = b2.reshape(-1, 1).astype(elem_dt)             # (128, 1)
    b3c = b3.reshape(-1, 1).astype(jnp.float32)         # (32, 1)
    b4c = b4.reshape(-1, 1).astype(jnp.float32)         # (16, 1)
    w5c = w5.reshape(-1, 1).astype(jnp.float32)         # (16, 1)
    b5s = b5.reshape(1, 1).astype(jnp.float32)          # scalar -> SMEM

    resident = lambda i: (0, 0)  # weights/biases: same block every grid step
    in_specs = [
        pl.BlockSpec((5, tile_b), lambda i: (0, i)),    # x tile (pipelined)
        pl.BlockSpec(w1b.shape, resident),
        pl.BlockSpec(b1c.shape, resident),
        pl.BlockSpec(w2b.shape, resident),
        pl.BlockSpec(b2c.shape, resident),
        pl.BlockSpec(w3b.shape, resident),
        pl.BlockSpec(b3c.shape, resident),
        pl.BlockSpec(w4b.shape, resident),
        pl.BlockSpec(b4c.shape, resident),
        pl.BlockSpec(w5c.shape, resident),
        pl.BlockSpec(memory_space=pltpu.MemorySpace.SMEM),  # b5 scalar
    ]

    # Advisory cost estimate so XLA schedules/overlaps the custom call well.
    flops = 2 * padded * (5 * 512 + 512 * 128 + 128 * 32 + 32 * 16 + 16 * 1)
    param_bytes = sum(int(a.size) * a.dtype.itemsize
                      for a in (w1b, b1c, w2b, b2c, w3b, b3c, w4b, b4c, w5c, b5s))
    cost = pl.CostEstimate(flops=flops,
                           transcendentals=padded,
                           bytes_accessed=padded * (5 * 4 + 4) + param_bytes)

    cp_kwargs = dict(dimension_semantics=("parallel",))
    # Only the big v6e tile needs more than the default scoped-VMEM budget
    # (v6e has 128 MiB physical VMEM); other generations fit the defaults.
    if gen == 6 and tile_b > 4096:
        cp_kwargs["vmem_limit_bytes"] = 100 * 1024 * 1024

    out = pl.pallas_call(
        mlp_kernel,
        out_shape=jax.ShapeDtypeStruct((1, padded), jnp.float32),
        grid=(num_tiles,),
        in_specs=in_specs,
        out_specs=pl.BlockSpec((1, tile_b), lambda i: (0, i)),
        compiler_params=pltpu.CompilerParams(**cp_kwargs),
        cost_estimate=cost,
    )(x_t, w1b, b1c, w2b, b2c, w3b, b3c, w4b, b4c, w5c, b5s)

    # Lane-dense row -> (batch, 1), dropping batch padding.
    return out[0, :batch].reshape(batch, 1)


def reference_forward(x, params):
    h = x
    for i, (w, b) in enumerate(params):
        h = h @ w.T + b
        if i < len(params) - 1:
            h = jnp.maximum(h, 0.0)
    return jax.nn.sigmoid(h)


if __name__ == "__main__":
    key = jax.random.PRNGKey(0)
    k_x, k_p = jax.random.split(key)

    batch = 8
    x = jax.random.normal(k_x, (batch, 5), jnp.float32)
    params = init_params(k_p)

    fwd = jax.jit(lambda xx: neural_network_forward(xx, params))
    out = jax.block_until_ready(fwd(x))

    ref = reference_forward(x, params)
    assert out.shape == (batch, 1), out.shape
    # bf16 MXU operands / bf16 elementwise vs pure-f32 reference -> loosened tol.
    assert jnp.allclose(out, ref, atol=2e-2, rtol=2e-2), (out, ref)

    print("KERNEL_OK")
</pallas_src>

<mosaic_0001>
module attributes {stable_mosaic.version = 11 : i64} {
  func.func @mlp_kernel(%arg0: i32, %arg1: memref<5x256xf32, #tpu.memory_space<vmem>>, %arg2: memref<512x5xbf16, #tpu.memory_space<vmem>>, %arg3: memref<512x1xbf16, #tpu.memory_space<vmem>>, %arg4: memref<128x512xbf16, #tpu.memory_space<vmem>>, %arg5: memref<128x1xbf16, #tpu.memory_space<vmem>>, %arg6: memref<32x128xbf16, #tpu.memory_space<vmem>>, %arg7: memref<32x1xf32, #tpu.memory_space<vmem>>, %arg8: memref<16x32xbf16, #tpu.memory_space<vmem>>, %arg9: memref<16x1xf32, #tpu.memory_space<vmem>>, %arg10: memref<16x1xf32, #tpu.memory_space<vmem>>, %arg11: memref<1x1xf32, #tpu.memory_space<smem>>, %arg12: memref<1x256xf32, #tpu.memory_space<vmem>>) attributes {dimension_semantics = [#tpu.dimension_semantics<parallel>], iteration_bounds = array<i64: 1>, scalar_prefetch = 0 : i64, scratch_operands = 0 : i64, tpu.core_type = #tpu.core_type<tc>, window_params = [{transform_indices = @transform_0, window_bounds = array<i64: 5, 256>}, {pipeline_mode = #tpu.pipeline_mode<synchronous>, transform_indices = @transform_1, window_bounds = array<i64: 512, 5>}, {pipeline_mode = #tpu.pipeline_mode<synchronous>, transform_indices = @transform_2, window_bounds = array<i64: 512, 1>}, {pipeline_mode = #tpu.pipeline_mode<synchronous>, transform_indices = @transform_3, window_bounds = array<i64: 128, 512>}, {pipeline_mode = #tpu.pipeline_mode<synchronous>, transform_indices = @transform_4, window_bounds = array<i64: 128, 1>}, {pipeline_mode = #tpu.pipeline_mode<synchronous>, transform_indices = @transform_5, window_bounds = array<i64: 32, 128>}, {pipeline_mode = #tpu.pipeline_mode<synchronous>, transform_indices = @transform_6, window_bounds = array<i64: 32, 1>}, {pipeline_mode = #tpu.pipeline_mode<synchronous>, transform_indices = @transform_7, window_bounds = array<i64: 16, 32>}, {pipeline_mode = #tpu.pipeline_mode<synchronous>, transform_indices = @transform_8, window_bounds = array<i64: 16, 1>}, {pipeline_mode = #tpu.pipeline_mode<synchronous>, transform_indices = @transform_9, window_bounds = array<i64: 16, 1>}, {transform_indices = @transform_10, window_bounds = array<i64: 1, 1>}, {transform_indices = @transform_11, window_bounds = array<i64: 1, 256>}]} {
    %c0 = arith.constant 0 : index
    %c0_0 = arith.constant 0 : index
    %0 = vector.load %arg1[%c0, %c0_0] : memref<5x256xf32, #tpu.memory_space<vmem>>, vector<5x256xf32>
    %1 = arith.truncf %0 : vector<5x256xf32> to vector<5x256xbf16>
    %c0_1 = arith.constant 0 : index
    %c0_2 = arith.constant 0 : index
    %2 = vector.load %arg2[%c0_1, %c0_2] : memref<512x5xbf16, #tpu.memory_space<vmem>>, vector<512x5xbf16>
    %cst = arith.constant dense<0.000000e+00> : vector<512x256xf32>
    %3 = tpu.matmul %2, %1, %cst {dimension_numbers = #tpu.dot_dimension_numbers<[1], [0], [0], [1], [0, 0, 1, 1], [], []>} : vector<512x5xbf16>, vector<5x256xbf16>, vector<512x256xf32> -> vector<512x256xf32>
    %4 = arith.truncf %3 : vector<512x256xf32> to vector<512x256xbf16>
    %c0_3 = arith.constant 0 : index
    %c0_4 = arith.constant 0 : index
    %5 = vector.load %arg3[%c0_3, %c0_4] : memref<512x1xbf16, #tpu.memory_space<vmem>>, vector<512x1xbf16>
    %6 = vector.broadcast %5 : vector<512x1xbf16> to vector<512x256xbf16>
    %7 = arith.addf %4, %6 : vector<512x256xbf16>
    %cst_5 = arith.constant 0.000000e+00 : bf16
    %8 = vector.broadcast %cst_5 : bf16 to vector<512x256xbf16>
    %9 = arith.maximumf %7, %8 : vector<512x256xbf16>
    %c0_6 = arith.constant 0 : index
    %c0_7 = arith.constant 0 : index
    %10 = vector.load %arg4[%c0_6, %c0_7] : memref<128x512xbf16, #tpu.memory_space<vmem>>, vector<128x512xbf16>
    %cst_8 = arith.constant dense<0.000000e+00> : vector<128x256xf32>
    %11 = tpu.matmul %10, %9, %cst_8 {dimension_numbers = #tpu.dot_dimension_numbers<[1], [0], [0], [1], [0, 0, 1, 1], [], []>} : vector<128x512xbf16>, vector<512x256xbf16>, vector<128x256xf32> -> vector<128x256xf32>
    %12 = arith.truncf %11 : vector<128x256xf32> to vector<128x256xbf16>
    %c0_9 = arith.constant 0 : index
    %c0_10 = arith.constant 0 : index
    %13 = vector.load %arg5[%c0_9, %c0_10] : memref<128x1xbf16, #tpu.memory_space<vmem>>, vector<128x1xbf16>
    %14 = vector.broadcast %13 : vector<128x1xbf16> to vector<128x256xbf16>
    %15 = arith.addf %12, %14 : vector<128x256xbf16>
    %cst_11 = arith.constant 0.000000e+00 : bf16
    %16 = vector.broadcast %cst_11 : bf16 to vector<128x256xbf16>
    %17 = arith.maximumf %15, %16 : vector<128x256xbf16>
    %c0_12 = arith.constant 0 : index
    %c0_13 = arith.constant 0 : index
    %18 = vector.load %arg6[%c0_12, %c0_13] : memref<32x128xbf16, #tpu.memory_space<vmem>>, vector<32x128xbf16>
    %cst_14 = arith.constant dense<0.000000e+00> : vector<32x256xf32>
    %19 = tpu.matmul %18, %17, %cst_14 {dimension_numbers = #tpu.dot_dimension_numbers<[1], [0], [0], [1], [0, 0, 1, 1], [], []>} : vector<32x128xbf16>, vector<128x256xbf16>, vector<32x256xf32> -> vector<32x256xf32>
    %c0_15 = arith.constant 0 : index
    %c0_16 = arith.constant 0 : index
    %20 = vector.load %arg7[%c0_15, %c0_16] : memref<32x1xf32, #tpu.memory_space<vmem>>, vector<32x1xf32>
    %21 = vector.broadcast %20 : vector<32x1xf32> to vector<32x256xf32>
    %22 = arith.addf %19, %21 : vector<32x256xf32>
    %cst_17 = arith.constant 0.000000e+00 : f32
    %23 = vector.broadcast %cst_17 : f32 to vector<32x256xf32>
    %24 = arith.maximumf %22, %23 : vector<32x256xf32>
    %25 = arith.truncf %24 : vector<32x256xf32> to vector<32x256xbf16>
    %c0_18 = arith.constant 0 : index
    %c0_19 = arith.constant 0 : index
    %26 = vector.load %arg8[%c0_18, %c0_19] : memref<16x32xbf16, #tpu.memory_space<vmem>>, vector<16x32xbf16>
    %cst_20 = arith.constant dense<0.000000e+00> : vector<16x256xf32>
    %27 = tpu.matmul %26, %25, %cst_20 {dimension_numbers = #tpu.dot_dimension_numbers<[1], [0], [0], [1], [0, 0, 1, 1], [], []>} : vector<16x32xbf16>, vector<32x256xbf16>, vector<16x256xf32> -> vector<16x256xf32>
    %c0_21 = arith.constant 0 : index
    %c0_22 = arith.constant 0 : index
    %28 = vector.load %arg9[%c0_21, %c0_22] : memref<16x1xf32, #tpu.memory_space<vmem>>, vector<16x1xf32>
    %29 = vector.broadcast %28 : vector<16x1xf32> to vector<16x256xf32>
    %30 = arith.addf %27, %29 : vector<16x256xf32>
    %cst_23 = arith.constant 0.000000e+00 : f32
    %31 = vector.broadcast %cst_23 : f32 to vector<16x256xf32>
    %32 = arith.maximumf %30, %31 : vector<16x256xf32>
    %c0_24 = arith.constant 0 : index
    %c0_25 = arith.constant 0 : index
    %33 = vector.load %arg10[%c0_24, %c0_25] : memref<16x1xf32, #tpu.memory_space<vmem>>, vector<16x1xf32>
    %34 = vector.broadcast %33 : vector<16x1xf32> to vector<16x256xf32>
    %35 = arith.mulf %32, %34 : vector<16x256xf32>
    %cst_26 = arith.constant dense<0.000000e+00> : vector<256xf32>
    %36 = vector.multi_reduction <add>, %35, %cst_26 [0] : vector<16x256xf32> to vector<256xf32>
    %37 = vector.shape_cast %36 : vector<256xf32> to vector<1x256xf32>
    %c0_27 = arith.constant 0 : index
    %c0_28 = arith.constant 0 : index
    %38 = memref.load %arg11[%c0_27, %c0_28] : memref<1x1xf32, #tpu.memory_space<smem>>
    %39 = vector.broadcast %38 : f32 to vector<1x256xf32>
    %40 = arith.addf %37, %39 : vector<1x256xf32>
    %41 = arith.negf %40 : vector<1x256xf32>
    %42 = math.exp %41 : vector<1x256xf32>
    %cst_29 = arith.constant 1.000000e+00 : f32
    %43 = vector.broadcast %cst_29 : f32 to vector<1x256xf32>
    %44 = arith.addf %43, %42 : vector<1x256xf32>
    %45 = arith.divf %43, %44 : vector<1x256xf32>
    %c0_30 = arith.constant 0 : index
    %c0_31 = arith.constant 0 : index
    %46 = vector.load %arg12[%c0_30, %c0_31] : memref<1x256xf32, #tpu.memory_space<vmem>>, vector<1x256xf32>
    tpu.vector_store %arg12[%c0_30, %c0_31], %45 {strides = array<i32>} : memref<1x256xf32, #tpu.memory_space<vmem>>, vector<1x256xf32>,
    return
  }
  func.func @transform_0(%arg0: i32) -> (i32, i32) {
    %c0_i32 = arith.constant 0 : i32
    %c0_i32_0 = arith.constant 0 : i32
    return %c0_i32, %arg0 : i32, i32
  }
  func.func @transform_1(%arg0: i32) -> (i32, i32) {
    %c0_i32 = arith.constant 0 : i32
    %c0_i32_0 = arith.constant 0 : i32
    %c0_i32_1 = arith.constant 0 : i32
    return %c0_i32, %c0_i32_0 : i32, i32
  }
  func.func @transform_2(%arg0: i32) -> (i32, i32) {
    %c0_i32 = arith.constant 0 : i32
    %c0_i32_0 = arith.constant 0 : i32
    %c0_i32_1 = arith.constant 0 : i32
    return %c0_i32, %c0_i32_0 : i32, i32
  }
  func.func @transform_3(%arg0: i32) -> (i32, i32) {
    %c0_i32 = arith.constant 0 : i32
    %c0_i32_0 = arith.constant 0 : i32
    %c0_i32_1 = arith.constant 0 : i32
    return %c0_i32, %c0_i32_0 : i32, i32
  }
  func.func @transform_4(%arg0: i32) -> (i32, i32) {
    %c0_i32 = arith.constant 0 : i32
    %c0_i32_0 = arith.constant 0 : i32
    %c0_i32_1 = arith.constant 0 : i32
    return %c0_i32, %c0_i32_0 : i32, i32
  }
  func.func @transform_5(%arg0: i32) -> (i32, i32) {
    %c0_i32 = arith.constant 0 : i32
    %c0_i32_0 = arith.constant 0 : i32
    %c0_i32_1 = arith.constant 0 : i32
    return %c0_i32, %c0_i32_0 : i32, i32
  }
  func.func @transform_6(%arg0: i32) -> (i32, i32) {
    %c0_i32 = arith.constant 0 : i32
    %c0_i32_0 = arith.constant 0 : i32
    %c0_i32_1 = arith.constant 0 : i32
    return %c0_i32, %c0_i32_0 : i32, i32
  }
  func.func @transform_7(%arg0: i32) -> (i32, i32) {
    %c0_i32 = arith.constant 0 : i32
    %c0_i32_0 = arith.constant 0 : i32
    %c0_i32_1 = arith.constant 0 : i32
    return %c0_i32, %c0_i32_0 : i32, i32
  }
  func.func @transform_8(%arg0: i32) -> (i32, i32) {
    %c0_i32 = arith.constant 0 : i32
    %c0_i32_0 = arith.constant 0 : i32
    %c0_i32_1 = arith.constant 0 : i32
    return %c0_i32, %c0_i32_0 : i32, i32
  }
  func.func @transform_9(%arg0: i32) -> (i32, i32) {
    %c0_i32 = arith.constant 0 : i32
    %c0_i32_0 = arith.constant 0 : i32
    %c0_i32_1 = arith.constant 0 : i32
    return %c0_i32, %c0_i32_0 : i32, i32
  }
  func.func @transform_10(%arg0: i32) -> (i32, i32) {
    %c0_i32 = arith.constant 0 : i32
    %c0_i32_0 = arith.constant 0 : i32
    %c0_i32_1 = arith.constant 0 : i32
    return %c0_i32, %c0_i32_0 : i32, i32
  }
  func.func @transform_11(%arg0: i32) -> (i32, i32) {
    %c0_i32 = arith.constant 0 : i32
    %c0_i32_0 = arith.constant 0 : i32
    return %c0_i32, %arg0 : i32, i32
  }
}

</mosaic_0001>

<bundles_post_ra>
// kernel: _lambda_.1
= control target key start
LH: loop header
LB: loop body
LE: loop exit
PB: predicated region body
PF: predicated region fallthrough
CT: control target
= control target key end

     0   :  { %17 = vsyncpa [#allocation4], 0  ;;  %s5175_s0 = inlined_call_operand.vmem [shape: f32[5,256], index: 0, kind: input, shape index: {}]   ;;  %s5176_s1 = inlined_call_operand.hbm [shape: bf16[512,5], index: 1, kind: input, shape index: {}]   ;;  %s5177_s2 = inlined_call_operand.hbm [shape: bf16[512,1], index: 2, kind: input, shape index: {}]   ;;  %s5178_s3 = inlined_call_operand.hbm [shape: bf16[128,512], index: 3, kind: input, shape index: {}]   ;;  %s5179_s4 = inlined_call_operand.hbm [shape: bf16[128,1], index: 4, kind: input, shape index: {}]   ;;  %s5180_s5 = inlined_call_operand.hbm [shape: bf16[32,128], index: 5, kind: input, shape index: {}]   ;;  %s5181_s6 = inlined_call_operand.vmem [shape: f32[32,1], index: 6, kind: input, shape index: {}]   ;;  %s5182_s7 = inlined_call_operand.vmem [shape: bf16[16,32], index: 7, kind: input, shape index: {}]   ;;  %s5183_s8 = inlined_call_operand.hbm [shape: f32[16,1], index: 8, kind: input, shape index: {}]   ;;  %s5184_s9 = inlined_call_operand.hbm [shape: f32[16,1], index: 9, kind: input, shape index: {}]   ;;  %s5185_s10 = inlined_call_operand.<no memory space> [shape: f32[1,1], index: 10, kind: input, shape index: {}]   ;;  %s5186_s11 = inlined_call_operand.vmem [shape: f32[1,256], index: 11, kind: output, shape index: {}]  }
   0x1   :  { %18 = vsyncpa [#allocation6], 0 }
   0x2   :  { %19 = vsyncpa [#allocation9], 0 }
   0x3   :  { %20 = vsyncpa [#allocation12], 0  ;;  %s40_s19 = sshll.u32 %s5177_s2, 4  ;;  %s4008_s20 = smov [#allocation5]   ;;  %s41_s19 = int_to_ptr.hbm [resolvable:$true] %s40_s19 }
   0x4   :  { %s42_s21 = sshll.u32 %s4008_s20, 4  ;;  %s66_s24 = sshll.u32 %s5179_s4, 4  ;;  %s43_s21 = int_to_ptr.vmem [resolvable:$true] %s42_s21  ;;  %s67_s24 = int_to_ptr.hbm [resolvable:$true] %s66_s24 }
   0x5   :  { %s4009_s25 = smov 64   ;;  %s4010_s26 = smov 4  }
   0x6   :  { %48 = dma.hbm_to_vmem [thread:$0]  %s41_s19, 4096, %s43_s21, [#allocation6], %s4009_s25, %s4009_s25, %s4010_s26  }
   0x7   :  { %s4011_s27 = smov [#allocation8]   ;;  %s96_s2 = sshll.u32 %s5183_s8, 4  ;;  %s97_s2 = int_to_ptr.hbm [resolvable:$true] %s96_s2 }
   0x8   :  { %s68_s28 = sshll.u32 %s4011_s27, 4  ;;  %s4012_s4 = smov [#allocation11]   ;;  %s69_s28 = int_to_ptr.vmem [resolvable:$true] %s68_s28 }
   0x9   :  { %74 = dma.hbm_to_vmem [thread:$0]  %s67_s24, 1024, %s69_s28, [#allocation9], %s4009_s25, %s4009_s25, %s4010_s26  }
   0xa   :  { %s98_s12 = sshll.u32 %s4012_s4, 4  ;;  %s27_s15 = sshll.u32 %s5176_s1, 4  ;;  %s99_s12 = int_to_ptr.vmem [resolvable:$true] %s98_s12  ;;  %s28_s15 = int_to_ptr.hbm [resolvable:$true] %s27_s15 }
   0xb   :  { %s4013_s16 = smov 128   ;;  %s4014_s17 = smov 8  }
   0xc   :  { %104 = dma.hbm_to_vmem [thread:$0]  %s97_s2, 256, %s99_s12, [#allocation12], %s4013_s16, %s4013_s16, %s4014_s17  }
   0xd   :  { %s4015_s8 = smov [#allocation3]   ;;  %s53_s21 = sshll.u32 %s5178_s3, 4  ;;  %s54_s21 = int_to_ptr.hbm [resolvable:$true] %s53_s21 }
   0xe   :  { %s29_s18 = sshll.u32 %s4015_s8, 4  ;;  %s4016_s1 = smov [#allocation7]   ;;  %s30_s18 = int_to_ptr.vmem [resolvable:$true] %s29_s18 }
   0xf   :  { %35 = dma.hbm_to_vmem [thread:$0]  %s28_s15, 4096, %s30_s18, [#allocation4], %s4009_s25, %s4009_s25, %s4010_s26  }
  0x10   :  { %s55_s22 = sshll.u32 %s4016_s1, 4  ;;  %s79_s27 = sshll.u32 %s5180_s5, 4  ;;  %s56_s22 = int_to_ptr.vmem [resolvable:$true] %s55_s22  ;;  %s80_s27 = int_to_ptr.hbm [resolvable:$true] %s79_s27 }
  0x11   :  { %s4017_s28 = smov 256   ;;  %s4018_s29 = smov 16  }
  0x12   :  { %61 = dma.hbm_to_vmem [thread:$0]  %s54_s21, 4096, %s56_s22, [#allocation6], %s4017_s28, %s4017_s28, %s4018_s29  }
  0x13   :  { %s4019_s30 = smov [#allocation10]   ;;  %s109_s12 = sshll.u32 %s5184_s9, 4  ;;  %s110_s12 = int_to_ptr.hbm [resolvable:$true] %s109_s12 }
  0x14   :  { %s81_s2 = sshll.u32 %s4019_s30, 4  ;;  %s4020_s13 = smov [#allocation13]   ;;  %s82_s2 = int_to_ptr.vmem [resolvable:$true] %s81_s2 }
  0x15   :  { %87 = dma.hbm_to_vmem [thread:$0]  %s80_s27, 256, %s82_s2, [#allocation9], %s4009_s25, %s4009_s25, %s4010_s26  }
  0x16   :  { %s111_s14 = sshll.u32 %s4020_s13, 4  ;;  %s112_s14 = int_to_ptr.vmem [resolvable:$true] %s111_s14 }
  0x17   :  { %117 = dma.hbm_to_vmem [thread:$0]  %s110_s12, 256, %s112_s14, [#allocation12], %s4013_s16, %s4013_s16, %s4014_s17  }
  0x18   :  { %4000 = dma.done.wait [#allocation4], 4096  }
  0x19   :  { %4001 = vsyncadd [#allocation4], 4294963200 }
  0x1a   :  { %4002 = dma.done.wait [#allocation6], 8192  }
  0x1b   :  { %4003 = vsyncadd [#allocation6], 4294959104 }
  0x1c   :  { %4004 = dma.done.wait [#allocation9], 1280  }
  0x1d   :  { %4005 = vsyncadd [#allocation9], 4294966016 }
  0x1e   :  { %4006 = dma.done.wait [#allocation12], 512  }
  0x1f   :  { %4007 = vsyncadd [#allocation12], 4294966784  ;;  %v4021_v0 = vmov 0   ;;  %vm474_vm0 = vcmask 1041408   ;;  %vm475_vm1 = vcmask 1042432   ;;  %v4022_v1 = vmov 65535  }
  0x20   :  { %3823 = vset.pattern.permute.xlu2 %v4021_v0  ;;  %3822 = vset.pattern.permute.xlu1 %v4021_v0  ;;  %v476_v2 = vsel %vm474_vm0, 4294967295, %v4022_v1  ;;  %v916_v3 = vld [vmem:[#allocation5 + $0x78] sm:$0xf]  ;;  %v898_v5 = vld [vmem:[#allocation5 + $0x30] sm:$0xf]  ;;  %v3738_v13 = vld [vmem:[#allocation3] sm:$0xff] }
  0x21   :  { %3821 = vset.pattern.permute.xlu0 %v4021_v0  ;;  %v900_v4 = vld [vmem:[#allocation5 + $0x38] sm:$0xf]  ;;  %1222 = vperm.xlu1 %3822, %v916_v3   ;;  %v149_v6 = vld [vmem:[%s5175_s0] sm:$0x1f]  ;;  %v477_v7 = vsel %vm475_vm1, %v476_v2, 0  ;;  %vm377_vm2 = vcmask 39936  }
  0x22   :  { %1078 = vperm.xlu0 %3821, %v900_v4   ;;  %v150_v8 = vld [vmem:[%s5175_s0 + $0x8] sm:$0x1f]  ;;  %1060 = vperm.xlu2 %3823, %v898_v5   ;;  %v151_v9 = vpack.c.bf16 %v149_v6, %v149_v6  ;;  %v917_v14 = vld [vmem:[#allocation5 + $0x7c] sm:$0xf]  ;;  %v899_v16 = vld [vmem:[#allocation5 + $0x34] sm:$0xf] }
  0x23   :  { %v152_v10 = vpack.c.bf16 %v150_v8, %v150_v8  ;;  %v901_v15 = vld [vmem:[#allocation5 + $0x3c] sm:$0xf]  ;;  %v915_v17 = vld [vmem:[#allocation5 + $0x74] sm:$0xf]  ;;  %v914_v18 = vld [vmem:[#allocation5 + $0x70] sm:$0xf] }
  0x24   :  { %v479_v11 = vand.u32 %v477_v7, %v151_v9  ;;  %v896_v19 = vld [vmem:[#allocation5 + $0x28] sm:$0xf]  ;;  %v897_v22 = vld [vmem:[#allocation5 + $0x2c] sm:$0xf]  ;;  %v895_v24 = vld [vmem:[#allocation5 + $0x24] sm:$0xf] }
  0x25   :  { %v482_v12 = vand.u32 %v477_v7, %v152_v10  ;;  %v3739_v20 = vld [vmem:[#allocation3 + $0x8] sm:$0xff]  ;;  %v894_v25 = vld [vmem:[#allocation5 + $0x20] sm:$0xf]  ;;  %v3740_v27 = vld [vmem:[#allocation3 + $0x10] sm:$0xff]  ;;  %vm3275_vm3 = vcmask 261120   ;;  %vm3386_vm11 = vcmask 1040384  }
  0x26   :  { %491 = vmatpush.bf16.msra.mxu0 %v479_v11  ;;  %v912_v21 = vld [vmem:[#allocation5 + $0x68] sm:$0xf]  ;;  %v913_v23 = vld [vmem:[#allocation5 + $0x6c] sm:$0xf]  ;;  %v910_v26 = vld [vmem:[#allocation5 + $0x60] sm:$0xf] }
  0x27   :  { %660 = vmatpush.bf16.msra.mxu1 %v482_v12  ;;  %v911_v28 = vld [vmem:[#allocation5 + $0x64] sm:$0xf]  ;;  %v892_v29 = vld [vmem:[#allocation5 + $0x18] sm:$0xf]  ;;  %v893_v30 = vld [vmem:[#allocation5 + $0x1c] sm:$0xf] }
  0x28   :  { %v908_v31 = vld [vmem:[#allocation5 + $0x58] sm:$0xf]  ;;  %v909_v32 = vld [vmem:[#allocation5 + $0x5c] sm:$0xf]  ;;  %v890_v33 = vld [vmem:[#allocation5 + $0x10] sm:$0xf] }
  0x29   :  { %3530 = vmatmul.msk.bf16.vlgmr.msra.gmra.mxu0 %vm377_vm2, %v3738_v13  ;;  %1231 = vperm.xlu1 %3822, %v917_v14   ;;  %v3741_v34 = vld [vmem:[#allocation3 + $0x18] sm:$0xff]  ;;  %v906_v35 = vld [vmem:[#allocation5 + $0x50] sm:$0xf]  ;;  %v891_v36 = vld [vmem:[#allocation5 + $0x14] sm:$0xf] }
  0x2a   :  { %3562 = vmatmul.msk.bf16.vlgmr.msra.gmra.mxu1 %vm377_vm2, %v3738_v13  ;;  %1087 = vperm.xlu0 %3821, %v901_v15   ;;  %v907_v37 = vld [vmem:[#allocation5 + $0x54] sm:$0xf]  ;;  %v889_v38 = vld [vmem:[#allocation5 + $0xc] sm:$0xf]  ;;  %v888_v39 = vld [vmem:[#allocation5 + $0x8] sm:$0xf] }
  0x2b   :  { %1069 = vperm.xlu2 %3823, %v899_v16   ;;  %v904_v40 = vld [vmem:[#allocation5 + $0x48] sm:$0xf]  ;;  %v3742_v41 = vld [vmem:[#allocation3 + $0x20] sm:$0xff]  ;;  %v3744_v47 = vld [vmem:[#allocation3 + $0x30] sm:$0xff] }
  0x2c   :  { %v886_v42 = vld [vmem:[#allocation5] sm:$0xf]  ;;  %v887_v43 = vld [vmem:[#allocation5 + $0x4] sm:$0xf]  ;;  %v3743_v44 = vld [vmem:[#allocation3 + $0x28] sm:$0xff] }
  0x2d   :  { %v905_v48 = vld [vmem:[#allocation5 + $0x4c] sm:$0xf]  ;;  %v902_v52 = vld [vmem:[#allocation5 + $0x40] sm:$0xf]  ;;  %v3745_v54 = vld [vmem:[#allocation3 + $0x38] sm:$0xff] }
  0x2e   :  { %v903_v57 = vld [vmem:[#allocation5 + $0x44] sm:$0xf]  ;;  %v3747_v11 = vld [vmem:[#allocation3 + $0x48] sm:$0xff] }
  0x2f   :  { %v3746_v62 = vld [vmem:[#allocation3 + $0x40] sm:$0xff] }
  0x31   :  { %1213 = vperm.xlu1 %3822, %v915_v17   ;;  %v4023_v17 = vmov 839922192  }
  0x32   :  { %1204 = vperm.xlu0 %3821, %v914_v18   ;;  %v956_v18 = vunpack.c.l.s4 %v4023_v17 }
  0x33   :  { %1042 = vperm.xlu2 %3823, %v896_v19  }
  0x39   :  { %3531 = vmatmul.msk.bf16.gmra.mxu0 %vm377_vm2, %v3739_v20  ;;  %1186 = vperm.xlu1 %3822, %v912_v21  }
  0x3a   :  { %3563 = vmatmul.msk.bf16.gmra.mxu1 %vm377_vm2, %v3739_v20  ;;  %1051 = vperm.xlu0 %3821, %v897_v22  }
  0x3b   :  { %1195 = vperm.xlu2 %3823, %v913_v23   ;;  %v4197_v23 = vunpack.c.0.s8 %v956_v18 }
  0x3d   :  { %5198 = vst [vmem:[#allocation18_spill] sm:$0xff] %v4197_v23 }
  0x41   :  { %1033 = vperm.xlu1 %3822, %v895_v24  }
  0x42   :  { %1024 = vperm.xlu0 %3821, %v894_v25  }
  0x43   :  { %1168 = vperm.xlu2 %3823, %v910_v26  }
  0x49   :  { %3532 = vmatmul.msk.bf16.gmra.mxu0 %vm377_vm2, %v3740_v27  ;;  %1006 = vperm.xlu1 %3822, %v892_v29  }
  0x4a   :  { %3564 = vmatmul.msk.bf16.gmra.mxu1 %vm377_vm2, %v3740_v27  ;;  %1177 = vperm.xlu0 %3821, %v911_v28   ;;  %v3748_v28 = vld [vmem:[#allocation3 + $0x50] sm:$0xff] }
  0x4b   :  { %1015 = vperm.xlu2 %3823, %v893_v30  }
  0x51   :  { %1159 = vperm.xlu1 %3822, %v909_v32  }
  0x52   :  { %1150 = vperm.xlu0 %3821, %v908_v31  }
  0x53   :  { %988 = vperm.xlu2 %3823, %v890_v33  }
  0x59   :  { %3533 = vmatmul.msk.bf16.gmra.mxu0 %vm377_vm2, %v3741_v34  ;;  %1132 = vperm.xlu1 %3822, %v906_v35  }
  0x5a   :  { %3565 = vmatmul.msk.bf16.gmra.mxu1 %vm377_vm2, %v3741_v34  ;;  %997 = vperm.xlu0 %3821, %v891_v36   ;;  %v933_v36 = vld [vmem:[#allocation5 + $0xbc] sm:$0xf] }
  0x5b   :  { %1141 = vperm.xlu2 %3823, %v907_v37  }
  0x61   :  { %979 = vperm.xlu1 %3822, %v889_v38  }
  0x62   :  { %970 = vperm.xlu0 %3821, %v888_v39  }
  0x63   :  { %1114 = vperm.xlu2 %3823, %v904_v40  }
  0x69   :  { %3534 = vmatmul.msk.bf16.gmra.mxu0 %vm377_vm2, %v3742_v41  ;;  %952 = vperm.xlu1 %3822, %v886_v42  }
  0x6a   :  { %3566 = vmatmul.msk.bf16.gmra.mxu1 %vm377_vm2, %v3742_v41  ;;  %1123 = vperm.xlu0 %3821, %v905_v48  }
  0x6b   :  { %961 = vperm.xlu2 %3823, %v887_v43  }
  0x71   :  { %1105 = vperm.xlu1 %3822, %v903_v57   ;;  %v948_v57 = vld [vmem:[#allocation5 + $0xf8] sm:$0xf] }
  0x72   :  { %1096 = vperm.xlu0 %3821, %v902_v52  }
  0x79   :  { %3535 = vmatmul.msk.bf16.gmra.mxu0 %vm377_vm2, %v3743_v44  ;;  %1510 = vperm.xlu1 %3822, %v948_v57  }
  0x7a   :  { %3567 = vmatmul.msk.bf16.gmra.mxu1 %vm377_vm2, %v3743_v44  ;;  %1375 = vperm.xlu0 %3821, %v933_v36  }
  0x7c   :  { %v4141_v45 = vpop.permute.xlu2 %1060 }
  0x85   :  { %v4143_v46 = vpop.permute.xlu2 %1069 }
  0x89   :  { %3536 = vmatmul.msk.bf16.gmra.mxu0 %vm377_vm2, %v3744_v47 }
  0x8a   :  { %3568 = vmatmul.msk.bf16.gmra.mxu1 %vm377_vm2, %v3744_v47 }
  0x8d   :  { %v4147_v49 = vpop.permute.xlu2 %1042 }
  0x93   :  { %v4149_v50 = vpop.permute.xlu1 %1222 }
  0x94   :  { %v4151_v51 = vpop.permute.xlu0 %1078 }
  0x95   :  { %v4153_v53 = vpop.permute.xlu2 %1195 }
  0x99   :  { %3537 = vmatmul.msk.bf16.gmra.mxu0 %vm377_vm2, %v3745_v54 }
  0x9a   :  { %3569 = vmatmul.msk.bf16.gmra.mxu1 %vm377_vm2, %v3745_v54  ;;  %v930_v54 = vld [vmem:[#allocation5 + $0xb0] sm:$0xf] }
  0x9b   :  { %v4157_v55 = vpop.permute.xlu1 %1231  ;;  %1348 = vperm.xlu0 %3821, %v930_v54  }
  0x9c   :  { %v4159_v56 = vpop.permute.xlu0 %1087 }
  0x9d   :  { %v4161_v58 = vpop.permute.xlu2 %1168 }
  0xa3   :  { %v4163_v59 = vpop.permute.xlu1 %1213 }
  0xa4   :  { %v4165_v60 = vpop.permute.xlu0 %1204 }
  0xa5   :  { %v4167_v61 = vpop.permute.xlu2 %1015 }
  0xa6   :  { %v493_v63 = vpop.f32.mrf.mxu0 }
  0xa7   :  { %v662_v0 = vpop.f32.mrf.mxu1 }
  0xa8   :  { %v4169_v1 = vpack.c.bf16 %v662_v0, %v493_v63 }
  0xa9   :  { %3538 = vmatmul.msk.bf16.gmra.mxu0 %vm377_vm2, %v3746_v62 }
  0xaa   :  { %3570 = vmatmul.msk.bf16.gmra.mxu1 %vm377_vm2, %v3746_v62 }
  0xab   :  { %v4173_v2 = vpop.permute.xlu1 %1186 }
  0xac   :  { %v4175_v3 = vpop.permute.xlu0 %1051 }
  0xad   :  { %v989_v4 = vpop.permute.xlu2 %988 }
  0xae   :  { %v495_v5 = vpop.f32.mrf.mxu0  ;;  %v994_v24 = vperm.slane %v989_v4, %v4197_v23 }
  0xaf   :  { %v664_v6 = vpop.f32.mrf.mxu1 }
  0xb0   :  { %v4177_v7 = vpack.c.bf16 %v664_v6, %v495_v5  ;;  %v1658_v32 = vunpack.c.l.bf16 %v994_v24 }
  0xb2   :  { %v1529_v34 = vunpack.c.h.bf16 %v4177_v7 }
  0xb3   :  { %v4179_v8 = vpop.permute.xlu1 %1033 }
  0xb4   :  { %v4181_v9 = vpop.permute.xlu0 %1024 }
  0xb5   :  { %v4183_v10 = vpop.permute.xlu2 %1141 }
  0xb6   :  { %v498_v12 = vpop.f32.mrf.mxu0 }
  0xb7   :  { %v667_v13 = vpop.f32.mrf.mxu1 }
  0xb8   :  { %v4185_v14 = vpack.c.bf16 %v667_v13, %v498_v12 }
  0xb9   :  { %3539 = vmatmul.msk.bf16.gmra.mxu0 %vm377_vm2, %v3747_v11 }
  0xba   :  { %3571 = vmatmul.msk.bf16.gmra.mxu1 %vm377_vm2, %v3747_v11  ;;  %v1530_v6 = vunpack.c.l.bf16 %v4185_v14 }
  0xbb   :  { %v4191_v16 = vpop.permute.xlu1 %1006 }
  0xbc   :  { %v4189_v15 = vpop.permute.xlu0 %1177  ;;  %v1012_v11 = vperm.slane %v4191_v16, %v4197_v23 }
  0xbd   :  { %v4193_v19 = vpop.permute.xlu2 %1114 }
  0xbe   :  { %v500_v20 = vpop.f32.mrf.mxu0 }
  0xbf   :  { %v669_v21 = vpop.f32.mrf.mxu1 }
  0xc0   :  { %v4195_v22 = vpack.c.bf16 %v669_v21, %v500_v20  ;;  %v3749_v21 = vld [vmem:[#allocation3 + $0x58] sm:$0xff] }
  0xc3   :  { %v4202_v26 = vpop.permute.xlu1 %1159 }
  0xc4   :  { %v4200_v25 = vpop.permute.xlu0 %1150 }
  0xc5   :  { %v962_v27 = vpop.permute.xlu2 %961 }
  0xc6   :  { %v967_v29 = vperm.slane %v962_v27, %v4197_v23  ;;  %v503_v30 = vpop.f32.mrf.mxu0 }
  0xc7   :  { %v672_v31 = vpop.f32.mrf.mxu1 }
  0xc8   :  { %v826_v33 = vpack.c.bf16 %v672_v31, %v503_v30  ;;  %v4206_v35 = vunpack.c.l.bf16 %v967_v29  ;;  %v1532_v29 = vunpack.c.l.bf16 %v4195_v22  ;;  %v1533_v30 = vunpack.c.h.bf16 %v4195_v22 }
  0xc9   :  { %3540 = vmatmul.msk.bf16.gmra.mxu0 %vm377_vm2, %v3748_v28  ;;  %v1021_v22 = vperm.slane %v4167_v61, %v4197_v23 }
  0xca   :  { %v1535_v37 = vunpack.c.h.bf16 %v826_v33  ;;  %3572 = vmatmul.msk.bf16.gmra.mxu1 %vm377_vm2, %v3748_v28  ;;  %v4211_v38 = vadd.f32 %v4206_v35, %v1529_v34  ;;  %v1534_v40 = vunpack.c.l.bf16 %v826_v33  ;;  %v1531_v28 = vunpack.c.h.bf16 %v4185_v14 }
  0xcb   :  { %v4213_v41 = vpop.permute.xlu1 %1132  ;;  %v1661_v61 = vunpack.c.l.bf16 %v1021_v22 }
  0xcc   :  { %v1727_v39 = vadd.f32 %v1658_v32, %v1535_v37  ;;  %v998_v42 = vpop.permute.xlu0 %997  ;;  %v1726_v62 = vadd.f32 %v1658_v32, %v1534_v40  ;;  %v1660_v40 = vunpack.c.l.bf16 %v1012_v11 }
  0xcd   :  { %v1003_v43 = vperm.slane %v998_v42, %v4197_v23  ;;  %v947_v42 = vld [vmem:[#allocation5 + $0xf4] sm:$0xf] }
  0xce   :  { %v505_v44 = vpop.f32.mrf.mxu0  ;;  %v2046_v17 = vmax.f32 %v1726_v62, 0.0  ;;  %v2047_v31 = vmax.f32 %v1727_v39, 0.0  ;;  %1501 = vperm.xlu0 %3821, %v947_v42  }
  0xcf   :  { %v674_v47 = vpop.f32.mrf.mxu1  ;;  %v1659_v48 = vunpack.c.l.bf16 %v1003_v43  ;;  %v931_v43 = vld [vmem:[#allocation5 + $0xb4] sm:$0xf] }
  0xd0   :  { %v827_v52 = vpack.c.bf16 %v674_v47, %v505_v44  ;;  %1357 = vperm.xlu1 %3822, %v931_v43  }
  0xd2   :  { %v1536_v63 = vunpack.c.l.bf16 %v827_v52  ;;  %v1537_v0 = vunpack.c.h.bf16 %v827_v52 }
  0xd3   :  { %v980_v12 = vpop.permute.xlu1 %979 }
  0xd4   :  { %v1729_v4 = vadd.f32 %v1659_v48, %v1537_v0  ;;  %v1728_v5 = vadd.f32 %v1659_v48, %v1536_v63  ;;  %v971_v13 = vpop.permute.xlu0 %970  ;;  %v985_v18 = vperm.slane %v980_v12, %v4197_v23  ;;  %v1528_v0 = vunpack.c.l.bf16 %v4177_v7 }
  0xd5   :  { %v976_v20 = vperm.slane %v971_v13, %v4197_v23 }
  0xd6   :  { %v2048_v24 = vmax.f32 %v1728_v5, 0.0  ;;  %v2049_v27 = vmax.f32 %v1729_v4, 0.0  ;;  %v508_v32 = vpop.f32.mrf.mxu0  ;;  %v1657_v16 = vunpack.c.l.bf16 %v985_v18 }
  0xd7   :  { %v677_v33 = vpop.f32.mrf.mxu1  ;;  %v1656_v34 = vunpack.c.l.bf16 %v976_v20 }
  0xd8   :  { %v828_v36 = vpack.c.bf16 %v677_v33, %v508_v32  ;;  %v4224_v37 = vpack.c.bf16 %v2048_v24, %v2046_v17  ;;  %v4226_v44 = vpack.c.bf16 %v2049_v27, %v2047_v31  ;;  %v1724_v47 = vadd.f32 %v1657_v16, %v1532_v29  ;;  %v928_v29 = vld [vmem:[#allocation5 + $0xa8] sm:$0xf] }
  0xd9   :  { %v1725_v48 = vadd.f32 %v1657_v16, %v1533_v30  ;;  %v1722_v14 = vadd.f32 %v1656_v34, %v1530_v6  ;;  %v1723_v52 = vadd.f32 %v1656_v34, %v1531_v28  ;;  %3541 = vmatmul.msk.bf16.gmra.mxu0 %vm377_vm2, %v3749_v21  ;;  %v1720_v17 = vadd.f32 %v4206_v35, %v1528_v0  ;;  %v944_v28 = vld [vmem:[#allocation5 + $0xe8] sm:$0xf] }
  0xda   :  { %v1539_v39 = vunpack.c.h.bf16 %v828_v36  ;;  %3573 = vmatmul.msk.bf16.gmra.mxu1 %vm377_vm2, %v3749_v21  ;;  %v2044_v63 = vmax.f32 %v1724_v47, 0.0  ;;  %v1538_v4 = vunpack.c.l.bf16 %v828_v36  ;;  %v1526_v21 = vunpack.c.l.bf16 %v4169_v1  ;;  %1474 = vperm.xlu0 %3821, %v944_v28   ;;  %v942_v28 = vld [vmem:[#allocation5 + $0xe0] sm:$0xf] }
  0xdb   :  { %v2045_v54 = vmax.f32 %v1725_v48, 0.0  ;;  %v2043_v57 = vmax.f32 %v1723_v52, 0.0  ;;  %v2042_v62 = vmax.f32 %v1722_v14, 0.0  ;;  %v953_v6 = vpop.permute.xlu1 %952  ;;  %v1527_v24 = vunpack.c.h.bf16 %v4169_v1  ;;  %1330 = vperm.xlu1 %3822, %v928_v29   ;;  %v932_v1 = vld [vmem:[#allocation5 + $0xb8] sm:$0xf]  ;;  %v3750_v52 = vld [vmem:[#allocation3 + $0x60] sm:$0xff] }
  0xdc   :  { %v1731_v5 = vadd.f32 %v1660_v40, %v1539_v39  ;;  %v958_v11 = vperm.slane %v953_v6, %v4197_v23  ;;  %v1730_v30 = vadd.f32 %v1660_v40, %v1538_v4  ;;  %v1030_v34 = vperm.slane %v4181_v9, %v4197_v23  ;;  %1366 = vperm.xlu2 %3823, %v932_v1   ;;  %v945_v6 = vld [vmem:[#allocation5 + $0xec] sm:$0xf]  ;;  %v941_v1 = vld [vmem:[#allocation5 + $0xdc] sm:$0xf] }
  0xdd   :  { %v4234_v12 = vpack.c.bf16 %v2044_v63, %v2042_v62  ;;  %v4236_v13 = vpack.c.bf16 %v2045_v54, %v2043_v57  ;;  %v2041_v35 = vmax.f32 %v4211_v38, 0.0  ;;  %v2040_v36 = vmax.f32 %v1720_v17, 0.0 }
  0xde   :  { %v510_v18 = vpop.f32.mrf.mxu0  ;;  %v1654_v27 = vunpack.c.l.bf16 %v958_v11  ;;  %v2051_v14 = vmax.f32 %v1731_v5, 0.0  ;;  %v2050_v40 = vmax.f32 %v1730_v30, 0.0  ;;  %v4248_v62 = vunpack.c.l.bf16 %v1030_v34  ;;  %v927_v5 = vld [vmem:[#allocation5 + $0xa4] sm:$0xf] }
  0xdf   :  { %v679_v20 = vpop.f32.mrf.mxu1  ;;  %v1048_v30 = vperm.slane %v4147_v49, %v4197_v23 }
  0xe0   :  { %v829_v7 = vpack.c.bf16 %v679_v20, %v510_v18  ;;  %v1718_v31 = vadd.f32 %v1654_v27, %v1526_v21  ;;  %v1719_v32 = vadd.f32 %v1654_v27, %v1527_v24  ;;  %v949_v18 = vld [vmem:[#allocation5 + $0xfc] sm:$0xf] }
  0xe2   :  { %v1540_v33 = vunpack.c.l.bf16 %v829_v7  ;;  %v1541_v16 = vunpack.c.h.bf16 %v829_v7  ;;  %v2039_v42 = vmax.f32 %v1719_v32, 0.0  ;;  %v2038_v48 = vmax.f32 %v1718_v31, 0.0  ;;  %1321 = vperm.xlu0 %3821, %v927_v5   ;;  %v924_v7 = vld [vmem:[#allocation5 + $0x98] sm:$0xf]  ;;  %v946_v31 = vld [vmem:[#allocation5 + $0xf0] sm:$0xf] }
  0xe3   :  { %1483 = vperm.xlu1 %3822, %v945_v6   ;;  %v922_v5 = vld [vmem:[#allocation5 + $0x90] sm:$0xf] }
  0xe4   :  { %v1733_v43 = vadd.f32 %v1661_v61, %v1541_v16  ;;  %v1732_v47 = vadd.f32 %v1661_v61, %v1540_v33  ;;  %v4244_v39 = vpack.c.bf16 %v2040_v36, %v2038_v48  ;;  %v4246_v57 = vpack.c.bf16 %v2041_v35, %v2039_v42  ;;  %1519 = vperm.xlu2 %3823, %v949_v18   ;;  %v3751_v33 = vld [vmem:[#allocation3 + $0x68] sm:$0xff]  ;;  %v926_v18 = vld [vmem:[#allocation5 + $0xa0] sm:$0xf] }
  0xe5   :  { %v1039_v61 = vperm.slane %v4179_v8, %v4197_v23  ;;  %v4270_v36 = vunpack.c.l.bf16 %v1048_v30  ;;  %v1057_v48 = vperm.slane %v4175_v3, %v4197_v23 }
  0xe6   :  { %v2052_v22 = vmax.f32 %v1732_v47, 0.0  ;;  %v2053_v54 = vmax.f32 %v1733_v43, 0.0  ;;  %v513_v9 = vpop.f32.mrf.mxu0  ;;  %v925_v47 = vld [vmem:[#allocation5 + $0x9c] sm:$0xf] }
  0xe7   :  { %v682_v38 = vpop.f32.mrf.mxu1  ;;  %v4262_v24 = vunpack.c.l.bf16 %v1039_v61 }
  0xe8   :  { %v4250_v63 = vpack.c.bf16 %v682_v38, %v513_v9  ;;  %v4252_v0 = vpack.c.bf16 %v2052_v22, %v2050_v40  ;;  %v4254_v4 = vpack.c.bf16 %v2053_v54, %v2051_v14  ;;  %v929_v40 = vld [vmem:[#allocation5 + $0xac] sm:$0xf]  ;;  %v4282_v54 = vunpack.c.l.bf16 %v1057_v48  ;;  %v938_v38 = vld [vmem:[#allocation5 + $0xd0] sm:$0xf]  ;;  %v936_v48 = vld [vmem:[#allocation5 + $0xc8] sm:$0xf] }
  0xe9   :  { %3542 = vmatmul.msk.bf16.gmra.mxu0 %vm377_vm2, %v3750_v52 }
  0xea   :  { %v1543_v11 = vunpack.c.h.bf16 %v4250_v63  ;;  %3574 = vmatmul.msk.bf16.gmra.mxu1 %vm377_vm2, %v3750_v52  ;;  %1294 = vperm.xlu0 %3821, %v924_v7  }
  0xeb   :  { %1456 = vperm.xlu1 %3822, %v942_v28  }
  0xec   :  { %v1735_v17 = vadd.f32 %v4248_v62, %v1543_v11  ;;  %1492 = vperm.xlu2 %3823, %v946_v31   ;;  %v1066_v11 = vperm.slane %v4141_v45, %v4197_v23  ;;  %v939_v31 = vld [vmem:[#allocation5 + $0xd4] sm:$0xf] }
  0xee   :  { %v515_v20 = vpop.f32.mrf.mxu0  ;;  %v2055_v32 = vmax.f32 %v1735_v17, 0.0  ;;  %v3752_v17 = vld [vmem:[#allocation3 + $0x70] sm:$0xff]  ;;  %v4290_v28 = vunpack.c.l.bf16 %v1066_v11 }
  0xef   :  { %v684_v21 = vpop.f32.mrf.mxu1 }
  0xf0   :  { %v4264_v27 = vpack.c.bf16 %v684_v21, %v515_v20 }
  0xf2   :  { %v1545_v29 = vunpack.c.h.bf16 %v4264_v27  ;;  %1447 = vperm.xlu0 %3821, %v941_v1  }
  0xf3   :  { %1303 = vperm.xlu1 %3822, %v925_v47  }
  0xf4   :  { %v1737_v8 = vadd.f32 %v4262_v24, %v1545_v29  ;;  %1339 = vperm.xlu2 %3823, %v929_v40   ;;  %v1084_v40 = vperm.slane %v4151_v51, %v4197_v23  ;;  %v1093_v51 = vperm.slane %v4159_v56, %v4197_v23 }
  0xf6   :  { %v2057_v16 = vmax.f32 %v1737_v8, 0.0  ;;  %v518_v34 = vpop.f32.mrf.mxu0  ;;  %v921_v8 = vld [vmem:[#allocation5 + $0x8c] sm:$0xf] }
  0xf7   :  { %v687_v35 = vpop.f32.mrf.mxu1 }
  0xf8   :  { %v4272_v42 = vpack.c.bf16 %v687_v35, %v518_v34  ;;  %v4274_v43 = vpack.c.bf16 %v2057_v16, %v2055_v32  ;;  %v1075_v32 = vperm.slane %v4143_v46, %v4197_v23  ;;  %v943_v16 = vld [vmem:[#allocation5 + $0xe4] sm:$0xf]  ;;  %v3753_v46 = vld [vmem:[#allocation3 + $0x78] sm:$0xff] }
  0xf9   :  { %3543 = vmatmul.msk.bf16.gmra.mxu0 %vm377_vm2, %v3751_v33 }
  0xfa   :  { %v1547_v49 = vunpack.c.h.bf16 %v4272_v42  ;;  %3575 = vmatmul.msk.bf16.gmra.mxu1 %vm377_vm2, %v3751_v33  ;;  %1420 = vperm.xlu0 %3821, %v938_v38   ;;  %v1667_v1 = vunpack.c.l.bf16 %v1075_v32  ;;  %v4304_v38 = vpop.permute.xlu0 %1123 }
  0xfb   :  { %1276 = vperm.xlu1 %3822, %v922_v5   ;;  %v940_v5 = vld [vmem:[#allocation5 + $0xd8] sm:$0xf] }
  0xfc   :  { %v1739_v14 = vadd.f32 %v4270_v36, %v1547_v49  ;;  %1312 = vperm.xlu2 %3823, %v926_v18   ;;  %v918_v49 = vld [vmem:[#allocation5 + $0x80] sm:$0xf] }
  0xfe   :  { %v520_v52 = vpop.f32.mrf.mxu0  ;;  %v2059_v61 = vmax.f32 %v1739_v14, 0.0 }
  0xff   :  { %v689_v22 = vpop.f32.mrf.mxu1 }
 0x100   :  { %v4284_v9 = vpack.c.bf16 %v689_v22, %v520_v52 }
 0x102   :  { %v1549_v6 = vunpack.c.h.bf16 %v4284_v9  ;;  %1267 = vperm.xlu0 %3821, %v921_v8   ;;  %v1548_v56 = vunpack.c.l.bf16 %v4284_v9 }
 0x103   :  { %1429 = vperm.xlu1 %3822, %v939_v31  }
 0x104   :  { %v1741_v3 = vadd.f32 %v4282_v54, %v1549_v6  ;;  %1465 = vperm.xlu2 %3823, %v943_v16   ;;  %v1669_v16 = vunpack.c.l.bf16 %v1093_v51 }
 0x106   :  { %v2061_v20 = vmax.f32 %v1741_v3, 0.0  ;;  %v523_v21 = vpop.f32.mrf.mxu0 }
 0x107   :  { %v692_v7 = vpop.f32.mrf.mxu1 }
 0x108   :  { %v4292_v29 = vpack.c.bf16 %v692_v7, %v523_v21  ;;  %v4294_v30 = vpack.c.bf16 %v2061_v20, %v2059_v61  ;;  %v1668_v61 = vunpack.c.l.bf16 %v1084_v40  ;;  %v935_v20 = vld [vmem:[#allocation5 + $0xc4] sm:$0xf]  ;;  %v2844_v40 = vld [vmem:[#allocation8 + $0x38] sm:$0xf] }
 0x109   :  { %3544 = vmatmul.msk.bf16.gmra.mxu0 %vm377_vm2, %v3752_v17  ;;  %v919_v21 = vld [vmem:[#allocation5 + $0x84] sm:$0xf] }
 0x10a   :  { %v1551_v45 = vunpack.c.h.bf16 %v4292_v29  ;;  %3576 = vmatmul.msk.bf16.gmra.mxu1 %vm377_vm2, %v3752_v17  ;;  %1240 = vperm.xlu0 %3821, %v918_v49   ;;  %v1097_v49 = vpop.permute.xlu0 %1096 }
 0x10b   :  { %1402 = vperm.xlu1 %3822, %v936_v48   ;;  %v1550_v48 = vunpack.c.l.bf16 %v4292_v29 }
 0x10c   :  { %v1743_v33 = vadd.f32 %v4290_v28, %v1551_v45  ;;  %1438 = vperm.xlu2 %3823, %v940_v5   ;;  %v923_v45 = vld [vmem:[#allocation5 + $0x94] sm:$0xf]  ;;  %v1102_v5 = vperm.slane %v1097_v49, %v4197_v23  ;;  %v1542_v49 = vunpack.c.l.bf16 %v4250_v63 }
 0x10e   :  { %v525_v34 = vpop.f32.mrf.mxu0  ;;  %v2063_v22 = vmax.f32 %v1743_v33, 0.0  ;;  %v1670_v9 = vunpack.c.l.bf16 %v1102_v5  ;;  %v1734_v5 = vadd.f32 %v4248_v62, %v1542_v49 }
 0x10f   :  { %v694_v35 = vpop.f32.mrf.mxu1 }
 0x110   :  { %v835_v47 = vpack.c.bf16 %v694_v35, %v525_v34 }
 0x112   :  { %v1553_v14 = vunpack.c.h.bf16 %v835_v47  ;;  %1393 = vperm.xlu0 %3821, %v935_v20   ;;  %v1552_v34 = vunpack.c.l.bf16 %v835_v47  ;;  %v1546_v47 = vunpack.c.l.bf16 %v4272_v42  ;;  %v1742_v20 = vadd.f32 %v4290_v28, %v1550_v48  ;;  %v2841_v28 = vld [vmem:[#allocation8 + $0x2c] sm:$0xf] }
 0x113   :  { %1249 = vperm.xlu1 %3822, %v919_v21  }
 0x114   :  { %v1745_v52 = vadd.f32 %v1667_v1, %v1553_v14  ;;  %1285 = vperm.xlu2 %3823, %v923_v45   ;;  %v2842_v14 = vld [vmem:[#allocation8 + $0x30] sm:$0xf]  ;;  %v920_v45 = vld [vmem:[#allocation5 + $0x88] sm:$0xf] }
 0x116   :  { %v2065_v6 = vmax.f32 %v1745_v52, 0.0  ;;  %v528_v11 = vpop.f32.mrf.mxu0 }
 0x117   :  { %v697_v3 = vpop.f32.mrf.mxu1 }
 0x118   :  { %v836_v17 = vpack.c.bf16 %v697_v3, %v528_v11  ;;  %v4306_v18 = vpack.c.bf16 %v2065_v6, %v2063_v22  ;;  %v1744_v3 = vadd.f32 %v1667_v1, %v1552_v34 }
 0x119   :  { %3545 = vmatmul.msk.bf16.gmra.mxu0 %vm377_vm2, %v3753_v46 }
 0x11a   :  { %v1555_v7 = vunpack.c.h.bf16 %v836_v17  ;;  %3577 = vmatmul.msk.bf16.gmra.mxu1 %vm377_vm2, %v3753_v46  ;;  %v1554_v31 = vunpack.c.l.bf16 %v836_v17  ;;  %2956 = vperm.xlu0 %3821, %v2842_v14   ;;  %v3754_v17 = vld [vmem:[#allocation3 + $0x80] sm:$0xff]  ;;  %v2064_v34 = vmax.f32 %v1744_v3, 0.0  ;;  %v1738_v14 = vadd.f32 %v4270_v36, %v1546_v47 }
 0x11b   :  { %2974 = vperm.xlu1 %3822, %v2844_v40  }
 0x11c   :  { %v1747_v8 = vadd.f32 %v1668_v61, %v1555_v7  ;;  %v1746_v46 = vadd.f32 %v1668_v61, %v1554_v31  ;;  %v1544_v61 = vunpack.c.l.bf16 %v4264_v27  ;;  %1258 = vperm.xlu2 %3823, %v920_v45   ;;  %v2062_v27 = vmax.f32 %v1742_v20, 0.0  ;;  %v2836_v20 = vld [vmem:[#allocation8 + $0x18] sm:$0xf] }
 0x11d   :  { %v2058_v63 = vmax.f32 %v1738_v14, 0.0 }
 0x11e   :  { %v530_v32 = vpop.f32.mrf.mxu0  ;;  %v2067_v29 = vmax.f32 %v1747_v8, 0.0  ;;  %v2066_v7 = vmax.f32 %v1746_v46, 0.0  ;;  %v2843_v8 = vld [vmem:[#allocation8 + $0x34] sm:$0xf] }
 0x11f   :  { %v699_v33 = vpop.f32.mrf.mxu1 }
 0x120   :  { %v837_v35 = vpack.c.bf16 %v699_v33, %v530_v32  ;;  %v1740_v33 = vadd.f32 %v4282_v54, %v1548_v56  ;;  %v1736_v54 = vadd.f32 %v4262_v24, %v1544_v61  ;;  %v1120_v61 = vperm.slane %v4193_v19, %v4197_v23  ;;  %v2835_v19 = vld [vmem:[#allocation8 + $0x14] sm:$0xf] }
 0x122   :  { %v1556_v52 = vunpack.c.l.bf16 %v837_v35  ;;  %v1557_v22 = vunpack.c.h.bf16 %v837_v35  ;;  %v1106_v35 = vpop.permute.xlu1 %1105  ;;  %2947 = vperm.xlu0 %3821, %v2841_v28   ;;  %v2060_v46 = vmax.f32 %v1740_v33, 0.0  ;;  %v2056_v24 = vmax.f32 %v1736_v54, 0.0  ;;  %v2837_v54 = vld [vmem:[#allocation8 + $0x1c] sm:$0xf] }
 0x123   :  { %2965 = vperm.xlu1 %3822, %v2843_v8  }
 0x124   :  { %v1749_v6 = vadd.f32 %v1669_v16, %v1557_v22  ;;  %v1748_v11 = vadd.f32 %v1669_v16, %v1556_v52  ;;  %v2178_v52 = vpack.c.bf16 %v2064_v34, %v2062_v27  ;;  %v1111_v22 = vperm.slane %v1106_v35, %v4197_v23 }
 0x126   :  { %v2069_v21 = vmax.f32 %v1749_v6, 0.0  ;;  %v2068_v51 = vmax.f32 %v1748_v11, 0.0  ;;  %v533_v31 = vpop.f32.mrf.mxu0  ;;  %v937_v6 = vld [vmem:[#allocation5 + $0xcc] sm:$0xf]  ;;  %v1671_v36 = vunpack.c.l.bf16 %v1111_v22 }
 0x127   :  { %v702_v32 = vpop.f32.mrf.mxu1  ;;  %1411 = vperm.xlu2 %3823, %v937_v6   ;;  %v2845_v6 = vld [vmem:[#allocation8 + $0x3c] sm:$0xf] }
 0x128   :  { %v838_v1 = vpack.c.bf16 %v702_v32, %v533_v31  ;;  %v2180_v16 = vpack.c.bf16 %v2068_v51, %v2066_v7  ;;  %v4319_v42 = vpack.c.bf16 %v2069_v21, %v2067_v29  ;;  %v2838_v29 = vld [vmem:[#allocation8 + $0x20] sm:$0xf]  ;;  %v2054_v51 = vmax.f32 %v1734_v5, 0.0 }
 0x129   :  { %3546 = vmatmul.msk.bf16.gmra.mxu0 %vm377_vm2, %v3754_v17  ;;  %v934_v32 = vld [vmem:[#allocation5 + $0xc0] sm:$0xf] }
 0x12a   :  { %v1559_v48 = vunpack.c.h.bf16 %v838_v1  ;;  %2422 = vmatpush.bf16.msra.mxu2 %v2180_v16  ;;  %3578 = vmatmul.msk.bf16.gmra.mxu1 %vm377_vm2, %v3754_v17  ;;  %v1558_v56 = vunpack.c.l.bf16 %v838_v1  ;;  %v2176_v17 = vpack.c.bf16 %v2060_v46, %v2058_v63  ;;  %v2174_v31 = vpack.c.bf16 %v2056_v24, %v2054_v51  ;;  %v3755_v16 = vld [vmem:[#allocation3 + $0x88] sm:$0xff] }
 0x12b   :  { %2902 = vperm.xlu0 %3821, %v2836_v20   ;;  %2920 = vperm.xlu1 %3822, %v2838_v29  }
 0x12c   :  { %v1751_v40 = vadd.f32 %v1670_v9, %v1559_v48  ;;  %v1750_v45 = vadd.f32 %v1670_v9, %v1558_v56  ;;  %v1672_v48 = vunpack.c.l.bf16 %v1120_v61 }
 0x12e   :  { %2423 = vmatpush.bf16.msra.mxu2 %v2178_v52  ;;  %v535_v11 = vpop.f32.mrf.mxu0  ;;  %v2071_v1 = vmax.f32 %v1751_v40, 0.0  ;;  %v2070_v34 = vmax.f32 %v1750_v45, 0.0  ;;  %v1129_v40 = vperm.slane %v4304_v38, %v4197_v23  ;;  %v1138_v38 = vperm.slane %v4213_v41, %v4197_v23  ;;  %v3173_v41 = vld [vmem:[%s5181_s6 + $0x18] sm:$0xff] }
 0x12f   :  { %v704_v3 = vpop.f32.mrf.mxu1  ;;  %1384 = vperm.xlu2 %3823, %v934_v32  }
 0x130   :  { %v839_v47 = vpack.c.bf16 %v704_v3, %v535_v11  ;;  %v1673_v11 = vunpack.c.l.bf16 %v1129_v40 }
 0x132   :  { %v1560_v21 = vunpack.c.l.bf16 %v839_v47  ;;  %v1561_v7 = vunpack.c.h.bf16 %v839_v47  ;;  %2424 = vmatpush.bf16.msra.mxu2 %v2176_v17  ;;  %v2832_v47 = vld [vmem:[#allocation8 + $0x8] sm:$0xf] }
 0x133   :  { %2893 = vperm.xlu0 %3821, %v2835_v19   ;;  %2911 = vperm.xlu1 %3822, %v2837_v54   ;;  %v4355_v54 = vpop.permute.xlu0 %1375 }
 0x134   :  { %v1753_v62 = vadd.f32 %v1671_v36, %v1561_v7  ;;  %v1752_v33 = vadd.f32 %v1671_v36, %v1560_v21  ;;  %v2830_v36 = vld [vmem:[#allocation8] sm:$0xf]  ;;  %v3756_v21 = vld [vmem:[#allocation3 + $0x90] sm:$0xff] }
 0x136   :  { %2425 = vmatpush.bf16.msra.mxu2 %v2174_v31  ;;  %v2072_v35 = vmax.f32 %v1752_v33, 0.0  ;;  %v2073_v28 = vmax.f32 %v1753_v62, 0.0  ;;  %v538_v8 = vpop.f32.mrf.mxu0  ;;  %v1674_v31 = vunpack.c.l.bf16 %v1138_v38 }
 0x137   :  { %v707_v49 = vpop.f32.mrf.mxu1  ;;  %2983 = vperm.xlu2 %3823, %v2845_v6   ;;  %v2834_v6 = vld [vmem:[#allocation8 + $0x10] sm:$0xf] }
 0x138   :  { %v840_v9 = vpack.c.bf16 %v707_v49, %v538_v8  ;;  %v4330_v27 = vpack.c.bf16 %v2072_v35, %v2070_v34  ;;  %v4332_v14 = vpack.c.bf16 %v2073_v28, %v2071_v1  ;;  %v2831_v1 = vld [vmem:[#allocation8 + $0x4] sm:$0xf]  ;;  %v1147_v34 = vperm.slane %v4183_v10, %v4197_v23 }
 0x139   :  { %3547 = vmatmul.msk.bf16.gmra.mxu0 %vm377_vm2, %v3755_v16 }
 0x13a   :  { %5199 = vst [vmem:[#allocation19_spill] sm:$0xff] %v4332_v14  ;;  %v1562_v52 = vunpack.c.l.bf16 %v840_v9  ;;  %v1563_v22 = vunpack.c.h.bf16 %v840_v9  ;;  %2426 = vmatpush.bf16.msra.mxu2 %v4252_v0  ;;  %3579 = vmatmul.msk.bf16.gmra.mxu1 %vm377_vm2, %v3755_v16  ;;  %v1675_v9 = vunpack.c.l.bf16 %v1147_v34  ;;  %v3762_v14 = vld [vmem:[#allocation3 + $0xc0] sm:$0xff] }
 0x13b   :  { %2848 = vperm.xlu0 %3821, %v2830_v36   ;;  %2866 = vperm.xlu1 %3822, %v2832_v47  }
 0x13c   :  { %v1755_v46 = vadd.f32 %v1672_v48, %v1563_v22  ;;  %v1754_v56 = vadd.f32 %v1672_v48, %v1562_v52  ;;  %v2839_v48 = vld [vmem:[#allocation8 + $0x24] sm:$0xf]  ;;  %v3258_v52 = vld [vmem:[#allocation11] sm:$0xff] }
 0x13d   :  { %v3170_v22 = vld [vmem:[%s5181_s6] sm:$0xff] }
 0x13e   :  { %2427 = vmatpush.bf16.msra.mxu2 %v4224_v37  ;;  %v540_v63 = vpop.f32.mrf.mxu0  ;;  %v2840_v37 = vld [vmem:[#allocation8 + $0x28] sm:$0xf]  ;;  %v2075_v29 = vmax.f32 %v1755_v46, 0.0  ;;  %v2074_v7 = vmax.f32 %v1754_v56, 0.0  ;;  %v4360_v56 = vpop.permute.xlu1 %1510 }
 0x13f   :  { %v709_v5 = vpop.f32.mrf.mxu1  ;;  %2938 = vperm.xlu2 %3823, %v2840_v37   ;;  %5201 = vst [vmem:[#allocation21_spill] sm:$0xff] %v4360_v56 }
 0x140   :  { %v841_v3 = vpack.c.bf16 %v709_v5, %v540_v63  ;;  %v1156_v5 = vperm.slane %v4200_v25, %v4197_v23  ;;  %v4369_v25 = vpop.permute.xlu0 %1348 }
 0x142   :  { %v1564_v0 = vunpack.c.l.bf16 %v841_v3  ;;  %v1565_v17 = vunpack.c.h.bf16 %v841_v3  ;;  %2428 = vmatpush.bf16.msra.mxu2 %v4234_v12  ;;  %v3757_v3 = vld [vmem:[#allocation3 + $0x98] sm:$0xff]  ;;  %v1676_v37 = vunpack.c.l.bf16 %v1156_v5 }
 0x143   :  { %3191 = vperm.xlu0 %3821, %v3173_v41   ;;  %2857 = vperm.xlu1 %3822, %v2831_v1   ;;  %v2833_v1 = vld [vmem:[#allocation8 + $0xc] sm:$0xf] }
 0x144   :  { %v1757_v24 = vadd.f32 %v1673_v11, %v1565_v17  ;;  %v1756_v20 = vadd.f32 %v1673_v11, %v1564_v0 }
 0x146   :  { %2429 = vmatpush.bf16.msra.mxu2 %v4244_v39  ;;  %v2076_v51 = vmax.f32 %v1756_v20, 0.0  ;;  %v2077_v45 = vmax.f32 %v1757_v24, 0.0  ;;  %v543_v61 = vpop.f32.mrf.mxu0 }
 0x147   :  { %v712_v62 = vpop.f32.mrf.mxu1  ;;  %2929 = vperm.xlu2 %3823, %v2839_v48  }
 0x148   :  { %v842_v32 = vpack.c.bf16 %v712_v62, %v543_v61  ;;  %v4344_v12 = vpack.c.bf16 %v2076_v51, %v2074_v7  ;;  %v4346_v33 = vpack.c.bf16 %v2077_v45, %v2075_v29  ;;  %v3259_v7 = vld [vmem:[#allocation11 + $0x8] sm:$0xff]  ;;  %v4372_v61 = vpop.permute.xlu1 %1357  ;;  %v1165_v62 = vperm.slane %v4202_v26, %v4197_v23  ;;  %v3172_v26 = vld [vmem:[%s5181_s6 + $0x10] sm:$0xff] }
 0x149   :  { %3548 = vmatmul.msk.bf16.gmra.mxu0 %vm377_vm2, %v3756_v21 }
 0x14a   :  { %5200 = vst [vmem:[#allocation20_spill] sm:$0xff] %v4346_v33  ;;  %v1566_v16 = vunpack.c.l.bf16 %v842_v32  ;;  %v1567_v39 = vunpack.c.h.bf16 %v842_v32  ;;  %3580 = vmatmul.msk.bf16.gmra.mxu1 %vm377_vm2, %v3756_v21  ;;  %v3312_v21 = vld [vmem:[#allocation13 + $0x8] sm:$0xff] }
 0x14b   :  { %3262 = vperm.xlu0 %3821, %v3258_v52   ;;  %3176 = vperm.xlu1 %3822, %v3170_v22  }
 0x14c   :  { %v1759_v35 = vadd.f32 %v1674_v31, %v1567_v39  ;;  %v1758_v28 = vadd.f32 %v1674_v31, %v1566_v16  ;;  %v1677_v39 = vunpack.c.l.bf16 %v1165_v62 }
 0x14e   :  { %v545_v8 = vpop.f32.mrf.mxu0  ;;  %v2079_v11 = vmax.f32 %v1759_v35, 0.0  ;;  %v2078_v36 = vmax.f32 %v1758_v28, 0.0 }
 0x14f   :  { %v714_v49 = vpop.f32.mrf.mxu1  ;;  %2884 = vperm.xlu2 %3823, %v2834_v6  }
 0x150   :  { %v843_v19 = vpack.c.bf16 %v714_v49, %v545_v8  ;;  %v4376_v8 = vpop.permute.xlu0 %1501  ;;  %v1174_v49 = vperm.slane %v4161_v58, %v4197_v23  ;;  %v4383_v52 = vpop.permute.xlu1 %1330 }
 0x151   :  { %5203 = vst [vmem:[#allocation23_spill] sm:$0xff] %v4376_v8 }
 0x152   :  { %v1568_v40 = vunpack.c.l.bf16 %v843_v19  ;;  %v1569_v46 = vunpack.c.h.bf16 %v843_v19  ;;  %v3758_v19 = vld [vmem:[#allocation3 + $0xa0] sm:$0xff]  ;;  %v1678_v6 = vunpack.c.l.bf16 %v1174_v49 }
 0x153   :  { %3320 = vperm.xlu0 %3821, %v3312_v21   ;;  %3267 = vperm.xlu1 %3822, %v3259_v7   ;;  %v3171_v7 = vld [vmem:[%s5181_s6 + $0x8] sm:$0xff] }
 0x154   :  { %v1761_v10 = vadd.f32 %v1675_v9, %v1569_v46  ;;  %v1760_v63 = vadd.f32 %v1675_v9, %v1568_v40 }
 0x156   :  { %v2080_v47 = vmax.f32 %v1760_v63, 0.0  ;;  %v2081_v0 = vmax.f32 %v1761_v10, 0.0  ;;  %v548_v17 = vpop.f32.mrf.mxu0 }
 0x157   :  { %v717_v38 = vpop.f32.mrf.mxu1  ;;  %2875 = vperm.xlu2 %3823, %v2833_v1  }
 0x158   :  { %v4364_v24 = vpack.c.bf16 %v2080_v47, %v2078_v36  ;;  %v4366_v20 = vpack.c.bf16 %v2081_v0, %v2079_v11  ;;  %v844_v29 = vpack.c.bf16 %v717_v38, %v548_v17  ;;  %v4389_v36 = vpop.permute.xlu2 %1366  ;;  %v1183_v17 = vperm.slane %v4189_v15, %v4197_v23 }
 0x159   :  { %3549 = vmatmul.msk.bf16.gmra.mxu0 %vm377_vm2, %v3757_v3  ;;  %v1192_v15 = vperm.slane %v4173_v2, %v4197_v23 }
 0x15a   :  { %5202 = vst [vmem:[#allocation22_spill] sm:$0xff] %v4366_v20  ;;  %v1570_v51 = vunpack.c.l.bf16 %v844_v29  ;;  %v1571_v45 = vunpack.c.h.bf16 %v844_v29  ;;  %3581 = vmatmul.msk.bf16.gmra.mxu1 %vm377_vm2, %v3757_v3  ;;  %v4395_v29 = vpop.permute.xlu0 %1474  ;;  %v1679_v62 = vunpack.c.l.bf16 %v1183_v17 }
 0x15b   :  { %5205 = vst [vmem:[#allocation25_spill] sm:$0xff] %v4395_v29 }
 0x15c   :  { %v1763_v31 = vadd.f32 %v1676_v37, %v1571_v45  ;;  %v1762_v32 = vadd.f32 %v1676_v37, %v1570_v51  ;;  %v4400_v45 = vpop.permute.xlu1 %1483 }
 0x15d   :  { %5206 = vst [vmem:[#allocation26_spill] sm:$0xff] %v4400_v45 }
 0x15e   :  { %v550_v41 = vpop.f32.mrf.mxu0  ;;  %v2083_v22 = vmax.f32 %v1763_v31, 0.0  ;;  %v2082_v46 = vmax.f32 %v1762_v32, 0.0 }
 0x15f   :  { %v719_v16 = vpop.f32.mrf.mxu1  ;;  %3186 = vperm.xlu2 %3823, %v3172_v26  }
 0x160   :  { %v845_v34 = vpack.c.bf16 %v719_v16, %v550_v41  ;;  %v4402_v1 = vpop.permute.xlu2 %1519 }
 0x161   :  { %5207 = vst [vmem:[#allocation27_spill] sm:$0xff] %v4402_v1 }
 0x162   :  { %v1572_v35 = vunpack.c.l.bf16 %v845_v34  ;;  %v1573_v28 = vunpack.c.h.bf16 %v845_v34 }
 0x164   :  { %v1765_v48 = vadd.f32 %v1677_v39, %v1573_v28  ;;  %v1764_v9 = vadd.f32 %v1677_v39, %v1572_v35  ;;  %v3311_v39 = vld [vmem:[#allocation13] sm:$0xff]  ;;  %v3759_v35 = vld [vmem:[#allocation3 + $0xa8] sm:$0xff]  ;;  %v4413_v2 = vpop.permute.xlu1 %1456 }
 0x166   :  { %v553_v40 = vpop.f32.mrf.mxu0  ;;  %v2084_v10 = vmax.f32 %v1764_v9, 0.0  ;;  %v2085_v63 = vmax.f32 %v1765_v48, 0.0 }
 0x167   :  { %v722_v5 = vpop.f32.mrf.mxu1  ;;  %3181 = vperm.xlu2 %3823, %v3171_v7  }
 0x168   :  { %v846_v11 = vpack.c.bf16 %v722_v5, %v553_v40  ;;  %v4385_v3 = vpack.c.bf16 %v2084_v10, %v2082_v46  ;;  %v4387_v58 = vpack.c.bf16 %v2085_v63, %v2083_v22  ;;  %v4406_v22 = vpop.permute.xlu0 %1321  ;;  %v1680_v40 = vunpack.c.l.bf16 %v1192_v15 }
 0x169   :  { %3550 = vmatmul.msk.bf16.gmra.mxu0 %vm377_vm2, %v3758_v19 }
 0x16a   :  { %5204 = vst [vmem:[#allocation24_spill] sm:$0xff] %v4387_v58  ;;  %v1574_v47 = vunpack.c.l.bf16 %v846_v11  ;;  %v1575_v0 = vunpack.c.h.bf16 %v846_v11  ;;  %3582 = vmatmul.msk.bf16.gmra.mxu1 %vm377_vm2, %v3758_v19 }
 0x16c   :  { %v1767_v38 = vadd.f32 %v1678_v6, %v1575_v0  ;;  %v1766_v37 = vadd.f32 %v1678_v6, %v1574_v47  ;;  %v1201_v6 = vperm.slane %v4153_v53, %v4197_v23  ;;  %v4418_v47 = vpop.permute.xlu2 %1492 }
 0x16d   :  { %5209 = vst [vmem:[#allocation29_spill] sm:$0xff] %v4418_v47 }
 0x16e   :  { %v555_v21 = vpop.f32.mrf.mxu0  ;;  %v2087_v28 = vmax.f32 %v1767_v38, 0.0  ;;  %v2086_v48 = vmax.f32 %v1766_v37, 0.0  ;;  %v1681_v37 = vunpack.c.l.bf16 %v1201_v6  ;;  %v1219_v6 = vperm.slane %v4163_v59, %v4197_v23  ;;  %v3761_v59 = vld [vmem:[#allocation3 + $0xb8] sm:$0xff] }
 0x16f   :  { %v724_v51 = vpop.f32.mrf.mxu1  ;;  %3315 = vperm.xlu2 %3823, %v3311_v39  }
 0x170   :  { %v847_v31 = vpack.c.bf16 %v724_v51, %v555_v21  ;;  %v4420_v7 = vpop.permute.xlu0 %1294 }
 0x172   :  { %v1576_v32 = vunpack.c.l.bf16 %v847_v31  ;;  %v1577_v41 = vunpack.c.h.bf16 %v847_v31  ;;  %v4422_v31 = vpop.permute.xlu1 %1303 }
 0x174   :  { %v1769_v16 = vadd.f32 %v1679_v62, %v1577_v41  ;;  %v1768_v34 = vadd.f32 %v1679_v62, %v1576_v32  ;;  %v1210_v41 = vperm.slane %v4165_v60, %v4197_v23 }
 0x176   :  { %v558_v49 = vpop.f32.mrf.mxu0  ;;  %v2088_v26 = vmax.f32 %v1768_v34, 0.0  ;;  %v2089_v9 = vmax.f32 %v1769_v16, 0.0  ;;  %v3760_v16 = vld [vmem:[#allocation3 + $0xb0] sm:$0xff] }
 0x177   :  { %v727_v19 = vpop.f32.mrf.mxu1 }
 0x178   :  { %v848_v46 = vpack.c.bf16 %v727_v19, %v558_v49  ;;  %v4408_v10 = vpack.c.bf16 %v2088_v26, %v2086_v48  ;;  %v4410_v63 = vpack.c.bf16 %v2089_v9, %v2087_v28  ;;  %v4426_v28 = vpop.permute.xlu2 %1339  ;;  %v1682_v9 = vunpack.c.l.bf16 %v1210_v41 }
 0x179   :  { %3551 = vmatmul.msk.bf16.gmra.mxu0 %vm377_vm2, %v3759_v35 }
 0x17a   :  { %5208 = vst [vmem:[#allocation28_spill] sm:$0xff] %v4410_v63  ;;  %v1579_v5 = vunpack.c.h.bf16 %v848_v46  ;;  %3583 = vmatmul.msk.bf16.gmra.mxu1 %vm377_vm2, %v3759_v35  ;;  %v1578_v17 = vunpack.c.l.bf16 %v848_v46  ;;  %v3596_v63 = vld [vmem:[#allocation7] sm:$0xf] }
 0x17c   :  { %v1771_v11 = vadd.f32 %v1680_v40, %v1579_v5  ;;  %v1770_v32 = vadd.f32 %v1680_v40, %v1578_v17  ;;  %v4434_v5 = vpop.permute.xlu0 %1447 }
 0x17e   :  { %v560_v0 = vpop.f32.mrf.mxu0  ;;  %v2091_v35 = vmax.f32 %v1771_v11, 0.0  ;;  %v2090_v48 = vmax.f32 %v1770_v32, 0.0 }
 0x17f   :  { %v729_v38 = vpop.f32.mrf.mxu1 }
 0x180   :  { %v849_v21 = vpack.c.bf16 %v729_v38, %v560_v0  ;;  %v4438_v0 = vpop.permute.xlu1 %1276 }
 0x182   :  { %v1580_v51 = vunpack.c.l.bf16 %v849_v21  ;;  %v1581_v62 = vunpack.c.h.bf16 %v849_v21  ;;  %v1683_v21 = vunpack.c.l.bf16 %v1219_v6 }
 0x184   :  { %v1773_v15 = vadd.f32 %v1681_v37, %v1581_v62  ;;  %v1772_v53 = vadd.f32 %v1681_v37, %v1580_v51  ;;  %v4440_v62 = vpop.permute.xlu2 %1312 }
 0x186   :  { %v563_v39 = vpop.f32.mrf.mxu0  ;;  %v2092_v34 = vmax.f32 %v1772_v53, 0.0  ;;  %v2093_v26 = vmax.f32 %v1773_v15, 0.0  ;;  %v1228_v53 = vperm.slane %v4149_v50, %v4197_v23 }
 0x187   :  { %v732_v49 = vpop.f32.mrf.mxu1 }
 0x188   :  { %v850_v19 = vpack.c.bf16 %v732_v49, %v563_v39  ;;  %v4429_v46 = vpack.c.bf16 %v2092_v34, %v2090_v48  ;;  %v4431_v40 = vpack.c.bf16 %v2093_v26, %v2091_v35  ;;  %v4444_v34 = vpop.permute.xlu0 %1420  ;;  %v4446_v6 = vpop.permute.xlu1 %1429 }
 0x189   :  { %3552 = vmatmul.msk.bf16.gmra.mxu0 %vm377_vm2, %v3760_v16 }
 0x18a   :  { %5210 = vst [vmem:[#allocation30_spill] sm:$0xff] %v4431_v40  ;;  %v1583_v60 = vunpack.c.h.bf16 %v850_v19  ;;  %3584 = vmatmul.msk.bf16.gmra.mxu1 %vm377_vm2, %v3760_v16  ;;  %v1582_v17 = vunpack.c.l.bf16 %v850_v19  ;;  %v3772_v40 = vld [vmem:[#allocation7 + $0xc] sm:$0xf0] }
 0x18c   :  { %v1775_v11 = vadd.f32 %v1682_v9, %v1583_v60  ;;  %v1774_v15 = vadd.f32 %v1682_v9, %v1582_v17  ;;  %v4452_v17 = vpop.permute.xlu2 %1465 }
 0x18e   :  { %v565_v38 = vpop.f32.mrf.mxu0  ;;  %v2095_v35 = vmax.f32 %v1775_v11, 0.0  ;;  %v2094_v48 = vmax.f32 %v1774_v15, 0.0  ;;  %v1237_v11 = vperm.slane %v4157_v55, %v4197_v23 }
 0x18f   :  { %v734_v37 = vpop.f32.mrf.mxu1 }
 0x190   :  { %v851_v51 = vpack.c.bf16 %v734_v37, %v565_v38  ;;  %v1684_v38 = vunpack.c.l.bf16 %v1228_v53  ;;  %v4456_v15 = vpop.permute.xlu0 %1267 }
 0x192   :  { %v1584_v32 = vunpack.c.l.bf16 %v851_v51  ;;  %v1585_v41 = vunpack.c.h.bf16 %v851_v51 }
 0x194   :  { %v1777_v16 = vadd.f32 %v1683_v21, %v1585_v41  ;;  %v1776_v39 = vadd.f32 %v1683_v21, %v1584_v32 }
 0x196   :  { %v568_v49 = vpop.f32.mrf.mxu0  ;;  %v2096_v26 = vmax.f32 %v1776_v39, 0.0  ;;  %v2097_v19 = vmax.f32 %v1777_v16, 0.0  ;;  %v1685_v16 = vunpack.c.l.bf16 %v1237_v11 }
 0x197   :  { %v737_v60 = vpop.f32.mrf.mxu1 }
 0x198   :  { %v852_v37 = vpack.c.bf16 %v737_v60, %v568_v49  ;;  %v2194_v51 = vpack.c.bf16 %v2096_v26, %v2094_v48  ;;  %v4448_v9 = vpack.c.bf16 %v2097_v19, %v2095_v35  ;;  %v4458_v35 = vpop.permute.xlu1 %1402  ;;  %v4460_v60 = vpop.permute.xlu2 %1438 }
 0x199   :  { %3553 = vmatmul.msk.bf16.gmra.mxu0 %vm377_vm2, %v3761_v59 }
 0x19a   :  { %5211 = vst [vmem:[#allocation31_spill] sm:$0xff] %v4448_v9  ;;  %v1587_v50 = vunpack.c.h.bf16 %v852_v37  ;;  %3585 = vmatmul.msk.bf16.gmra.mxu1 %vm377_vm2, %v3761_v59  ;;  %v1586_v32 = vunpack.c.l.bf16 %v852_v37  ;;  %v1241_v9 = vpop.permute.xlu0 %1240 }
 0x19c   :  { %v1779_v21 = vadd.f32 %v1684_v38, %v1587_v50  ;;  %v1778_v26 = vadd.f32 %v1684_v38, %v1586_v32  ;;  %v1246_v32 = vperm.slane %v1241_v9, %v4197_v23 }
 0x19e   :  { %v570_v41 = vpop.f32.mrf.mxu0  ;;  %v2098_v50 = vmax.f32 %v1778_v26, 0.0  ;;  %v2099_v20 = vmax.f32 %v1779_v21, 0.0 }
 0x19f   :  { %v739_v53 = vpop.f32.mrf.mxu1 }
 0x1a0   :  { %v853_v39 = vpack.c.bf16 %v739_v53, %v570_v41  ;;  %v4462_v53 = vor.u32 %v3772_v40, %v3596_v63  ;;  %v4471_v40 = vpop.permute.xlu2 %1285 }
 0x1a2   :  { %v1588_v49 = vunpack.c.l.bf16 %v853_v39  ;;  %v1589_v48 = vunpack.c.h.bf16 %v853_v39  ;;  %5212 = vst [vmem:[#allocation32_spill] sm:$0xff] %v4462_v53  ;;  %2430 = vmatmul.bf16.vlgmr.msra.gmra.mxu2 %v4462_v53  ;;  %v1686_v39 = vunpack.c.l.bf16 %v1246_v32  ;;  %v3612_v53 = vld [vmem:[#allocation7 + $0x20] sm:$0xf] }
 0x1a4   :  { %v1781_v19 = vadd.f32 %v1685_v16, %v1589_v48  ;;  %v1780_v59 = vadd.f32 %v1685_v16, %v1588_v49  ;;  %v1250_v16 = vpop.permute.xlu1 %1249 }
 0x1a5   :  { %v1255_v21 = vperm.slane %v1250_v16, %v4197_v23 }
 0x1a6   :  { %v2101_v33 = vmax.f32 %v1781_v19, 0.0  ;;  %v573_v55 = vpop.f32.mrf.mxu0  ;;  %v2100_v37 = vmax.f32 %v1780_v59, 0.0 }
 0x1a7   :  { %v742_v58 = vpop.f32.mrf.mxu1 }
 0x1a8   :  { %v854_v11 = vpack.c.bf16 %v742_v58, %v573_v55  ;;  %v2196_v41 = vpack.c.bf16 %v2100_v37, %v2098_v50  ;;  %v4465_v38 = vpack.c.bf16 %v2101_v33, %v2099_v20  ;;  %v1687_v33 = vunpack.c.l.bf16 %v1255_v21  ;;  %v3763_v50 = vld [vmem:[#allocation3 + $0xc8] sm:$0xff]  ;;  %v3776_v21 = vld [vmem:[#allocation7 + $0x2c] sm:$0xf0] }
 0x1a9   :  { %3554 = vmatmul.msk.bf16.gmra.mxu0 %vm377_vm2, %v3762_v14 }
 0x1aa   :  { %5213 = vst [vmem:[#allocation33_spill] sm:$0xff] %v4465_v38  ;;  %3586 = vmatmul.msk.bf16.gmra.mxu1 %vm377_vm2, %v3762_v14  ;;  %2471 = vmatpush.bf16.msra.mxu3 %v2196_v41  ;;  %v1590_v58 = vunpack.c.l.bf16 %v854_v11  ;;  %v1591_v49 = vunpack.c.h.bf16 %v854_v11 }
 0x1ac   :  { %v1782_v14 = vadd.f32 %v1686_v39, %v1590_v58  ;;  %v1783_v19 = vadd.f32 %v1686_v39, %v1591_v49  ;;  %v1273_v58 = vperm.slane %v4456_v15, %v4197_v23 }
 0x1ae   :  { %2472 = vmatpush.bf16.msra.mxu3 %v2194_v51  ;;  %v575_v63 = vpop.f32.mrf.mxu0  ;;  %v2102_v51 = vmax.f32 %v1782_v14, 0.0  ;;  %v2103_v16 = vmax.f32 %v1783_v19, 0.0  ;;  %v1689_v14 = vunpack.c.l.bf16 %v1273_v58 }
 0x1af   :  { %v744_v48 = vpop.f32.mrf.mxu1 }
 0x1b0   :  { %v855_v20 = vpack.c.bf16 %v744_v48, %v575_v63  ;;  %v4475_v48 = vor.u32 %v3776_v21, %v3612_v53 }
 0x1b2   :  { %v1592_v26 = vunpack.c.l.bf16 %v855_v20  ;;  %v1593_v9 = vunpack.c.h.bf16 %v855_v20  ;;  %2473 = vmatpush.bf16.msra.mxu3 %v4429_v46  ;;  %5214 = vst [vmem:[#allocation34_spill] sm:$0xff] %v4475_v48  ;;  %v1259_v46 = vpop.permute.xlu2 %1258  ;;  %2435 = vmatmul.bf16.gmra.mxu2 %v4475_v48 }
 0x1b4   :  { %v1785_v59 = vadd.f32 %v1687_v33, %v1593_v9  ;;  %v1784_v55 = vadd.f32 %v1687_v33, %v1592_v26 }
 0x1b6   :  { %2474 = vmatpush.bf16.msra.mxu3 %v4408_v10  ;;  %v578_v37 = vpop.f32.mrf.mxu0  ;;  %v2104_v41 = vmax.f32 %v1784_v55, 0.0  ;;  %v2105_v32 = vmax.f32 %v1785_v59, 0.0  ;;  %v1264_v10 = vperm.slane %v1259_v46, %v4197_v23  ;;  %v3780_v46 = vld [vmem:[#allocation7 + $0x4c] sm:$0xf0] }
 0x1b7   :  { %v747_v11 = vpop.f32.mrf.mxu1 }
 0x1b8   :  { %v856_v63 = vpack.c.bf16 %v747_v11, %v578_v37  ;;  %v4477_v20 = vpack.c.bf16 %v2104_v41, %v2102_v51  ;;  %v4480_v39 = vpack.c.bf16 %v2105_v32, %v2103_v16  ;;  %v1688_v53 = vunpack.c.l.bf16 %v1264_v10  ;;  %v3764_v41 = vld [vmem:[#allocation3 + $0xd0] sm:$0xff] }
 0x1b9   :  { %3555 = vmatmul.msk.bf16.gmra.mxu0 %vm377_vm2, %v3763_v50 }
 0x1ba   :  { %5215 = vst [vmem:[#allocation35_spill] sm:$0xff] %v4480_v39  ;;  %3587 = vmatmul.msk.bf16.gmra.mxu1 %vm377_vm2, %v3763_v50  ;;  %2475 = vmatpush.bf16.msra.mxu3 %v4385_v3  ;;  %v1594_v49 = vunpack.c.l.bf16 %v856_v63  ;;  %v1595_v33 = vunpack.c.h.bf16 %v856_v63  ;;  %v3628_v63 = vld [vmem:[#allocation7 + $0x40] sm:$0xf] }
 0x1bb   :  { %v4491_v58 = vor.u32 %v3780_v46, %v3628_v63  ;;  %v3644_v63 = vld [vmem:[#allocation7 + $0x60] sm:$0xf]  ;;  %v3784_v46 = vld [vmem:[#allocation7 + $0x6c] sm:$0xf0] }
 0x1bc   :  { %v1787_v59 = vadd.f32 %v1688_v53, %v1595_v33  ;;  %v1786_v3 = vadd.f32 %v1688_v53, %v1594_v49  ;;  %v1282_v53 = vperm.slane %v4438_v0, %v4197_v23 }
 0x1bd   :  { %5216 = vst [vmem:[#allocation36_spill] sm:$0xff] %v4491_v58 }
 0x1be   :  { %2476 = vmatpush.bf16.msra.mxu3 %v4364_v24  ;;  %v580_v26 = vpop.f32.mrf.mxu0  ;;  %v2107_v32 = vmax.f32 %v1787_v59, 0.0  ;;  %v2106_v16 = vmax.f32 %v1786_v3, 0.0  ;;  %v1690_v49 = vunpack.c.l.bf16 %v1282_v53  ;;  %v4504_v53 = vor.u32 %v3784_v46, %v3644_v63  ;;  %v3660_v46 = vld [vmem:[#allocation7 + $0x80] sm:$0xf] }
 0x1bf   :  { %v749_v9 = vpop.f32.mrf.mxu1 }
 0x1c0   :  { %v857_v19 = vpack.c.bf16 %v749_v9, %v580_v26  ;;  %5218 = vst [vmem:[#allocation38_spill] sm:$0xff] %v4504_v53 }
 0x1c2   :  { %v1596_v55 = vunpack.c.l.bf16 %v857_v19  ;;  %v1597_v37 = vunpack.c.h.bf16 %v857_v19  ;;  %2477 = vmatpush.bf16.msra.mxu3 %v4344_v12  ;;  %2440 = vmatmul.bf16.gmra.mxu2 %v4491_v58 }
 0x1c4   :  { %v1789_v50 = vadd.f32 %v1689_v14, %v1597_v37  ;;  %v1788_v51 = vadd.f32 %v1689_v14, %v1596_v55 }
 0x1c6   :  { %2478 = vmatpush.bf16.msra.mxu3 %v4330_v27  ;;  %v583_v15 = vpop.f32.mrf.mxu0  ;;  %v2108_v11 = vmax.f32 %v1788_v51, 0.0  ;;  %v2109_v24 = vmax.f32 %v1789_v50, 0.0  ;;  %v1291_v27 = vperm.slane %v4471_v40, %v4197_v23 }
 0x1c7   :  { %v752_v21 = vpop.f32.mrf.mxu1 }
 0x1c8   :  { %v858_v10 = vpack.c.bf16 %v752_v21, %v583_v15  ;;  %v4493_v33 = vpack.c.bf16 %v2108_v11, %v2106_v16  ;;  %v4495_v12 = vpack.c.bf16 %v2109_v24, %v2107_v32  ;;  %v1691_v59 = vunpack.c.l.bf16 %v1291_v27  ;;  %v3765_v15 = vld [vmem:[#allocation3 + $0xd8] sm:$0xff] }
 0x1c9   :  { %3556 = vmatmul.msk.bf16.gmra.mxu0 %vm377_vm2, %v3764_v41 }
 0x1ca   :  { %5217 = vst [vmem:[#allocation37_spill] sm:$0xff] %v4495_v12  ;;  %3588 = vmatmul.msk.bf16.gmra.mxu1 %vm377_vm2, %v3764_v41  ;;  %v1598_v26 = vunpack.c.l.bf16 %v858_v10  ;;  %v1599_v9 = vunpack.c.h.bf16 %v858_v10 }
 0x1cc   :  { %v1791_v37 = vadd.f32 %v1690_v49, %v1599_v9  ;;  %v1790_v51 = vadd.f32 %v1690_v49, %v1598_v26  ;;  %v1300_v49 = vperm.slane %v4420_v7, %v4197_v23  ;;  %v1309_v26 = vperm.slane %v4422_v31, %v4197_v23 }
 0x1ce   :  { %v585_v14 = vpop.f32.mrf.mxu0  ;;  %v2111_v41 = vmax.f32 %v1791_v37, 0.0  ;;  %v2110_v11 = vmax.f32 %v1790_v51, 0.0 }
 0x1cf   :  { %v754_v19 = vpop.f32.mrf.mxu1 }
 0x1d0   :  { %v859_v55 = vpack.c.bf16 %v754_v19, %v585_v14  ;;  %v1692_v14 = vunpack.c.l.bf16 %v1300_v49  ;;  %v3788_v49 = vld [vmem:[#allocation7 + $0x8c] sm:$0xf0] }
 0x1d2   :  { %v1600_v3 = vunpack.c.l.bf16 %v859_v55  ;;  %v1601_v50 = vunpack.c.h.bf16 %v859_v55  ;;  %2445 = vmatmul.bf16.gmra.mxu2 %v4504_v53  ;;  %v4519_v53 = vor.u32 %v3788_v49, %v3660_v46 }
 0x1d4   :  { %v1793_v32 = vadd.f32 %v1691_v59, %v1601_v50  ;;  %v1792_v0 = vadd.f32 %v1691_v59, %v1600_v3  ;;  %v1693_v3 = vunpack.c.l.bf16 %v1309_v26  ;;  %5220 = vst [vmem:[#allocation40_spill] sm:$0xff] %v4519_v53 }
 0x1d6   :  { %v588_v16 = vpop.f32.mrf.mxu0  ;;  %v2112_v24 = vmax.f32 %v1792_v0, 0.0  ;;  %v2113_v21 = vmax.f32 %v1793_v32, 0.0 }
 0x1d7   :  { %v757_v40 = vpop.f32.mrf.mxu1 }
 0x1d8   :  { %v860_v10 = vpack.c.bf16 %v757_v40, %v588_v16  ;;  %v4506_v27 = vpack.c.bf16 %v2112_v24, %v2110_v11  ;;  %v4508_v9 = vpack.c.bf16 %v2113_v21, %v2111_v41  ;;  %v3766_v11 = vld [vmem:[#allocation3 + $0xe0] sm:$0xff] }
 0x1d9   :  { %3557 = vmatmul.msk.bf16.gmra.mxu0 %vm377_vm2, %v3765_v15 }
 0x1da   :  { %5219 = vst [vmem:[#allocation39_spill] sm:$0xff] %v4508_v9  ;;  %3589 = vmatmul.msk.bf16.gmra.mxu1 %vm377_vm2, %v3765_v15  ;;  %v1602_v19 = vunpack.c.l.bf16 %v860_v10  ;;  %v1603_v59 = vunpack.c.h.bf16 %v860_v10 }
 0x1dc   :  { %v1795_v51 = vadd.f32 %v1692_v14, %v1603_v59  ;;  %v1794_v41 = vadd.f32 %v1692_v14, %v1602_v19 }
 0x1de   :  { %v590_v55 = vpop.f32.mrf.mxu0  ;;  %v2115_v15 = vmax.f32 %v1795_v51, 0.0  ;;  %v2114_v21 = vmax.f32 %v1794_v41, 0.0  ;;  %v3792_v51 = vld [vmem:[#allocation7 + $0xac] sm:$0xf0] }
 0x1df   :  { %v759_v37 = vpop.f32.mrf.mxu1 }
 0x1e0   :  { %v861_v50 = vpack.c.bf16 %v759_v37, %v590_v55  ;;  %v3767_v55 = vld [vmem:[#allocation3 + $0xe8] sm:$0xff] }
 0x1e2   :  { %v1604_v32 = vunpack.c.l.bf16 %v861_v50  ;;  %v1605_v0 = vunpack.c.h.bf16 %v861_v50  ;;  %2450 = vmatmul.bf16.gmra.mxu2 %v4519_v53  ;;  %v3676_v50 = vld [vmem:[#allocation7 + $0xa0] sm:$0xf] }
 0x1e4   :  { %v1797_v16 = vadd.f32 %v1693_v3, %v1605_v0  ;;  %v1796_v7 = vadd.f32 %v1693_v3, %v1604_v32  ;;  %v4528_v32 = vor.u32 %v3792_v51, %v3676_v50  ;;  %v3800_v50 = vld [vmem:[#allocation7 + $0xec] sm:$0xf0] }
 0x1e6   :  { %v593_v24 = vpop.f32.mrf.mxu0  ;;  %v2116_v40 = vmax.f32 %v1796_v7, 0.0  ;;  %v2117_v63 = vmax.f32 %v1797_v16, 0.0  ;;  %5222 = vst [vmem:[#allocation42_spill] sm:$0xff] %v4528_v32  ;;  %v3768_v16 = vld [vmem:[#allocation3 + $0xf0] sm:$0xff] }
 0x1e7   :  { %v762_v31 = vpop.f32.mrf.mxu1 }
 0x1e8   :  { %v4517_v10 = vpack.c.bf16 %v762_v31, %v593_v24  ;;  %v4521_v26 = vpack.c.bf16 %v2116_v40, %v2114_v21  ;;  %v4523_v59 = vpack.c.bf16 %v2117_v63, %v2115_v15  ;;  %v3692_v15 = vld [vmem:[#allocation7 + $0xc0] sm:$0xf]  ;;  %v3796_v24 = vld [vmem:[#allocation7 + $0xcc] sm:$0xf0]  ;;  %v3769_v31 = vld [vmem:[#allocation3 + $0xf8] sm:$0xff] }
 0x1e9   :  { %3558 = vmatmul.msk.bf16.gmra.mxu0 %vm377_vm2, %v3766_v11  ;;  %v4533_v21 = vor.u32 %v3796_v24, %v3692_v15  ;;  %v1381_v24 = vperm.slane %v4355_v54, %v4197_v23 }
 0x1ea   :  { %5221 = vst [vmem:[#allocation41_spill] sm:$0xff] %v4523_v59  ;;  %3590 = vmatmul.msk.bf16.gmra.mxu1 %vm377_vm2, %v3766_v11 }
 0x1eb   :  { %5223 = vst [vmem:[#allocation43_spill] sm:$0xff] %v4533_v21 }
 0x1ee   :  { %v595_v14 = vpop.f32.mrf.mxu0 }
 0x1ef   :  { %v764_v19 = vpop.f32.mrf.mxu1 }
 0x1f2   :  { %2455 = vmatmul.bf16.gmra.mxu2 %v4528_v32 }
 0x1f6   :  { %v598_v37 = vpop.f32.mrf.mxu0 }
 0x1f7   :  { %v767_v3 = vpop.f32.mrf.mxu1 }
 0x1f9   :  { %3559 = vmatmul.msk.bf16.gmra.mxu0 %vm377_vm2, %v3767_v55 }
 0x1fa   :  { %3591 = vmatmul.msk.bf16.gmra.mxu1 %vm377_vm2, %v3767_v55  ;;  %v3708_v55 = vld [vmem:[#allocation7 + $0xe0] sm:$0xf] }
 0x1fb   :  { %v4538_v51 = vor.u32 %v3800_v50, %v3708_v55  ;;  %v1363_v55 = vperm.slane %v4372_v61, %v4197_v23  ;;  %v3770_v50 = vld [vmem:[#allocation7 + $0x4] sm:$0xf] }
 0x1fd   :  { %5224 = vst [vmem:[#allocation44_spill] sm:$0xff] %v4538_v51 }
 0x1fe   :  { %v600_v0 = vpop.f32.mrf.mxu0 }
 0x1ff   :  { %v769_v41 = vpop.f32.mrf.mxu1 }
 0x202   :  { %2460 = vmatmul.bf16.gmra.mxu2 %v4533_v21  ;;  %v3598_v21 = vld [vmem:[#allocation7 + $0x10] sm:$0xf0] }
 0x206   :  { %v603_v7 = vpop.f32.mrf.mxu0 }
 0x207   :  { %v772_v11 = vpop.f32.mrf.mxu1 }
 0x208   :  { %v4553_v53 = vpack.c.bf16 %v772_v11, %v603_v7  ;;  %v4568_v7 = vunpack.c.l.bf16 %v1381_v24  ;;  %v4570_v11 = vunpack.c.l.bf16 %v1363_v55  ;;  %v4583_v24 = vpack.c.bf16 %v764_v19, %v595_v14 }
 0x209   :  { %3560 = vmatmul.msk.bf16.gmra.mxu0 %vm377_vm2, %v3768_v16 }
 0x20a   :  { %3592 = vmatmul.msk.bf16.gmra.mxu1 %vm377_vm2, %v3768_v16  ;;  %v1372_v16 = vperm.slane %v4389_v36, %v4197_v23  ;;  %v1354_v36 = vperm.slane %v4369_v25, %v4197_v23  ;;  %v4576_v25 = vpack.c.bf16 %v767_v3, %v598_v37 }
 0x20c   :  { %v4585_v55 = vunpack.c.l.bf16 %v1354_v36 }
 0x20e   :  { %v605_v40 = vpop.f32.mrf.mxu0 }
 0x20f   :  { %v774_v63 = vpop.f32.mrf.mxu1 }
 0x210   :  { %v4547_v15 = vpack.c.bf16 %v774_v63, %v605_v40  ;;  %v4560_v63 = vunpack.c.l.bf16 %v1372_v16 }
 0x212   :  { %2465 = vmatmul.bf16.gmra.mxu2 %v4538_v51  ;;  %v4562_v51 = vpack.c.bf16 %v769_v41, %v600_v0  ;;  %v1616_v54 = vunpack.c.l.bf16 %v4547_v15  ;;  %v1614_v0 = vunpack.c.l.bf16 %v4553_v53 }
 0x214   :  { %v1808_v37 = vadd.f32 %v4570_v11, %v1616_v54  ;;  %v1806_v58 = vadd.f32 %v4585_v55, %v1614_v0 }
 0x216   :  { %v608_v46 = vpop.f32.mrf.mxu0  ;;  %v2128_v1 = vmax.f32 %v1808_v37, 0.0 }
 0x217   :  { %v777_v49 = vpop.f32.mrf.mxu1 }
 0x218   :  { %v4541_v32 = vpack.c.bf16 %v777_v49, %v608_v46  ;;  %v4556_v49 = vor.u32 %v3770_v50, %v3598_v21  ;;  %v1345_v21 = vperm.slane %v4426_v28, %v4197_v23  ;;  %v4574_v50 = vpop.permute.xlu2 %1411 }
 0x219   :  { %3561 = vmatmul.msk.bf16.gmra.mxu0 %vm377_vm2, %v3769_v31 }
 0x21a   :  { %3593 = vmatmul.msk.bf16.gmra.mxu1 %vm377_vm2, %v3769_v31  ;;  %v1618_v46 = vunpack.c.l.bf16 %v4541_v32  ;;  %5225 = vst [vmem:[#allocation45_spill] sm:$0xff] %v4556_v49  ;;  %2479 = vmatmul.bf16.vlgmr.msra.gmra.mxu3 %v4556_v49  ;;  %v4590_v3 = vunpack.c.l.bf16 %v1345_v21  ;;  %v1327_v49 = vperm.slane %v4406_v22, %v4197_v23 }
 0x21c   :  { %v1810_v16 = vadd.f32 %v4560_v63, %v1618_v46  ;;  %v1318_v46 = vperm.slane %v4440_v62, %v4197_v23  ;;  %v1606_v62 = vunpack.c.l.bf16 %v4517_v10  ;;  %v4605_v8 = vunpack.c.l.bf16 %v1327_v49 }
 0x21e   :  { %v610_v31 = vpop.f32.mrf.mxu0  ;;  %v2130_v19 = vmax.f32 %v1810_v16, 0.0  ;;  %v4602_v56 = vunpack.c.l.bf16 %v1318_v46  ;;  %v2126_v16 = vmax.f32 %v1806_v58, 0.0 }
 0x21f   :  { %v779_v40 = vpop.f32.mrf.mxu1 }
 0x220   :  { %v4565_v61 = vpack.c.bf16 %v779_v40, %v610_v31  ;;  %v1336_v31 = vperm.slane %v4383_v52, %v4197_v23  ;;  %v1612_v40 = vunpack.c.l.bf16 %v4562_v51  ;;  %v1610_v52 = vunpack.c.l.bf16 %v4576_v25 }
 0x221   :  { %v2210_v39 = vpack.c.bf16 %v2128_v1, %v2126_v16  ;;  %v1798_v46 = vadd.f32 %v4602_v56, %v1606_v62 }
 0x222   :  { %v1620_v41 = vunpack.c.l.bf16 %v4565_v61  ;;  %v4598_v48 = vunpack.c.l.bf16 %v1336_v31  ;;  %v1804_v22 = vadd.f32 %v4590_v3, %v1612_v40  ;;  %v1385_v31 = vpop.permute.xlu2 %1384 }
 0x223   :  { %v1390_v47 = vperm.slane %v1385_v31, %v4197_v23  ;;  %v2118_v62 = vmax.f32 %v1798_v46, 0.0 }
 0x224   :  { %v1812_v28 = vadd.f32 %v4568_v7, %v1620_v41  ;;  %v1608_v41 = vunpack.c.l.bf16 %v4583_v24  ;;  %v1802_v0 = vadd.f32 %v4598_v48, %v1610_v52 }
 0x225   :  { %v4612_v52 = vpop.f32.mrf.mxu2  ;;  %v1702_v1 = vunpack.c.l.bf16 %v1390_v47 }
 0x226   :  { %v613_v14 = vpop.f32.mrf.mxu0  ;;  %v2132_v36 = vmax.f32 %v1812_v28, 0.0  ;;  %v1394_v28 = vpop.permute.xlu0 %1393  ;;  %v1800_v37 = vadd.f32 %v4605_v8, %v1608_v41  ;;  %v2122_v58 = vmax.f32 %v1802_v0, 0.0 }
 0x227   :  { %v782_v54 = vpop.f32.mrf.mxu1  ;;  %v1399_v40 = vperm.slane %v1394_v28, %v4197_v23 }
 0x228   :  { %v870_v21 = vpack.c.bf16 %v782_v54, %v613_v14  ;;  %v2212_v38 = vpack.c.bf16 %v2132_v36, %v2130_v19  ;;  %v2124_v14 = vmax.f32 %v1804_v22, 0.0  ;;  %v3774_v19 = vld [vmem:[#allocation7 + $0x24] sm:$0xf]  ;;  %v3614_v36 = vld [vmem:[#allocation7 + $0x30] sm:$0xf0]  ;;  %v2120_v41 = vmax.f32 %v1800_v37, 0.0 }
 0x229   :  { %v4614_v45 = vor.u32 %v3774_v19, %v3614_v36  ;;  %v1703_v28 = vunpack.c.l.bf16 %v1399_v40  ;;  %v1408_v19 = vperm.slane %v4458_v35, %v4197_v23 }
 0x22a   :  { %2520 = vmatpush.bf16.msrb.mxu2 %v2212_v38  ;;  %v1622_v49 = vunpack.c.l.bf16 %v870_v21  ;;  %v1623_v54 = vunpack.c.h.bf16 %v870_v21  ;;  %v2208_v16 = vpack.c.bf16 %v2124_v14, %v2122_v58  ;;  %v2206_v0 = vpack.c.bf16 %v2120_v41, %v2118_v62 }
 0x22b   :  { %2484 = vmatmul.bf16.gmra.mxu3 %v4614_v45 }
 0x22c   :  { %v1815_v12 = vadd.f32 %v1702_v1, %v1623_v54 }
 0x22d   :  { %v4619_v37 = vpop.f32.mrf.mxu2 }
 0x22e   :  { %2521 = vmatpush.bf16.msrb.mxu2 %v2210_v39  ;;  %v615_v38 = vpop.f32.mrf.mxu0  ;;  %v1814_v39 = vadd.f32 %v1702_v1, %v1622_v49  ;;  %v2135_v36 = vmax.f32 %v1815_v12, 0.0  ;;  %v3778_v1 = vld [vmem:[#allocation7 + $0x44] sm:$0xf] }
 0x22f   :  { %v784_v31 = vpop.f32.mrf.mxu1 }
 0x230   :  { %v871_v22 = vpack.c.bf16 %v784_v31, %v615_v38  ;;  %v2134_v38 = vmax.f32 %v1814_v39, 0.0 }
 0x232   :  { %v1624_v29 = vunpack.c.l.bf16 %v871_v22  ;;  %v1625_v9 = vunpack.c.h.bf16 %v871_v22  ;;  %2522 = vmatpush.bf16.msrb.mxu2 %v2208_v16  ;;  %v3630_v22 = vld [vmem:[#allocation7 + $0x50] sm:$0xf0]  ;;  %v1417_v16 = vperm.slane %v4574_v50, %v4197_v23 }
 0x233   :  { %v4629_v41 = vor.u32 %v3778_v1, %v3630_v22 }
 0x234   :  { %v1817_v21 = vadd.f32 %v1703_v28, %v1625_v9  ;;  %v1816_v59 = vadd.f32 %v1703_v28, %v1624_v29  ;;  %v1704_v9 = vunpack.c.l.bf16 %v1408_v19  ;;  %v3604_v19 = vld [vmem:[#allocation7 + $0x8] sm:$0xf] }
 0x235   :  { %v4631_v39 = vpop.f32.mrf.mxu2 }
 0x236   :  { %v2137_v47 = vmax.f32 %v1817_v21, 0.0  ;;  %2523 = vmatpush.bf16.msrb.mxu2 %v2206_v0  ;;  %v618_v14 = vpop.f32.mrf.mxu0  ;;  %v2136_v40 = vmax.f32 %v1816_v59, 0.0  ;;  %v1705_v21 = vunpack.c.l.bf16 %v1417_v16 }
 0x237   :  { %v787_v46 = vpop.f32.mrf.mxu1 }
 0x238   :  { %v872_v54 = vpack.c.bf16 %v787_v46, %v618_v14  ;;  %v4621_v58 = vpack.c.bf16 %v2136_v40, %v2134_v38  ;;  %v4623_v31 = vpack.c.bf16 %v2137_v47, %v2135_v36  ;;  %v3773_v36 = vld [vmem:[#allocation7 + $0x14] sm:$0xf0] }
 0x239   :  { %v4637_v14 = vor.u32 %v3773_v36, %v3604_v19 }
 0x23a   :  { %v1626_v49 = vunpack.c.l.bf16 %v872_v54  ;;  %v1627_v29 = vunpack.c.h.bf16 %v872_v54  ;;  %2524 = vmatpush.bf16.msrb.mxu2 %v4521_v26 }
 0x23b   :  { %2489 = vmatmul.bf16.gmra.mxu3 %v4629_v41 }
 0x23c   :  { %v1819_v35 = vadd.f32 %v1704_v9, %v1627_v29  ;;  %v1818_v12 = vadd.f32 %v1704_v9, %v1626_v49 }
 0x23e   :  { %2525 = vmatpush.bf16.msrb.mxu2 %v4506_v27  ;;  %v620_v59 = vpop.f32.mrf.mxu0  ;;  %v1426_v27 = vperm.slane %v4444_v34, %v4197_v23  ;;  %v2139_v38 = vmax.f32 %v1819_v35, 0.0  ;;  %v2138_v54 = vmax.f32 %v1818_v12, 0.0  ;;  %v4646_v35 = vpop.f32.mrf.mxu2 }
 0x23f   :  { %v789_v28 = vpop.f32.mrf.mxu1 }
 0x240   :  { %v873_v62 = vpack.c.bf16 %v789_v28, %v620_v59  ;;  %v1706_v34 = vunpack.c.l.bf16 %v1426_v27  ;;  %v3782_v59 = vld [vmem:[#allocation7 + $0x64] sm:$0xf]  ;;  %v3646_v28 = vld [vmem:[#allocation7 + $0x70] sm:$0xf0] }
 0x242   :  { %v1628_v26 = vunpack.c.l.bf16 %v873_v62  ;;  %v1629_v0 = vunpack.c.h.bf16 %v873_v62  ;;  %2526 = vmatpush.bf16.msrb.mxu2 %v4493_v33 }
 0x244   :  { %v1821_v47 = vadd.f32 %v1705_v21, %v1629_v0  ;;  %v1820_v50 = vadd.f32 %v1705_v21, %v1628_v26  ;;  %v4651_v21 = vor.u32 %v3782_v59, %v3646_v28 }
 0x246   :  { %v2141_v40 = vmax.f32 %v1821_v47, 0.0  ;;  %2527 = vmatpush.bf16.msrb.mxu2 %v4477_v20  ;;  %v623_v46 = vpop.f32.mrf.mxu0  ;;  %v2140_v9 = vmax.f32 %v1820_v50, 0.0  ;;  %v3777_v50 = vld [vmem:[#allocation7 + $0x34] sm:$0xf0] }
 0x247   :  { %v792_v49 = vpop.f32.mrf.mxu1 }
 0x248   :  { %v874_v33 = vpack.c.bf16 %v792_v49, %v623_v46  ;;  %v4641_v29 = vpack.c.bf16 %v2140_v9, %v2138_v54  ;;  %v4643_v1 = vpack.c.bf16 %v2141_v40, %v2139_v38  ;;  %v4656_v38 = vpop.f32.mrf.mxu2  ;;  %v1444_v40 = vperm.slane %v4460_v60, %v4197_v23 }
 0x249   :  { %2528 = vmatmul.bf16.vlgmr.msrb.gmra.mxu2 %v4637_v14  ;;  %v1621_v46 = vunpack.c.h.bf16 %v4565_v61  ;;  %v1617_v60 = vunpack.c.h.bf16 %v4547_v15  ;;  %v3786_v15 = vld [vmem:[#allocation7 + $0x84] sm:$0xf] }
 0x24a   :  { %2618 = vmatpush.bf16.msra.mxu2 %v4319_v42  ;;  %v1630_v22 = vunpack.c.l.bf16 %v874_v33  ;;  %v1631_v16 = vunpack.c.h.bf16 %v874_v33  ;;  %v1435_v42 = vperm.slane %v4446_v6, %v4197_v23  ;;  %v1708_v61 = vunpack.c.l.bf16 %v1444_v40 }
 0x24b   :  { %2494 = vmatmul.bf16.gmra.mxu3 %v4651_v21 }
 0x24c   :  { %v1823_v20 = vadd.f32 %v1706_v34, %v1631_v16  ;;  %v1822_v12 = vadd.f32 %v1706_v34, %v1630_v22  ;;  %v1707_v19 = vunpack.c.l.bf16 %v1435_v42 }
 0x24e   :  { %2619 = vmatpush.bf16.msra.mxu2 %v4306_v18  ;;  %v625_v62 = vpop.f32.mrf.mxu0  ;;  %v3620_v18 = vld [vmem:[#allocation7 + $0x28] sm:$0xf]  ;;  %v2143_v54 = vmax.f32 %v1823_v20, 0.0  ;;  %v2142_v33 = vmax.f32 %v1822_v12, 0.0  ;;  %v1813_v20 = vadd.f32 %v4568_v7, %v1621_v46 }
 0x24f   :  { %v794_v26 = vpop.f32.mrf.mxu1 }
 0x250   :  { %v875_v0 = vpack.c.bf16 %v794_v26, %v625_v62  ;;  %v1615_v62 = vunpack.c.h.bf16 %v4553_v53  ;;  %v2133_v7 = vmax.f32 %v1813_v20, 0.0 }
 0x252   :  { %2620 = vmatpush.bf16.msra.mxu2 %v4294_v30  ;;  %v1632_v36 = vunpack.c.l.bf16 %v875_v0  ;;  %v1633_v47 = vunpack.c.h.bf16 %v875_v0  ;;  %v4661_v30 = vor.u32 %v3777_v50, %v3620_v18  ;;  %v1613_v0 = vunpack.c.h.bf16 %v4562_v51  ;;  %v4679_v50 = vpop.f32.mrf.mxu2 }
 0x253   :  { %v1611_v51 = vunpack.c.h.bf16 %v4576_v25  ;;  %v1462_v25 = vperm.slane %v4413_v2, %v4197_v23 }
 0x254   :  { %v1825_v27 = vadd.f32 %v1707_v19, %v1633_v47  ;;  %v1824_v6 = vadd.f32 %v1707_v19, %v1632_v36  ;;  %v1809_v19 = vadd.f32 %v4570_v11, %v1617_v60  ;;  %v3662_v36 = vld [vmem:[#allocation7 + $0x90] sm:$0xf0]  ;;  %v1453_v47 = vperm.slane %v4434_v5, %v4197_v23 }
 0x255   :  { %v4681_v53 = vor.u32 %v3786_v15, %v3662_v36  ;;  %v1805_v5 = vadd.f32 %v4590_v3, %v1613_v0  ;;  %v1710_v15 = vunpack.c.l.bf16 %v1462_v25 }
 0x256   :  { %2621 = vmatpush.bf16.msra.mxu2 %v4274_v43  ;;  %v2145_v9 = vmax.f32 %v1825_v27, 0.0  ;;  %v628_v49 = vpop.f32.mrf.mxu0  ;;  %v2144_v34 = vmax.f32 %v1824_v6, 0.0  ;;  %v1619_v43 = vunpack.c.h.bf16 %v4541_v32  ;;  %v1609_v6 = vunpack.c.h.bf16 %v4583_v24 }
 0x257   :  { %v797_v22 = vpop.f32.mrf.mxu1  ;;  %v2129_v40 = vmax.f32 %v1809_v19, 0.0  ;;  %v1709_v46 = vunpack.c.l.bf16 %v1453_v47 }
 0x258   :  { %v876_v16 = vpack.c.bf16 %v797_v22, %v628_v49  ;;  %v4665_v59 = vpack.c.bf16 %v2144_v34, %v2142_v33  ;;  %v4667_v28 = vpack.c.bf16 %v2145_v9, %v2143_v54  ;;  %v3636_v33 = vld [vmem:[#allocation7 + $0x48] sm:$0xf]  ;;  %v1607_v34 = vunpack.c.h.bf16 %v4517_v10 }
 0x259   :  { %2533 = vmatmul.bf16.gmra.mxu2 %v4661_v30  ;;  %v1803_v22 = vadd.f32 %v4598_v48, %v1611_v51  ;;  %v1471_v51 = vperm.slane %v4452_v17, %v4197_v23 }
 0x25a   :  { %2622 = vmatpush.bf16.msra.mxu2 %v4254_v4  ;;  %v1634_v42 = vunpack.c.l.bf16 %v876_v16  ;;  %v1635_v12 = vunpack.c.h.bf16 %v876_v16  ;;  %v1811_v4 = vadd.f32 %v4560_v63, %v1619_v43  ;;  %v1801_v43 = vadd.f32 %v4605_v8, %v1609_v6  ;;  %v4698_v48 = vpop.f32.mrf.mxu2 }
 0x25b   :  { %2499 = vmatmul.bf16.gmra.mxu3 %v4681_v53  ;;  %v2123_v2 = vmax.f32 %v1803_v22, 0.0 }
 0x25c   :  { %v1827_v32 = vadd.f32 %v1708_v61, %v1635_v12  ;;  %v1826_v26 = vadd.f32 %v1708_v61, %v1634_v42  ;;  %v2131_v27 = vmax.f32 %v1811_v4, 0.0  ;;  %v2125_v61 = vmax.f32 %v1805_v5, 0.0 }
 0x25e   :  { %2623 = vmatpush.bf16.msra.mxu2 %v4226_v44  ;;  %v630_v18 = vpop.f32.mrf.mxu0  ;;  %v1807_v44 = vadd.f32 %v4585_v55, %v1615_v62  ;;  %v2213_v54 = vpack.c.bf16 %v2133_v7, %v2131_v27  ;;  %v3781_v55 = vld [vmem:[#allocation7 + $0x54] sm:$0xf0]  ;;  %v2147_v20 = vmax.f32 %v1827_v32, 0.0  ;;  %v2146_v12 = vmax.f32 %v1826_v26, 0.0 }
 0x25f   :  { %v799_v63 = vpop.f32.mrf.mxu1  ;;  %v4695_v60 = vor.u32 %v3781_v55, %v3636_v33  ;;  %v2209_v47 = vpack.c.bf16 %v2125_v61, %v2123_v2  ;;  %v2121_v26 = vmax.f32 %v1801_v43, 0.0  ;;  %v3785_v33 = vld [vmem:[#allocation7 + $0x74] sm:$0xf0] }
 0x260   :  { %v877_v11 = vpack.c.bf16 %v799_v63, %v630_v18  ;;  %v3678_v63 = vld [vmem:[#allocation7 + $0xb0] sm:$0xf0] }
 0x262   :  { %2624 = vmatpush.bf16.msra.mxu2 %v4236_v13  ;;  %v1636_v9 = vunpack.c.l.bf16 %v877_v11  ;;  %v1637_v49 = vunpack.c.h.bf16 %v877_v11  ;;  %v2127_v13 = vmax.f32 %v1807_v44, 0.0  ;;  %v3790_v44 = vld [vmem:[#allocation7 + $0xa4] sm:$0xf]  ;;  %v4710_v55 = vpop.f32.mrf.mxu2 }
 0x263   :  { %v4707_v6 = vor.u32 %v3790_v44, %v3678_v63 }
 0x264   :  { %v1829_v24 = vadd.f32 %v1709_v46, %v1637_v49  ;;  %v1828_v3 = vadd.f32 %v1709_v46, %v1636_v9  ;;  %v2211_v16 = vpack.c.bf16 %v2129_v40, %v2127_v13  ;;  %v1711_v46 = vunpack.c.l.bf16 %v1471_v51  ;;  %v3652_v49 = vld [vmem:[#allocation7 + $0x68] sm:$0xf]  ;;  %v5231_v51 = vld [vmem:[#allocation35_spill] sm:$0xff] }
 0x265   :  { %v5226_v13 = vld [vmem:[#allocation41_spill] sm:$0xff]  ;;  %v4713_v25 = vor.u32 %v3785_v33, %v3652_v49 }
 0x266   :  { %2625 = vmatpush.bf16.msra.mxu2 %v4246_v57  ;;  %v2149_v42 = vmax.f32 %v1829_v24, 0.0  ;;  %v633_v10 = vpop.f32.mrf.mxu0  ;;  %v2148_v62 = vmax.f32 %v1828_v3, 0.0  ;;  %v1799_v57 = vadd.f32 %v4602_v56, %v1607_v34 }
 0x267   :  { %v802_v4 = vpop.f32.mrf.mxu1 }
 0x268   :  { %v878_v0 = vpack.c.bf16 %v802_v4, %v633_v10  ;;  %v4700_v19 = vpack.c.bf16 %v2148_v62, %v2146_v12  ;;  %v4702_v8 = vpack.c.bf16 %v2149_v42, %v2147_v20  ;;  %v2119_v7 = vmax.f32 %v1799_v57, 0.0  ;;  %v5227_v20 = vld [vmem:[#allocation39_spill] sm:$0xff]  ;;  %v5228_v62 = vld [vmem:[#allocation25_spill] sm:$0xff] }
 0x269   :  { %2538 = vmatmul.bf16.gmra.mxu2 %v4695_v60  ;;  %v1480_v57 = vperm.slane %v5228_v62, %v4197_v23  ;;  %v5229_v4 = vld [vmem:[#allocation37_spill] sm:$0xff] }
 0x26a   :  { %2716 = vmatpush.bf16.msrb.mxu2 %v2213_v54  ;;  %v1638_v32 = vunpack.c.l.bf16 %v878_v0  ;;  %v1639_v36 = vunpack.c.h.bf16 %v878_v0  ;;  %v2207_v11 = vpack.c.bf16 %v2121_v26, %v2119_v7  ;;  %v4724_v2 = vpop.f32.mrf.mxu2  ;;  %v5230_v0 = vld [vmem:[#allocation26_spill] sm:$0xff]  ;;  %v5232_v62 = vld [vmem:[#allocation29_spill] sm:$0xff] }
 0x26b   :  { %2504 = vmatmul.bf16.gmra.mxu3 %v4707_v6  ;;  %v1712_v44 = vunpack.c.l.bf16 %v1480_v57  ;;  %v1498_v57 = vperm.slane %v5232_v62, %v4197_v23 }
 0x26c   :  { %v1831_v18 = vadd.f32 %v1710_v15, %v1639_v36  ;;  %v1830_v56 = vadd.f32 %v1710_v15, %v1638_v32  ;;  %v1489_v15 = vperm.slane %v5230_v0, %v4197_v23  ;;  %v3794_v32 = vld [vmem:[#allocation7 + $0xc4] sm:$0xf]  ;;  %v3694_v36 = vld [vmem:[#allocation7 + $0xd0] sm:$0xf0] }
 0x26e   :  { %2717 = vmatpush.bf16.msrb.mxu2 %v2211_v16  ;;  %v635_v27 = vpop.f32.mrf.mxu0  ;;  %v2151_v22 = vmax.f32 %v1831_v18, 0.0  ;;  %v2150_v43 = vmax.f32 %v1830_v56, 0.0  ;;  %v4728_v18 = vor.u32 %v3794_v32, %v3694_v36  ;;  %v3710_v32 = vld [vmem:[#allocation7 + $0xf0] sm:$0xf0] }
 0x26f   :  { %v804_v5 = vpop.f32.mrf.mxu1 }
 0x270   :  { %v879_v40 = vpack.c.bf16 %v804_v5, %v635_v27  ;;  %v1713_v27 = vunpack.c.l.bf16 %v1489_v15  ;;  %v3798_v15 = vld [vmem:[#allocation7 + $0xe4] sm:$0xf] }
 0x272   :  { %2718 = vmatpush.bf16.msrb.mxu2 %v2209_v47  ;;  %v1640_v54 = vunpack.c.l.bf16 %v879_v40  ;;  %v1641_v9 = vunpack.c.h.bf16 %v879_v40 }
 0x274   :  { %v1833_v34 = vadd.f32 %v1711_v46, %v1641_v9  ;;  %v1832_v17 = vadd.f32 %v1711_v46, %v1640_v54  ;;  %v3668_v46 = vld [vmem:[#allocation7 + $0x88] sm:$0xf]  ;;  %v3789_v54 = vld [vmem:[#allocation7 + $0x94] sm:$0xf0] }
 0x276   :  { %2719 = vmatpush.bf16.msrb.mxu2 %v2207_v11  ;;  %v2153_v24 = vmax.f32 %v1833_v34, 0.0  ;;  %v638_v3 = vpop.f32.mrf.mxu0  ;;  %v2152_v16 = vmax.f32 %v1832_v17, 0.0  ;;  %v4732_v34 = vor.u32 %v3789_v54, %v3668_v46  ;;  %v3684_v46 = vld [vmem:[#allocation7 + $0xa8] sm:$0xf]  ;;  %v3793_v54 = vld [vmem:[#allocation7 + $0xb4] sm:$0xf0] }
 0x277   :  { %v807_v61 = vpop.f32.mrf.mxu1 }
 0x278   :  { %v4716_v42 = vpack.c.bf16 %v2152_v16, %v2150_v43  ;;  %v4718_v10 = vpack.c.bf16 %v2153_v24, %v2151_v22  ;;  %v880_v12 = vpack.c.bf16 %v807_v61, %v638_v3  ;;  %v4734_v24 = vpop.f32.mrf.mxu2 }
 0x279   :  { %2543 = vmatmul.bf16.gmra.mxu2 %v4713_v25 }
 0x27a   :  { %2720 = vmatpush.bf16.msrb.mxu2 %v5226_v13  ;;  %v1642_v47 = vunpack.c.l.bf16 %v880_v12  ;;  %v1643_v26 = vunpack.c.h.bf16 %v880_v12 }
 0x27b   :  { %2509 = vmatmul.bf16.gmra.mxu3 %v4728_v18 }
 0x27c   :  { %v1835_v11 = vadd.f32 %v1712_v44, %v1643_v26  ;;  %v1834_v9 = vadd.f32 %v1712_v44, %v1642_v47  ;;  %v1714_v44 = vunpack.c.l.bf16 %v1498_v57 }
 0x27e   :  { %2721 = vmatpush.bf16.msrb.mxu2 %v5227_v20  ;;  %v640_v7 = vpop.f32.mrf.mxu0  ;;  %v2155_v13 = vmax.f32 %v1835_v11, 0.0  ;;  %v2154_v3 = vmax.f32 %v1834_v9, 0.0 }
 0x27f   :  { %v809_v56 = vpop.f32.mrf.mxu1 }
 0x280   :  { %v881_v63 = vpack.c.bf16 %v809_v56, %v640_v7  ;;  %v4745_v7 = vor.u32 %v3798_v15, %v3710_v32  ;;  %v5234_v15 = vld [vmem:[#allocation21_spill] sm:$0xff] }
 0x281   :  { %v1516_v32 = vperm.slane %v5234_v15, %v4197_v23 }
 0x282   :  { %2722 = vmatpush.bf16.msrb.mxu2 %v5229_v4  ;;  %v1644_v5 = vunpack.c.l.bf16 %v881_v63  ;;  %v1645_v40 = vunpack.c.h.bf16 %v881_v63  ;;  %v5233_v4 = vld [vmem:[#allocation23_spill] sm:$0xff] }
 0x283   :  { %v1507_v0 = vperm.slane %v5233_v4, %v4197_v23 }
 0x284   :  { %v1837_v49 = vadd.f32 %v1713_v27, %v1645_v40  ;;  %v1836_v33 = vadd.f32 %v1713_v27, %v1644_v5 }
 0x285   :  { %v1715_v27 = vunpack.c.l.bf16 %v1507_v0 }
 0x286   :  { %2723 = vmatpush.bf16.msrb.mxu2 %v5231_v51  ;;  %v2157_v17 = vmax.f32 %v1837_v49, 0.0  ;;  %v643_v22 = vpop.f32.mrf.mxu0  ;;  %v2156_v43 = vmax.f32 %v1836_v33, 0.0  ;;  %v4747_v51 = vpop.f32.mrf.mxu2 }
 0x287   :  { %v812_v16 = vpop.f32.mrf.mxu1 }
 0x288   :  { %v4736_v61 = vpack.c.bf16 %v2156_v43, %v2154_v3  ;;  %v4738_v20 = vpack.c.bf16 %v2157_v17, %v2155_v13  ;;  %v882_v12 = vpack.c.bf16 %v812_v16, %v643_v22  ;;  %v4750_v13 = vor.u32 %v3793_v54, %v3684_v46 }
 0x289   :  { %2548 = vmatmul.bf16.gmra.mxu2 %v4732_v34 }
 0x28a   :  { %v1646_v36 = vunpack.c.l.bf16 %v882_v12  ;;  %v1647_v47 = vunpack.c.h.bf16 %v882_v12 }
 0x28b   :  { %2514 = vmatmul.bf16.gmra.mxu3 %v4745_v7 }
 0x28c   :  { %v1839_v11 = vadd.f32 %v1714_v44, %v1647_v47  ;;  %v1838_v9 = vadd.f32 %v1714_v44, %v1646_v36  ;;  %v5235_v36 = vld [vmem:[#allocation27_spill] sm:$0xff] }
 0x28d   :  { %v1525_v47 = vperm.slane %v5235_v36, %v4197_v23 }
 0x28e   :  { %v645_v26 = vpop.f32.mrf.mxu0  ;;  %v2159_v17 = vmax.f32 %v1839_v11, 0.0  ;;  %v2158_v43 = vmax.f32 %v1838_v9, 0.0  ;;  %v4755_v0 = vpop.f32.mrf.mxu2  ;;  %v3700_v9 = vld [vmem:[#allocation7 + $0xc8] sm:$0xf] }
 0x28f   :  { %v814_v56 = vpop.f32.mrf.mxu1 }
 0x290   :  { %v883_v63 = vpack.c.bf16 %v814_v56, %v645_v26 }
 0x292   :  { %v1648_v5 = vunpack.c.l.bf16 %v883_v63  ;;  %v1649_v40 = vunpack.c.h.bf16 %v883_v63 }
 0x294   :  { %v1841_v49 = vadd.f32 %v1715_v27, %v1649_v40  ;;  %v1840_v33 = vadd.f32 %v1715_v27, %v1648_v5  ;;  %v1716_v27 = vunpack.c.l.bf16 %v1516_v32  ;;  %v1717_v5 = vunpack.c.l.bf16 %v1525_v47 }
 0x296   :  { %v2161_v22 = vmax.f32 %v1841_v49, 0.0  ;;  %v648_v3 = vpop.f32.mrf.mxu0  ;;  %v2160_v16 = vmax.f32 %v1840_v33, 0.0  ;;  %v3797_v49 = vld [vmem:[#allocation7 + $0xd4] sm:$0xf0] }
 0x297   :  { %v817_v12 = vpop.f32.mrf.mxu1 }
 0x298   :  { %v2226_v62 = vpack.c.bf16 %v2160_v16, %v2158_v43  ;;  %v4752_v57 = vpack.c.bf16 %v2161_v22, %v2159_v17  ;;  %v884_v4 = vpack.c.bf16 %v817_v12, %v648_v3  ;;  %v4761_v3 = vpop.f32.mrf.mxu2  ;;  %v4763_v43 = vor.u32 %v3797_v49, %v3700_v9  ;;  %v5238_v9 = vld [vmem:[#allocation31_spill] sm:$0xff] }
 0x299   :  { %2553 = vmatmul.bf16.gmra.mxu2 %v4750_v13 }
 0x29a   :  { %v1650_v26 = vunpack.c.l.bf16 %v884_v4  ;;  %v1651_v56 = vunpack.c.h.bf16 %v884_v4 }
 0x29c   :  { %v1843_v40 = vadd.f32 %v1716_v27, %v1651_v56  ;;  %v1842_v33 = vadd.f32 %v1716_v27, %v1650_v26  ;;  %v3716_v26 = vld [vmem:[#allocation7 + $0xe8] sm:$0xf] }
 0x29d   :  { %v2480_v47 = vpop.f32.mrf.mxu3 }
 0x29e   :  { %v650_v44 = vpop.f32.mrf.mxu0  ;;  %v2163_v16 = vmax.f32 %v1843_v40, 0.0  ;;  %v2162_v4 = vmax.f32 %v1842_v33, 0.0  ;;  %v3606_v40 = vld [vmem:[#allocation7 + $0x18] sm:$0xf0]  ;;  %v5239_v33 = vld [vmem:[#allocation30_spill] sm:$0xff] }
 0x29f   :  { %v819_v63 = vpop.f32.mrf.mxu1 }
 0x2a0   :  { %v885_v11 = vpack.c.bf16 %v819_v63, %v650_v44  ;;  %v4766_v56 = vpop.f32.mrf.mxu2  ;;  %v3801_v44 = vld [vmem:[#allocation7 + $0xf4] sm:$0xf0] }
 0x2a1   :  { %v4769_v63 = vor.u32 %v3801_v44, %v3716_v26 }
 0x2a2   :  { %v1652_v46 = vunpack.c.l.bf16 %v885_v11  ;;  %v1653_v54 = vunpack.c.h.bf16 %v885_v11 }
 0x2a4   :  { %v1845_v17 = vadd.f32 %v1717_v5, %v1653_v54  ;;  %v1844_v22 = vadd.f32 %v1717_v5, %v1652_v46  ;;  %v3771_v5 = vld [vmem:[#allocation7 + $0xc] sm:$0xf]  ;;  %v2481_v54 = vadd.f32 %v2480_v47, %v4612_v52  ;;  %v5243_v47 = vld [vmem:[#allocation22_spill] sm:$0xff] }
 0x2a5   :  { %v4772_v27 = vpop.f32.mrf.mxu3  ;;  %v4782_v46 = vor.u32 %v3771_v5, %v3606_v40  ;;  %v5244_v40 = vld [vmem:[#allocation20_spill] sm:$0xff] }
 0x2a6   :  { %v2165_v12 = vmax.f32 %v1845_v17, 0.0  ;;  %v2164_v15 = vmax.f32 %v1844_v22, 0.0  ;;  %v3775_v17 = vld [vmem:[#allocation7 + $0x2c] sm:$0xf]  ;;  %v3622_v22 = vld [vmem:[#allocation7 + $0x38] sm:$0xf0] }
 0x2a8   :  { %v2229_v36 = vpack.c.bf16 %v2165_v12, %v2163_v16  ;;  %v2228_v32 = vpack.c.bf16 %v2164_v15, %v2162_v4  ;;  %v4774_v11 = vpop.f32.mrf.mxu2  ;;  %v4798_v12 = vor.u32 %v3775_v17, %v3622_v22  ;;  %v5241_v4 = vld [vmem:[#allocation24_spill] sm:$0xff] }
 0x2a9   :  { %2558 = vmatmul.bf16.gmra.mxu2 %v4763_v43 }
 0x2aa   :  { %2569 = vmatpush.bf16.msrb.mxu3 %v2228_v32  ;;  %v5242_v32 = vld [vmem:[#allocation34_spill] sm:$0xff] }
 0x2ae   :  { %2570 = vmatpush.bf16.msrb.mxu3 %v2226_v62  ;;  %v2485_v62 = vpop.f32.mrf.mxu3 }
 0x2af   :  { %v2486_v15 = vadd.f32 %v2485_v62, %v4631_v39 }
 0x2b2   :  { %2571 = vmatpush.bf16.msrb.mxu3 %v4736_v61  ;;  %v4780_v61 = vpop.f32.mrf.mxu2 }
 0x2b6   :  { %2572 = vmatpush.bf16.msrb.mxu3 %v4716_v42  ;;  %v5236_v42 = vld [vmem:[#allocation33_spill] sm:$0xff] }
 0x2b9   :  { %2563 = vmatmul.bf16.gmra.mxu2 %v4769_v63 }
 0x2ba   :  { %2573 = vmatpush.bf16.msrb.mxu3 %v4700_v19  ;;  %v5237_v19 = vld [vmem:[#allocation32_spill] sm:$0xff] }
 0x2be   :  { %2574 = vmatpush.bf16.msrb.mxu3 %v4665_v59  ;;  %v4789_v59 = vpop.f32.mrf.mxu3 }
 0x2c2   :  { %2575 = vmatpush.bf16.msrb.mxu3 %v4641_v29 }
 0x2c6   :  { %2576 = vmatpush.bf16.msrb.mxu3 %v4621_v58  ;;  %v5240_v58 = vld [vmem:[#allocation28_spill] sm:$0xff]  ;;  %v2490_v52 = vpop.f32.mrf.mxu3 }
 0x2c9   :  { %2577 = vmatmul.bf16.vlgmr.msrb.gmra.mxu3 %v4782_v46  ;;  %2626 = vmatmul.bf16.vlgmr.msra.gmra.mxu2 %v5237_v19  ;;  %v5245_v19 = vld [vmem:[#allocation19_spill] sm:$0xff] }
 0x2ca   :  { %2667 = vmatpush.bf16.msra.mxu3 %v5236_v42  ;;  %v3779_v42 = vld [vmem:[#allocation7 + $0x4c] sm:$0xf] }
 0x2cc   :  { %v2529_v29 = vpop.f32.mrf.mxu2 }
 0x2cd   :  { %v4792_v49 = vadd.f32 %v2529_v29, %v2481_v54  ;;  %v3638_v54 = vld [vmem:[#allocation7 + $0x58] sm:$0xf0]  ;;  %v2491_v29 = vadd.f32 %v2490_v52, %v4656_v38 }
 0x2ce   :  { %2668 = vmatpush.bf16.msra.mxu3 %v5238_v9  ;;  %v4807_v5 = vpop.f32.mrf.mxu3  ;;  %v4813_v39 = vor.u32 %v3779_v42, %v3638_v54  ;;  %v5248_v42 = vld [vmem:[#allocation40_spill] sm:$0xff] }
 0x2d2   :  { %2669 = vmatpush.bf16.msra.mxu3 %v5239_v33  ;;  %v5246_v33 = vld [vmem:[#allocation36_spill] sm:$0xff] }
 0x2d4   :  { %v4796_v16 = vpop.f32.mrf.mxu2 }
 0x2d6   :  { %2670 = vmatpush.bf16.msra.mxu3 %v5240_v58  ;;  %v2495_v62 = vpop.f32.mrf.mxu3  ;;  %v3783_v58 = vld [vmem:[#allocation7 + $0x6c] sm:$0xf] }
 0x2d9   :  { %2582 = vmatmul.bf16.gmra.mxu3 %v4798_v12  ;;  %2631 = vmatmul.bf16.gmra.mxu2 %v5242_v32 }
 0x2da   :  { %2671 = vmatpush.bf16.msra.mxu3 %v5241_v4 }
 0x2dc   :  { %v2534_v26 = vpop.f32.mrf.mxu2 }
 0x2dd   :  { %v4805_v44 = vadd.f32 %v2534_v26, %v2486_v15 }
 0x2de   :  { %2672 = vmatpush.bf16.msra.mxu3 %v5243_v47  ;;  %v4823_v4 = vpop.f32.mrf.mxu3  ;;  %v3787_v47 = vld [vmem:[#allocation7 + $0x8c] sm:$0xf] }
 0x2e2   :  { %2673 = vmatpush.bf16.msra.mxu3 %v5244_v40 }
 0x2e4   :  { %v4811_v9 = vpop.f32.mrf.mxu2 }
 0x2e6   :  { %2674 = vmatpush.bf16.msra.mxu3 %v5245_v19 }
 0x2e9   :  { %2587 = vmatmul.bf16.gmra.mxu3 %v4813_v39  ;;  %2636 = vmatmul.bf16.gmra.mxu2 %v5246_v33 }
 0x2ea   :  { %2765 = vmatpush.bf16.msrb.mxu3 %v2229_v36  ;;  %v3654_v36 = vld [vmem:[#allocation7 + $0x78] sm:$0xf0] }
 0x2eb   :  { %v4828_v38 = vor.u32 %v3783_v58, %v3654_v36  ;;  %v5249_v58 = vld [vmem:[#allocation42_spill] sm:$0xff] }
 0x2ec   :  { %v2539_v17 = vpop.f32.mrf.mxu2 }
 0x2ed   :  { %v4820_v22 = vadd.f32 %v2539_v17, %v2491_v29 }
 0x2ee   :  { %2766 = vmatpush.bf16.msrb.mxu3 %v4752_v57  ;;  %v2496_v57 = vadd.f32 %v2495_v62, %v4698_v48  ;;  %v3791_v62 = vld [vmem:[#allocation7 + $0xac] sm:$0xf] }
 0x2f2   :  { %2767 = vmatpush.bf16.msrb.mxu3 %v4738_v20  ;;  %v5247_v20 = vld [vmem:[#allocation38_spill] sm:$0xff] }
 0x2f4   :  { %v4825_v15 = vpop.f32.mrf.mxu2 }
 0x2f6   :  { %2768 = vmatpush.bf16.msrb.mxu3 %v4718_v10  ;;  %v2500_v10 = vpop.f32.mrf.mxu3 }
 0x2f7   :  { %v2501_v48 = vadd.f32 %v2500_v10, %v4724_v2 }
 0x2f9   :  { %2592 = vmatmul.bf16.gmra.mxu3 %v4828_v38  ;;  %2641 = vmatmul.bf16.gmra.mxu2 %v5247_v20  ;;  %v3795_v20 = vld [vmem:[#allocation7 + $0xcc] sm:$0xf] }
 0x2fa   :  { %2769 = vmatpush.bf16.msrb.mxu3 %v4702_v8  ;;  %v3670_v8 = vld [vmem:[#allocation7 + $0x98] sm:$0xf0] }
 0x2fb   :  { %v4840_v40 = vor.u32 %v3787_v47, %v3670_v8 }
 0x2fc   :  { %v2544_v52 = vpop.f32.mrf.mxu2 }
 0x2fd   :  { %v4835_v32 = vadd.f32 %v2544_v52, %v2496_v57  ;;  %v3702_v52 = vld [vmem:[#allocation7 + $0xd8] sm:$0xf0] }
 0x2fe   :  { %2770 = vmatpush.bf16.msrb.mxu3 %v4667_v28  ;;  %v4842_v28 = vpop.f32.mrf.mxu3  ;;  %v4862_v8 = vor.u32 %v3795_v20, %v3702_v52 }
 0x302   :  { %2771 = vmatpush.bf16.msrb.mxu3 %v4643_v1 }
 0x304   :  { %v4838_v26 = vpop.f32.mrf.mxu2 }
 0x306   :  { %2772 = vmatpush.bf16.msrb.mxu3 %v4623_v31  ;;  %v2505_v19 = vpop.f32.mrf.mxu3  ;;  %v3686_v31 = vld [vmem:[#allocation7 + $0xb8] sm:$0xf0] }
 0x307   :  { %v4851_v33 = vor.u32 %v3791_v62, %v3686_v31  ;;  %v2506_v17 = vadd.f32 %v2505_v19, %v4747_v51  ;;  %v5250_v51 = vld [vmem:[#allocation43_spill] sm:$0xff]  ;;  %v3799_v62 = vld [vmem:[#allocation7 + $0xec] sm:$0xf] }
 0x308   :  { %v3718_v31 = vld [vmem:[#allocation7 + $0xf8] sm:$0xf0] }
 0x309   :  { %2597 = vmatmul.bf16.gmra.mxu3 %v4840_v40  ;;  %2646 = vmatmul.bf16.gmra.mxu2 %v5248_v42 }
 0x30c   :  { %v2549_v1 = vpop.f32.mrf.mxu2 }
 0x30d   :  { %v4847_v54 = vadd.f32 %v2549_v1, %v2501_v48 }
 0x30e   :  { %v4856_v2 = vpop.f32.mrf.mxu3 }
 0x314   :  { %v4849_v29 = vpop.f32.mrf.mxu2 }
 0x316   :  { %v2510_v10 = vpop.f32.mrf.mxu3 }
 0x317   :  { %v2511_v48 = vadd.f32 %v2510_v10, %v4761_v3  ;;  %v5251_v3 = vld [vmem:[#allocation44_spill] sm:$0xff] }
 0x319   :  { %2602 = vmatmul.bf16.gmra.mxu3 %v4851_v33  ;;  %2651 = vmatmul.bf16.gmra.mxu2 %v5249_v58  ;;  %v4873_v58 = vor.u32 %v3799_v62, %v3718_v31 }
 0x31c   :  { %v2554_v36 = vpop.f32.mrf.mxu2 }
 0x31d   :  { %v4858_v57 = vadd.f32 %v2554_v36, %v2506_v17 }
 0x31e   :  { %v4869_v19 = vpop.f32.mrf.mxu3 }
 0x324   :  { %v4860_v47 = vpop.f32.mrf.mxu2 }
 0x326   :  { %v2515_v36 = vpop.f32.mrf.mxu3 }
 0x327   :  { %v2516_v20 = vadd.f32 %v2515_v36, %v4774_v11  ;;  %v2483_v36 = vadd.f32 %v4772_v27, %v4619_v37  ;;  %v2488_v37 = vadd.f32 %v4789_v59, %v4646_v35  ;;  %v2493_v35 = vadd.f32 %v4807_v5, %v4679_v50 }
 0x328   :  { %v2498_v50 = vadd.f32 %v4823_v4, %v4710_v55  ;;  %v2503_v55 = vadd.f32 %v4842_v28, %v4734_v24  ;;  %v2508_v24 = vadd.f32 %v4856_v2, %v4755_v0  ;;  %v2513_v0 = vadd.f32 %v4869_v19, %v4766_v56 }
 0x329   :  { %2607 = vmatmul.bf16.gmra.mxu3 %v4862_v8  ;;  %2656 = vmatmul.bf16.gmra.mxu2 %v5250_v51  ;;  %v2537_v27 = vadd.f32 %v4811_v9, %v2488_v37  ;;  %v2542_v59 = vadd.f32 %v4825_v15, %v2493_v35 }
 0x32a   :  { %v2547_v5 = vadd.f32 %v4838_v26, %v2498_v50  ;;  %v2552_v4 = vadd.f32 %v4849_v29, %v2503_v55  ;;  %v2557_v28 = vadd.f32 %v4860_v47, %v2508_v24 }
 0x32c   :  { %v2559_v42 = vpop.f32.mrf.mxu2 }
 0x32d   :  { %v4867_v1 = vadd.f32 %v2559_v42, %v2511_v48  ;;  %v5252_v42 = vld [vmem:[#allocation45_spill] sm:$0xff] }
 0x32e   :  { %v4880_v48 = vpop.f32.mrf.mxu3 }
 0x32f   :  { %v2518_v56 = vadd.f32 %v4880_v48, %v4780_v61 }
 0x334   :  { %v4871_v17 = vpop.f32.mrf.mxu2 }
 0x335   :  { %v2562_v2 = vadd.f32 %v4871_v17, %v2513_v0 }
 0x339   :  { %2612 = vmatmul.bf16.gmra.mxu3 %v4873_v58  ;;  %2661 = vmatmul.bf16.gmra.mxu2 %v5251_v3 }
 0x33c   :  { %v2564_v52 = vpop.f32.mrf.mxu2 }
 0x33d   :  { %v4878_v10 = vadd.f32 %v2564_v52, %v2516_v20  ;;  %v2532_v20 = vadd.f32 %v4796_v16, %v2483_v36 }
 0x344   :  { %v4882_v51 = vpop.f32.mrf.mxu2 }
 0x345   :  { %v2567_v19 = vadd.f32 %v4882_v51, %v2518_v56 }
 0x349   :  { %2675 = vmatmul.bf16.vlgmr.msra.gmra.mxu3 %v5252_v42  ;;  %2724 = vmatmul.bf16.vlgmr.msrb.gmra.mxu2 %v4637_v14 }
 0x34c   :  { %v2578_v62 = vpop.f32.mrf.mxu3  ;;  %v4886_v31 = vpop.f32.mrf.mxu2 }
 0x34d   :  { %v4889_v11 = vadd.f32 %v2578_v62, %v4792_v49 }
 0x354   :  { %v2580_v3 = vpop.f32.mrf.mxu3  ;;  %v4894_v52 = vpop.f32.mrf.mxu2 }
 0x355   :  { %v4896_v23 = vadd.f32 %v2580_v3, %v2532_v20 }
 0x359   :  { %2680 = vmatmul.bf16.gmra.mxu3 %v4614_v45  ;;  %2729 = vmatmul.bf16.gmra.mxu2 %v4661_v30 }
 0x35c   :  { %v2583_v14 = vpop.f32.mrf.mxu3  ;;  %v4900_v42 = vpop.f32.mrf.mxu2 }
 0x35d   :  { %v4903_v49 = vadd.f32 %v2583_v14, %v4805_v44 }
 0x364   :  { %v2585_v16 = vpop.f32.mrf.mxu3  ;;  %v4908_v62 = vpop.f32.mrf.mxu2 }
 0x365   :  { %v4910_v36 = vadd.f32 %v2585_v16, %v2537_v27 }
 0x369   :  { %2685 = vmatmul.bf16.gmra.mxu3 %v4629_v41  ;;  %2734 = vmatmul.bf16.gmra.mxu2 %v4695_v60 }
 0x36c   :  { %v2588_v45 = vpop.f32.mrf.mxu3  ;;  %v4914_v30 = vpop.f32.mrf.mxu2 }
 0x36d   :  { %v4917_v44 = vadd.f32 %v2588_v45, %v4820_v22 }
 0x374   :  { %v2590_v9 = vpop.f32.mrf.mxu3  ;;  %v4922_v20 = vpop.f32.mrf.mxu2 }
 0x375   :  { %v4924_v3 = vadd.f32 %v2590_v9, %v2542_v59 }
 0x379   :  { %2690 = vmatmul.bf16.gmra.mxu3 %v4651_v21  ;;  %2739 = vmatmul.bf16.gmra.mxu2 %v4713_v25 }
 0x37c   :  { %v2593_v41 = vpop.f32.mrf.mxu3  ;;  %v4928_v60 = vpop.f32.mrf.mxu2 }
 0x37d   :  { %v4931_v22 = vadd.f32 %v2593_v41, %v4835_v32 }
 0x384   :  { %v2595_v15 = vpop.f32.mrf.mxu3  ;;  %v4936_v14 = vpop.f32.mrf.mxu2 }
 0x385   :  { %v4938_v37 = vadd.f32 %v2595_v15, %v2547_v5 }
 0x389   :  { %2695 = vmatmul.bf16.gmra.mxu3 %v4681_v53  ;;  %2744 = vmatmul.bf16.gmra.mxu2 %v4732_v34 }
 0x38c   :  { %v2598_v21 = vpop.f32.mrf.mxu3  ;;  %v4942_v25 = vpop.f32.mrf.mxu2 }
 0x38d   :  { %v4945_v32 = vadd.f32 %v2598_v21, %v4847_v54 }
 0x394   :  { %v2600_v26 = vpop.f32.mrf.mxu3  ;;  %v4950_v27 = vpop.f32.mrf.mxu2 }
 0x395   :  { %v4952_v16 = vadd.f32 %v2600_v26, %v2552_v4 }
 0x399   :  { %2700 = vmatmul.bf16.gmra.mxu3 %v4707_v6  ;;  %2749 = vmatmul.bf16.gmra.mxu2 %v4750_v13 }
 0x39c   :  { %v2603_v53 = vpop.f32.mrf.mxu3  ;;  %v4956_v34 = vpop.f32.mrf.mxu2 }
 0x39d   :  { %v4959_v54 = vadd.f32 %v2603_v53, %v4858_v57 }
 0x3a4   :  { %v2605_v29 = vpop.f32.mrf.mxu3  ;;  %v4964_v45 = vpop.f32.mrf.mxu2 }
 0x3a5   :  { %v4966_v35 = vadd.f32 %v2605_v29, %v2557_v28 }
 0x3a9   :  { %2705 = vmatmul.bf16.gmra.mxu3 %v4728_v18  ;;  %2754 = vmatmul.bf16.gmra.mxu2 %v4763_v43 }
 0x3ac   :  { %v2608_v6 = vpop.f32.mrf.mxu3  ;;  %v4970_v13 = vpop.f32.mrf.mxu2 }
 0x3ad   :  { %v4973_v57 = vadd.f32 %v2608_v6, %v4867_v1 }
 0x3b4   :  { %v2610_v47 = vpop.f32.mrf.mxu3  ;;  %v4978_v59 = vpop.f32.mrf.mxu2 }
 0x3b5   :  { %v4980_v9 = vadd.f32 %v2610_v47, %v2562_v2 }
 0x3b7   :  { %5253 = vst [vmem:[#allocation41_spill] sm:$0xff] %v4980_v9 }
 0x3b9   :  { %2710 = vmatmul.bf16.gmra.mxu3 %v4745_v7  ;;  %2759 = vmatmul.bf16.gmra.mxu2 %v4769_v63 }
 0x3bc   :  { %v2613_v18 = vpop.f32.mrf.mxu3  ;;  %v4984_v43 = vpop.f32.mrf.mxu2 }
 0x3bd   :  { %v4987_v1 = vadd.f32 %v2613_v18, %v4878_v10 }
 0x3bf   :  { %5254 = vst [vmem:[#allocation39_spill] sm:$0xff] %v4987_v1 }
 0x3c4   :  { %v2615_v17 = vpop.f32.mrf.mxu3  ;;  %v4992_v41 = vpop.f32.mrf.mxu2 }
 0x3c5   :  { %5255 = vst [vmem:[#allocation25_spill] sm:$0xff] %v4992_v41  ;;  %v4994_v50 = vadd.f32 %v2615_v17, %v2567_v19 }
 0x3c7   :  { %5256 = vst [vmem:[#allocation37_spill] sm:$0xff] %v4994_v50 }
 0x3c9   :  { %2773 = vmatmul.bf16.vlgmr.msrb.gmra.mxu3 %v4782_v46 }
 0x3cc   :  { %v2676_v7 = vpop.f32.mrf.mxu3  ;;  %v2725_v63 = vpop.f32.mrf.mxu2 }
 0x3cd   :  { %v2677_v5 = vadd.f32 %v2676_v7, %v4886_v31 }
 0x3cf   :  { %v2726_v15 = vadd.f32 %v2725_v63, %v2677_v5 }
 0x3d4   :  { %v2678_v21 = vpop.f32.mrf.mxu3  ;;  %v2727_v10 = vpop.f32.mrf.mxu2 }
 0x3d5   :  { %v2679_v55 = vadd.f32 %v2678_v21, %v4894_v52  ;;  %v5031_v21 = vpop.permute.xlu1 %2974 }
 0x3d6   :  { %5257 = vst [vmem:[#allocation26_spill] sm:$0xff] %v5031_v21 }
 0x3d7   :  { %v4999_v4 = vadd.f32 %v2727_v10, %v2679_v55 }
 0x3d9   :  { %2778 = vmatmul.bf16.gmra.mxu3 %v4798_v12 }
 0x3dc   :  { %v2681_v61 = vpop.f32.mrf.mxu3  ;;  %v2730_v48 = vpop.f32.mrf.mxu2 }
 0x3dd   :  { %v2682_v51 = vadd.f32 %v2681_v61, %v4900_v42 }
 0x3df   :  { %v5003_v26 = vadd.f32 %v2730_v48, %v2682_v51 }
 0x3e4   :  { %v2683_v46 = vpop.f32.mrf.mxu3  ;;  %v2732_v53 = vpop.f32.mrf.mxu2 }
 0x3e5   :  { %v2684_v24 = vadd.f32 %v2683_v46, %v4908_v62 }
 0x3e7   :  { %v5006_v31 = vadd.f32 %v2732_v53, %v2684_v24 }
 0x3e9   :  { %2783 = vmatmul.bf16.gmra.mxu3 %v4813_v39 }
 0x3ec   :  { %v2686_v28 = vpop.f32.mrf.mxu3  ;;  %v2735_v52 = vpop.f32.mrf.mxu2 }
 0x3ed   :  { %v2687_v29 = vadd.f32 %v2686_v28, %v4914_v30 }
 0x3ef   :  { %v5010_v6 = vadd.f32 %v2735_v52, %v2687_v29 }
 0x3f4   :  { %v2688_v12 = vpop.f32.mrf.mxu3  ;;  %v2737_v0 = vpop.f32.mrf.mxu2 }
 0x3f5   :  { %v2689_v42 = vadd.f32 %v2688_v12, %v4922_v20 }
 0x3f7   :  { %v5013_v2 = vadd.f32 %v2737_v0, %v2689_v42 }
 0x3f9   :  { %2788 = vmatmul.bf16.gmra.mxu3 %v4828_v38 }
 0x3fc   :  { %v2691_v47 = vpop.f32.mrf.mxu3  ;;  %v2740_v62 = vpop.f32.mrf.mxu2 }
 0x3fd   :  { %v2692_v18 = vadd.f32 %v2691_v47, %v4928_v60  ;;  %v5261_v47 = vld [vmem:[#allocation18_spill] sm:$0xff] }
 0x3ff   :  { %v5017_v56 = vadd.f32 %v2740_v62, %v2692_v18 }
 0x404   :  { %v2693_v39 = vpop.f32.mrf.mxu3  ;;  %v2742_v19 = vpop.f32.mrf.mxu2 }
 0x405   :  { %v2694_v30 = vadd.f32 %v2693_v39, %v4936_v14  ;;  %v5035_v14 = vpop.permute.xlu0 %2956 }
 0x407   :  { %v5020_v17 = vadd.f32 %v2742_v19, %v2694_v30 }
 0x409   :  { %2793 = vmatmul.bf16.gmra.mxu3 %v4840_v40  ;;  %v5038_v40 = vpop.permute.xlu1 %2965 }
 0x40c   :  { %v2696_v7 = vpop.f32.mrf.mxu3  ;;  %v2745_v20 = vpop.f32.mrf.mxu2 }
 0x40d   :  { %v2697_v63 = vadd.f32 %v2696_v7, %v4942_v25  ;;  %v5042_v25 = vpop.permute.xlu0 %2947 }
 0x40f   :  { %v5024_v5 = vadd.f32 %v2745_v20, %v2697_v63 }
 0x411   :  { %v5046_v48 = vpop.permute.xlu1 %2920 }
 0x414   :  { %v5026_v38 = vpop.f32.mrf.mxu3 }
 0x415   :  { %v5053_v46 = vpop.permute.xlu0 %2902 }
 0x419   :  { %2798 = vmatmul.bf16.gmra.mxu3 %v4851_v33  ;;  %v5049_v33 = vpop.permute.xlu2 %2983  ;;  %v5055_v53 = vpop.permute.xlu1 %2911 }
 0x41a   :  { %5258 = vst [vmem:[#allocation35_spill] sm:$0xff] %v5049_v33 }
 0x41c   :  { %v5029_v60 = vpop.f32.mrf.mxu3 }
 0x41d   :  { %v5061_v28 = vpop.permute.xlu0 %2893 }
 0x421   :  { %v5059_v24 = vpop.permute.xlu2 %2938  ;;  %v2867_v52 = vpop.permute.xlu1 %2866 }
 0x424   :  { %v5033_v10 = vpop.f32.mrf.mxu3 }
 0x425   :  { %v2849_v42 = vpop.permute.xlu0 %2848 }
 0x426   :  { %v2854_v62 = vperm.slane %v2849_v42, %v5261_v47 }
 0x428   :  { %v3022_v63 = vunpack.c.l.bf16 %v2854_v62 }
 0x429   :  { %2803 = vmatmul.bf16.gmra.mxu3 %v4862_v8  ;;  %v2858_v18 = vpop.permute.xlu1 %2857 }
 0x42a   :  { %v2863_v30 = vperm.slane %v2858_v18, %v5261_v47 }
 0x42c   :  { %v5040_v55 = vpop.f32.mrf.mxu3 }
 0x434   :  { %v5044_v61 = vpop.f32.mrf.mxu3 }
 0x439   :  { %2808 = vmatmul.bf16.gmra.mxu3 %v4873_v58  ;;  %v5064_v58 = vpop.permute.xlu2 %2929 }
 0x43c   :  { %v5051_v51 = vpop.f32.mrf.mxu3 }
 0x43d   :  { %5259 = vst [vmem:[#allocation29_spill] sm:$0xff] %v5051_v51 }
 0x441   :  { %v2885_v21 = vpop.permute.xlu2 %2884 }
 0x444   :  { %v5057_v8 = vpop.f32.mrf.mxu3 }
 0x445   :  { %5260 = vst [vmem:[#allocation23_spill] sm:$0xff] %v5057_v8 }
 0x44c   :  { %v2774_v29 = vpop.f32.mrf.mxu3 }
 0x44d   :  { %v2775_v12 = vadd.f32 %v2774_v29, %v2726_v15  ;;  %v3023_v15 = vunpack.c.l.bf16 %v2863_v30 }
 0x44f   :  { %v2814_v0 = vpack.c.bf16 %v2775_v12, %v4889_v11 }
 0x451   :  { %v2990_v39 = vunpack.c.l.bf16 %v2814_v0  ;;  %v2991_v7 = vunpack.c.h.bf16 %v2814_v0 }
 0x453   :  { %v3038_v33 = vadd.f32 %v3022_v63, %v2990_v39  ;;  %v3039_v12 = vadd.f32 %v3022_v63, %v2991_v7  ;;  %v2872_v39 = vperm.slane %v2867_v52, %v5261_v47 }
 0x454   :  { %v2776_v19 = vpop.f32.mrf.mxu3 }
 0x455   :  { %v2777_v20 = vadd.f32 %v2776_v19, %v4999_v4  ;;  %v3118_v41 = vmax.f32 %v3038_v33, 0.0  ;;  %v3119_v18 = vmax.f32 %v3039_v12, 0.0 }
 0x457   :  { %v2815_v50 = vpack.c.bf16 %v2777_v20, %v4896_v23 }
 0x459   :  { %v2992_v29 = vunpack.c.l.bf16 %v2815_v50  ;;  %v2993_v11 = vunpack.c.h.bf16 %v2815_v50  ;;  %v2876_v50 = vpop.permute.xlu2 %2875 }
 0x45a   :  { %v2881_v7 = vperm.slane %v2876_v50, %v5261_v47 }
 0x45b   :  { %v3040_v1 = vadd.f32 %v3023_v15, %v2992_v29  ;;  %v3041_v8 = vadd.f32 %v3023_v15, %v2993_v11 }
 0x45c   :  { %v2779_v42 = vpop.f32.mrf.mxu3  ;;  %v3025_v63 = vunpack.c.l.bf16 %v2881_v7 }
 0x45d   :  { %v2780_v9 = vadd.f32 %v2779_v42, %v5003_v26  ;;  %v3120_v51 = vmax.f32 %v3040_v1, 0.0  ;;  %v3121_v0 = vmax.f32 %v3041_v8, 0.0  ;;  %v3024_v26 = vunpack.c.l.bf16 %v2872_v39 }
 0x45f   :  { %v2816_v4 = vpack.c.bf16 %v2780_v9, %v4903_v49  ;;  %v5072_v62 = vpack.c.bf16 %v3120_v51, %v3118_v41  ;;  %v5074_v23 = vpack.c.bf16 %v3121_v0, %v3119_v18 }
 0x461   :  { %v2994_v19 = vunpack.c.l.bf16 %v2816_v4  ;;  %v2995_v20 = vunpack.c.h.bf16 %v2816_v4 }
 0x463   :  { %v3042_v8 = vadd.f32 %v3024_v26, %v2994_v19  ;;  %v3043_v41 = vadd.f32 %v3024_v26, %v2995_v20  ;;  %v2899_v19 = vperm.slane %v5061_v28, %v5261_v47 }
 0x464   :  { %v2781_v30 = vpop.f32.mrf.mxu3 }
 0x465   :  { %v2782_v33 = vadd.f32 %v2781_v30, %v5006_v31  ;;  %v3122_v52 = vmax.f32 %v3042_v8, 0.0  ;;  %v3123_v42 = vmax.f32 %v3043_v41, 0.0  ;;  %v3027_v26 = vunpack.c.l.bf16 %v2899_v19 }
 0x467   :  { %v2817_v1 = vpack.c.bf16 %v2782_v33, %v4910_v36  ;;  %v2890_v36 = vperm.slane %v2885_v21, %v5261_v47 }
 0x469   :  { %v2996_v49 = vunpack.c.l.bf16 %v2817_v1  ;;  %v2997_v9 = vunpack.c.h.bf16 %v2817_v1 }
 0x46b   :  { %v3044_v51 = vadd.f32 %v3025_v63, %v2996_v49  ;;  %v3045_v15 = vadd.f32 %v3025_v63, %v2997_v9 }
 0x46c   :  { %v2784_v29 = vpop.f32.mrf.mxu3 }
 0x46d   :  { %v2785_v11 = vadd.f32 %v2784_v29, %v5010_v6  ;;  %v3124_v12 = vmax.f32 %v3044_v51, 0.0  ;;  %v3125_v18 = vmax.f32 %v3045_v15, 0.0  ;;  %v3026_v6 = vunpack.c.l.bf16 %v2890_v36 }
 0x46f   :  { %v2818_v0 = vpack.c.bf16 %v2785_v11, %v4917_v44  ;;  %v5082_v31 = vpack.c.bf16 %v3124_v12, %v3122_v52  ;;  %v5084_v4 = vpack.c.bf16 %v3125_v18, %v3123_v42  ;;  %v2747_v11 = vpop.f32.mrf.mxu2  ;;  %v2917_v18 = vperm.slane %v5055_v53, %v5261_v47 }
 0x471   :  { %v2998_v39 = vunpack.c.l.bf16 %v2818_v0  ;;  %v2999_v30 = vunpack.c.h.bf16 %v2818_v0 }
 0x473   :  { %v3046_v33 = vadd.f32 %v3026_v6, %v2998_v39  ;;  %v3047_v8 = vadd.f32 %v3026_v6, %v2999_v30 }
 0x474   :  { %v2786_v50 = vpop.f32.mrf.mxu3 }
 0x475   :  { %v2787_v7 = vadd.f32 %v2786_v50, %v5013_v2  ;;  %v3126_v21 = vmax.f32 %v3046_v33, 0.0  ;;  %v3127_v15 = vmax.f32 %v3047_v8, 0.0  ;;  %v3029_v50 = vunpack.c.l.bf16 %v2917_v18 }
 0x477   :  { %v2819_v20 = vpack.c.bf16 %v2787_v7, %v4924_v3  ;;  %v2908_v3 = vperm.slane %v5053_v46, %v5261_v47  ;;  %v2750_v8 = vpop.f32.mrf.mxu2 }
 0x479   :  { %v3000_v44 = vunpack.c.l.bf16 %v2819_v20  ;;  %v3001_v1 = vunpack.c.h.bf16 %v2819_v20  ;;  %v3028_v36 = vunpack.c.l.bf16 %v2908_v3 }
 0x47b   :  { %v3048_v63 = vadd.f32 %v3027_v26, %v3000_v44  ;;  %v3049_v49 = vadd.f32 %v3027_v26, %v3001_v1 }
 0x47c   :  { %v2789_v9 = vpop.f32.mrf.mxu3 }
 0x47d   :  { %v2790_v41 = vadd.f32 %v2789_v9, %v5017_v56  ;;  %v3128_v51 = vmax.f32 %v3048_v63, 0.0  ;;  %v3129_v28 = vmax.f32 %v3049_v49, 0.0  ;;  %v2926_v9 = vperm.slane %v5046_v48, %v5261_v47 }
 0x47f   :  { %v2820_v29 = vpack.c.bf16 %v2790_v41, %v4931_v22  ;;  %v5093_v2 = vpack.c.bf16 %v3128_v51, %v3126_v21  ;;  %v5095_v52 = vpack.c.bf16 %v3129_v28, %v3127_v15 }
 0x481   :  { %v3002_v12 = vunpack.c.l.bf16 %v2820_v29  ;;  %v3003_v0 = vunpack.c.h.bf16 %v2820_v29  ;;  %v3030_v29 = vunpack.c.l.bf16 %v2926_v9 }
 0x483   :  { %v3050_v22 = vadd.f32 %v3028_v36, %v3002_v12  ;;  %v3051_v7 = vadd.f32 %v3028_v36, %v3003_v0 }
 0x484   :  { %v2791_v42 = vpop.f32.mrf.mxu3 }
 0x485   :  { %v2792_v56 = vadd.f32 %v2791_v42, %v5020_v17  ;;  %v3130_v33 = vmax.f32 %v3050_v22, 0.0  ;;  %v3131_v1 = vmax.f32 %v3051_v7, 0.0  ;;  %v2699_v17 = vadd.f32 %v5026_v38, %v4950_v27  ;;  %v2752_v38 = vpop.f32.mrf.mxu2 }
 0x486   :  { %v2702_v27 = vadd.f32 %v5029_v60, %v4956_v34  ;;  %v2704_v34 = vadd.f32 %v5033_v10, %v4964_v45  ;;  %v2944_v7 = vperm.slane %v5059_v24, %v5261_v47 }
 0x487   :  { %v2821_v39 = vpack.c.bf16 %v2792_v56, %v4938_v37  ;;  %v2748_v21 = vadd.f32 %v2747_v11, %v2699_v17 }
 0x488   :  { %v2751_v11 = vadd.f32 %v2750_v8, %v2702_v27 }
 0x489   :  { %v3004_v19 = vunpack.c.l.bf16 %v2821_v39  ;;  %v3005_v30 = vunpack.c.h.bf16 %v2821_v39 }
 0x48b   :  { %v3052_v6 = vadd.f32 %v3029_v50, %v3004_v19  ;;  %v3053_v20 = vadd.f32 %v3029_v50, %v3005_v30 }
 0x48c   :  { %v2794_v46 = vpop.f32.mrf.mxu3 }
 0x48d   :  { %v2795_v26 = vadd.f32 %v2794_v46, %v5024_v5  ;;  %v3132_v44 = vmax.f32 %v3052_v6, 0.0  ;;  %v3133_v53 = vmax.f32 %v3053_v20, 0.0  ;;  %v2935_v5 = vperm.slane %v5064_v58, %v5261_v47  ;;  %v2755_v6 = vpop.f32.mrf.mxu2 }
 0x48e   :  { %v2753_v20 = vadd.f32 %v2752_v38, %v2704_v34  ;;  %v2962_v38 = vperm.slane %v5035_v14, %v5261_v47 }
 0x48f   :  { %v2822_v37 = vpack.c.bf16 %v2795_v26, %v4945_v32  ;;  %v5107_v63 = vpack.c.bf16 %v3132_v44, %v3130_v33  ;;  %v5109_v49 = vpack.c.bf16 %v3133_v53, %v3131_v1  ;;  %v3031_v12 = vunpack.c.l.bf16 %v2935_v5 }
 0x490   :  { %v2953_v26 = vperm.slane %v5042_v25, %v5261_v47  ;;  %v3032_v53 = vunpack.c.l.bf16 %v2944_v7 }
 0x491   :  { %v3006_v41 = vunpack.c.l.bf16 %v2822_v37  ;;  %v3007_v15 = vunpack.c.h.bf16 %v2822_v37 }
 0x492   :  { %v3033_v8 = vunpack.c.l.bf16 %v2953_v26  ;;  %v5264_v26 = vld [vmem:[#allocation25_spill] sm:$0xff] }
 0x493   :  { %v3054_v3 = vadd.f32 %v3030_v29, %v3006_v41  ;;  %v3055_v48 = vadd.f32 %v3030_v29, %v3007_v15 }
 0x494   :  { %v2796_v51 = vpop.f32.mrf.mxu3 }
 0x495   :  { %v2797_v28 = vadd.f32 %v2796_v51, %v2748_v21  ;;  %v3134_v39 = vmax.f32 %v3054_v3, 0.0  ;;  %v3135_v50 = vmax.f32 %v3055_v48, 0.0  ;;  %v2757_v51 = vpop.f32.mrf.mxu2 }
 0x497   :  { %v2823_v32 = vpack.c.bf16 %v2797_v28, %v4952_v16 }
 0x499   :  { %v3008_v42 = vunpack.c.l.bf16 %v2823_v32  ;;  %v3009_v18 = vunpack.c.h.bf16 %v2823_v32 }
 0x49b   :  { %v3056_v0 = vadd.f32 %v3031_v12, %v3008_v42  ;;  %v3057_v56 = vadd.f32 %v3031_v12, %v3009_v18  ;;  %v2971_v18 = vperm.slane %v5038_v40, %v5261_v47 }
 0x49c   :  { %v2799_v36 = vpop.f32.mrf.mxu3 }
 0x49d   :  { %v2800_v58 = vadd.f32 %v2799_v36, %v2751_v11  ;;  %v3136_v22 = vmax.f32 %v3056_v0, 0.0  ;;  %v3137_v19 = vmax.f32 %v3057_v56, 0.0  ;;  %v3034_v0 = vunpack.c.l.bf16 %v2962_v38  ;;  %v2760_v56 = vpop.f32.mrf.mxu2  ;;  %v5262_v36 = vld [vmem:[#allocation29_spill] sm:$0xff] }
 0x49f   :  { %v2824_v16 = vpack.c.bf16 %v2800_v58, %v4959_v54  ;;  %v5121_v60 = vpack.c.bf16 %v3136_v22, %v3134_v39  ;;  %v5123_v30 = vpack.c.bf16 %v3137_v19, %v3135_v50  ;;  %v2707_v54 = vadd.f32 %v5040_v55, %v4970_v13 }
 0x4a0   :  { %v2709_v13 = vadd.f32 %v5044_v61, %v4978_v59  ;;  %v2712_v59 = vadd.f32 %v5262_v36, %v4984_v43  ;;  %v5263_v61 = vld [vmem:[#allocation41_spill] sm:$0xff]  ;;  %v3035_v58 = vunpack.c.l.bf16 %v2971_v18  ;;  %v5266_v43 = vld [vmem:[#allocation39_spill] sm:$0xff] }
 0x4a1   :  { %v3010_v46 = vunpack.c.l.bf16 %v2824_v16  ;;  %v3011_v44 = vunpack.c.h.bf16 %v2824_v16  ;;  %v2756_v9 = vadd.f32 %v2755_v6, %v2707_v54 }
 0x4a2   :  { %v2758_v3 = vadd.f32 %v2757_v51, %v2709_v13  ;;  %v2761_v19 = vadd.f32 %v2760_v56, %v2712_v59  ;;  %v3802_v56 = vld [vmem:[#allocation10] sm:$0xff] }
 0x4a3   :  { %v3058_v10 = vadd.f32 %v3032_v53, %v3010_v46  ;;  %v3059_v24 = vadd.f32 %v3032_v53, %v3011_v44  ;;  %v5265_v44 = vld [vmem:[#allocation23_spill] sm:$0xff] }
 0x4a4   :  { %v2801_v33 = vpop.f32.mrf.mxu3 }
 0x4a5   :  { %v2802_v1 = vadd.f32 %v2801_v33, %v2753_v20  ;;  %v3138_v15 = vmax.f32 %v3058_v10, 0.0  ;;  %v3139_v29 = vmax.f32 %v3059_v24, 0.0  ;;  %v2762_v10 = vpop.f32.mrf.mxu2  ;;  %v5268_v24 = vld [vmem:[#allocation35_spill] sm:$0xff] }
 0x4a7   :  { %v2825_v45 = vpack.c.bf16 %v2802_v1, %v4966_v35  ;;  %v2714_v1 = vadd.f32 %v5265_v44, %v5264_v26 }
 0x4a9   :  { %v3012_v17 = vunpack.c.l.bf16 %v2825_v45  ;;  %v3013_v37 = vunpack.c.h.bf16 %v2825_v45 }
 0x4ab   :  { %v3060_v21 = vadd.f32 %v3033_v8, %v3012_v17  ;;  %v3061_v41 = vadd.f32 %v3033_v8, %v3013_v37  ;;  %v5267_v8 = vld [vmem:[#allocation26_spill] sm:$0xff]  ;;  %v2763_v37 = vadd.f32 %v2762_v10, %v2714_v1 }
 0x4ac   :  { %v2804_v5 = vpop.f32.mrf.mxu3  ;;  %v2980_v17 = vperm.slane %v5267_v8, %v5261_v47 }
 0x4ad   :  { %v2805_v25 = vadd.f32 %v2804_v5, %v2756_v9  ;;  %v3140_v28 = vmax.f32 %v3060_v21, 0.0  ;;  %v3141_v27 = vmax.f32 %v3061_v41, 0.0  ;;  %v2989_v9 = vperm.slane %v5268_v24, %v5261_v47 }
 0x4af   :  { %v2826_v35 = vpack.c.bf16 %v2805_v25, %v4973_v57  ;;  %v3160_v55 = vpack.c.bf16 %v3140_v28, %v3138_v15  ;;  %v3161_v32 = vpack.c.bf16 %v3141_v27, %v3139_v29  ;;  %v3036_v15 = vunpack.c.l.bf16 %v2980_v17  ;;  %v5269_v25 = vld [vmem:[#allocation37_spill] sm:$0xff] }
 0x4b0   :  { %v3037_v29 = vunpack.c.l.bf16 %v2989_v9 }
 0x4b1   :  { %v3014_v12 = vunpack.c.l.bf16 %v2826_v35  ;;  %v3015_v48 = vunpack.c.h.bf16 %v2826_v35 }
 0x4b3   :  { %v3062_v39 = vadd.f32 %v3034_v0, %v3014_v12  ;;  %v3063_v14 = vadd.f32 %v3034_v0, %v3015_v48 }
 0x4b4   :  { %v2806_v42 = vpop.f32.mrf.mxu3 }
 0x4b5   :  { %v2807_v11 = vadd.f32 %v2806_v42, %v2758_v3  ;;  %v3142_v6 = vmax.f32 %v3062_v39, 0.0  ;;  %v3143_v46 = vmax.f32 %v3063_v14, 0.0 }
 0x4b7   :  { %v2827_v57 = vpack.c.bf16 %v2807_v11, %v5263_v61 }
 0x4b9   :  { %v3016_v22 = vunpack.c.l.bf16 %v2827_v57  ;;  %v3017_v50 = vunpack.c.h.bf16 %v2827_v57  ;;  %v3177_v57 = vpop.permute.xlu1 %3176 }
 0x4bb   :  { %v3064_v34 = vadd.f32 %v3035_v58, %v3016_v22  ;;  %v3065_v16 = vadd.f32 %v3035_v58, %v3017_v50 }
 0x4bc   :  { %v2809_v7 = vpop.f32.mrf.mxu3 }
 0x4bd   :  { %v2810_v40 = vadd.f32 %v2809_v7, %v2761_v19  ;;  %v3144_v20 = vmax.f32 %v3064_v34, 0.0  ;;  %v3145_v33 = vmax.f32 %v3065_v16, 0.0 }
 0x4bf   :  { %v2828_v53 = vpack.c.bf16 %v2810_v40, %v5266_v43  ;;  %v3162_v54 = vpack.c.bf16 %v3144_v20, %v3142_v6  ;;  %v3163_v45 = vpack.c.bf16 %v3145_v33, %v3143_v46  ;;  %v3804_v43 = vld [vmem:[%s5182_s7] sm:$0xff] }
 0x4c1   :  { %v3018_v41 = vunpack.c.l.bf16 %v2828_v53  ;;  %v3019_v51 = vunpack.c.h.bf16 %v2828_v53  ;;  %v3268_v17 = vpop.permute.xlu1 %3267 }
 0x4c3   :  { %v3066_v35 = vadd.f32 %v3036_v15, %v3018_v41  ;;  %v3067_v38 = vadd.f32 %v3036_v15, %v3019_v51 }
 0x4c4   :  { %v2811_v21 = vpop.f32.mrf.mxu3 }
 0x4c5   :  { %v2812_v5 = vadd.f32 %v2811_v21, %v2763_v37  ;;  %v3146_v42 = vmax.f32 %v3066_v35, 0.0  ;;  %v3147_v48 = vmax.f32 %v3067_v38, 0.0 }
 0x4c7   :  { %v2829_v28 = vpack.c.bf16 %v2812_v5, %v5269_v25 }
 0x4c9   :  { %v3020_v27 = vunpack.c.l.bf16 %v2829_v28  ;;  %v3021_v13 = vunpack.c.h.bf16 %v2829_v28 }
 0x4cb   :  { %v3068_v3 = vadd.f32 %v3037_v29, %v3020_v27  ;;  %v3069_v12 = vadd.f32 %v3037_v29, %v3021_v13 }
 0x4cd   :  { %v3148_v18 = vmax.f32 %v3068_v3, 0.0  ;;  %v3149_v11 = vmax.f32 %v3069_v12, 0.0 }
 0x4cf   :  { %v3164_v0 = vpack.c.bf16 %v3148_v18, %v3146_v42  ;;  %v3165_v47 = vpack.c.bf16 %v3149_v11, %v3147_v48 }
 0x4d1   :  { %3206 = vmatpush.bf16.msrb.mxu0 %v3164_v0  ;;  %3225 = vmatpush.bf16.msrb.mxu1 %v3165_v47 }
 0x4d5   :  { %3207 = vmatpush.bf16.msrb.mxu0 %v3162_v54  ;;  %3226 = vmatpush.bf16.msrb.mxu1 %v3163_v45 }
 0x4d9   :  { %3208 = vmatpush.bf16.msrb.mxu0 %v3160_v55  ;;  %3227 = vmatpush.bf16.msrb.mxu1 %v3161_v32  ;;  %v3187_v55 = vpop.permute.xlu2 %3186 }
 0x4dd   :  { %3209 = vmatpush.bf16.msrb.mxu0 %v5121_v60  ;;  %3228 = vmatpush.bf16.msrb.mxu1 %v5123_v30  ;;  %v3803_v60 = vld [vmem:[#allocation10 + $0x8] sm:$0xff] }
 0x4e1   :  { %3210 = vmatpush.bf16.msrb.mxu0 %v5107_v63  ;;  %3229 = vmatpush.bf16.msrb.mxu1 %v5109_v49  ;;  %v3182_v36 = vpop.permute.xlu2 %3181 }
 0x4e5   :  { %3211 = vmatpush.bf16.msrb.mxu0 %v5093_v2  ;;  %3230 = vmatpush.bf16.msrb.mxu1 %v5095_v52 }
 0x4e9   :  { %3212 = vmatpush.bf16.msrb.mxu0 %v5082_v31  ;;  %3231 = vmatpush.bf16.msrb.mxu1 %v5084_v4  ;;  %v3192_v31 = vpop.permute.xlu0 %3191  ;;  %v3316_v28 = vpop.permute.xlu2 %3315 }
 0x4ed   :  { %3213 = vmatpush.bf16.msrb.mxu0 %v5072_v62  ;;  %3232 = vmatpush.bf16.msrb.mxu1 %v5074_v23 }
 0x4f0   :  { %3214 = vmatmul.bf16.vlgmr.msrb.gmra.mxu0 %v3802_v56  ;;  %3233 = vmatmul.bf16.vlgmr.msrb.gmra.mxu1 %v3802_v56 }
 0x4f1   :  { %v3263_v45 = vpop.permute.xlu0 %3262 }
 0x4f9   :  { %v3321_v25 = vpop.permute.xlu0 %3320 }
 0x500   :  { %3219 = vmatmul.bf16.gmra.mxu0 %v3803_v60  ;;  %3238 = vmatmul.bf16.gmra.mxu1 %v3803_v60 }
 0x56d   :  { %v3215_v63 = vpop.f32.mrf.mxu0  ;;  %v3234_v49 = vpop.f32.mrf.mxu1 }
 0x56e   :  { %v3216_v50 = vadd.f32 %v3215_v63, %v3177_v57  ;;  %v3235_v14 = vadd.f32 %v3234_v49, %v3177_v57  ;;  %v3342_v49 = vstv %s5185_s10 }
 0x570   :  { %v3244_v33 = vmax.f32 %v3216_v50, 0.0  ;;  %v3245_v26 = vmax.f32 %v3235_v14, 0.0 }
 0x575   :  { %v3217_v30 = vpop.f32.mrf.mxu0  ;;  %v3236_v2 = vpop.f32.mrf.mxu1 }
 0x576   :  { %v3218_v23 = vadd.f32 %v3217_v30, %v3182_v36  ;;  %v3237_v39 = vadd.f32 %v3236_v2, %v3182_v36 }
 0x578   :  { %v3246_v6 = vmax.f32 %v3218_v23, 0.0  ;;  %v3247_v40 = vmax.f32 %v3237_v39, 0.0 }
 0x57a   :  { %v3252_v44 = vpack.c.bf16 %v3246_v6, %v3244_v33  ;;  %v3253_v1 = vpack.c.bf16 %v3247_v40, %v3245_v26 }
 0x57d   :  { %v3220_v52 = vpop.f32.mrf.mxu0  ;;  %v3239_v32 = vpop.f32.mrf.mxu1 }
 0x57e   :  { %v3221_v4 = vadd.f32 %v3220_v52, %v3187_v55  ;;  %v3240_v59 = vadd.f32 %v3239_v32, %v3187_v55 }
 0x580   :  { %v3248_v19 = vmax.f32 %v3221_v4, 0.0  ;;  %v3249_v34 = vmax.f32 %v3240_v59, 0.0 }
 0x585   :  { %v3222_v61 = vpop.f32.mrf.mxu0  ;;  %v3241_v62 = vpop.f32.mrf.mxu1 }
 0x586   :  { %v3223_v58 = vadd.f32 %v3222_v61, %v3192_v31  ;;  %v3242_v22 = vadd.f32 %v3241_v62, %v3192_v31 }
 0x588   :  { %v3250_v16 = vmax.f32 %v3223_v58, 0.0  ;;  %v3251_v7 = vmax.f32 %v3242_v22, 0.0 }
 0x58a   :  { %v3254_v20 = vpack.c.bf16 %v3250_v16, %v3248_v19  ;;  %v3255_v46 = vpack.c.bf16 %v3251_v7, %v3249_v34 }
 0x58c   :  { %3285 = vmatpush.bf16.msra.mxu2 %v3254_v20  ;;  %3299 = vmatpush.bf16.msra.mxu3 %v3255_v46  ;;  %v3389_v46 = vlaneseq }
 0x58e   :  { %vm3391_vm13 = vcmp.lt.s32.totalorder %v3389_v46, 256 }
 0x590   :  { %3286 = vmatpush.bf16.msra.mxu2 %v3252_v44  ;;  %3300 = vmatpush.bf16.msra.mxu3 %v3253_v1 }
 0x593   :  { %3734 = vmatmul.msk.bf16.vlgmr.msra.gmra.mxu2 %vm3275_vm3, %v3804_v43  ;;  %3735 = vmatmul.msk.bf16.vlgmr.msra.gmra.mxu3 %vm3275_vm3, %v3804_v43 }
 0x616   :  { %v3288_v53 = vpop.f32.mrf.mxu2  ;;  %v3302_v54 = vpop.f32.mrf.mxu3 }
 0x617   :  { %v3289_v10 = vadd.f32 %v3288_v53, %v3263_v45  ;;  %v3303_v8 = vadd.f32 %v3302_v54, %v3263_v45 }
 0x619   :  { %v3307_v9 = vmax.f32 %v3289_v10, 0.0  ;;  %v3308_v21 = vmax.f32 %v3303_v8, 0.0 }
 0x61b   :  { %v3323_v29 = vmul.f32 %v3316_v28, %v3307_v9  ;;  %v3324_v27 = vmul.f32 %v3316_v28, %v3308_v21 }
 0x61e   :  { %v3290_v37 = vpop.f32.mrf.mxu2  ;;  %v3304_v24 = vpop.f32.mrf.mxu3 }
 0x61f   :  { %v3291_v41 = vadd.f32 %v3290_v37, %v3268_v17  ;;  %v3305_v51 = vadd.f32 %v3304_v24, %v3268_v17 }
 0x621   :  { %v3309_v5 = vmax.f32 %v3291_v41, 0.0  ;;  %v3310_v15 = vmax.f32 %v3305_v51, 0.0 }
 0x623   :  { %v3325_v13 = vmul.f32 %v3321_v25, %v3309_v5  ;;  %v3326_v35 = vmul.f32 %v3321_v25, %v3310_v15 }
 0x625   :  { %v3327_v38 = vadd.f32 %v3325_v13, %v3323_v29  ;;  %v3334_v3 = vadd.f32 %v3326_v35, %v3324_v27 }
 0x627   :  { %v3328_v12 = vrot.slane %v3327_v38, 4  ;;  %v3335_v42 = vrot.slane %v3334_v3, 4 }
 0x629   :  { %v3329_v18 = vadd.f32 %v3328_v12, %v3327_v38  ;;  %v3336_v48 = vadd.f32 %v3335_v42, %v3334_v3 }
 0x62b   :  { %v3330_v11 = vrot.slane %v3329_v18, 2  ;;  %v3337_v0 = vrot.slane %v3336_v48, 2 }
 0x62d   :  { %v3331_v47 = vadd.f32 %v3330_v11, %v3329_v18  ;;  %v3338_v56 = vadd.f32 %v3337_v0, %v3336_v48 }
 0x62f   :  { %v3332_v60 = vrot.slane %v3331_v47, 1  ;;  %v3339_v63 = vrot.slane %v3338_v56, 1 }
 0x631   :  { %v3333_v30 = vadd.f32 %v3332_v60, %v3331_v47  ;;  %v3340_v2 = vadd.f32 %v3339_v63, %v3338_v56 }
 0x633   :  { %v3343_v55 = vadd.f32 %v3342_v49, %v3333_v30  ;;  %v3344_v52 = vadd.f32 %v3342_v49, %v3340_v2 }
 0x635   :  { %v3736_v32 = vmul.f32 -1.442695, %v3343_v55  ;;  %v3737_v31 = vmul.f32 -1.442695, %v3344_v52 }
 0x637   :  { %3824 = vpow2.f32 %v3736_v32 }
 0x638   :  { %3826 = vpow2.f32 %v3737_v31 }
 0x63d   :  { %v3825_v36 = vpop.eup %3824 }
 0x63e   :  { %v3827_v4 = vpop.eup %3826  ;;  %v3351_v59 = vadd.f32 1.0, %v3825_v36 }
 0x63f   :  { %v3352_v61 = vadd.f32 1.0, %v3827_v4 }
 0x640   :  { %3828 = vrcp.f32 %v3351_v59  ;;  %vm3358_vm6 = vweird.f32 %v3351_v59  ;;  %v3364_v7 = vand.u32 2147483648, %v3351_v59  ;;  %v3362_v40 = vand.u32 2147483647, %v3351_v59 }
 0x641   :  { %3830 = vrcp.f32 %v3352_v61  ;;  %v3379_v14 = vand.u32 2147483648, %v3352_v61  ;;  %v3377_v34 = vand.u32 2147483647, %v3352_v61  ;;  %vm3373_vm8 = vweird.f32 %v3352_v61 }
 0x642   :  { %v3365_v1 = vor.u32 1.1754944e-38, %v3364_v7  ;;  %vm3363_vm12 = vcmp.eq.f32.partialorder %v3362_v40, 8.507059e+37 }
 0x643   :  { %v3380_v33 = vor.u32 1.1754944e-38, %v3379_v14  ;;  %vm3378_vm10 = vcmp.eq.f32.partialorder %v3377_v34, 8.507059e+37 }
 0x646   :  { %v3829_v62 = vpop.eup %3828 }
 0x647   :  { %v3831_v57 = vpop.eup %3830  ;;  %v3354_v23 = vmul.f32 %v3829_v62, %v3351_v59  ;;  %vm3359_vm4 = vweird.f32 %v3829_v62 }
 0x648   :  { %v3369_v39 = vmul.f32 %v3831_v57, %v3352_v61  ;;  %vm3374_vm5 = vweird.f32 %v3831_v57  ;;  %vm5166_vm7 = vmor %vm3358_vm6, %vm3359_vm4 }
 0x649   :  { %v3355_v58 = vsub.f32 1.0, %v3354_v23  ;;  %vm3375_vm9 = vmor %vm3373_vm8, %vm3374_vm5 }
 0x64a   :  { %v3370_v22 = vsub.f32 1.0, %v3369_v39 }
 0x64b   :  { %v3356_v50 = vmul.f32 %v3829_v62, %v3355_v58 }
 0x64c   :  { %v3371_v19 = vmul.f32 %v3831_v57, %v3370_v22 }
 0x64d   :  { %v3357_v16 = vadd.f32 %v3829_v62, %v3356_v50 }
 0x64e   :  { %v3372_v20 = vadd.f32 %v3831_v57, %v3371_v19 }
 0x64f   :  { %v3361_v26 = vsel %vm5166_vm7, %v3829_v62, %v3357_v16 }
 0x650   :  { %v3376_v44 = vsel %vm3375_vm9, %v3831_v57, %v3372_v20  ;;  %v3366_v54 = vsel %vm3363_vm12, %v3365_v1, %v3361_v26 }
 0x651   :  { %v3381_v43 = vsel %vm3378_vm10, %v3380_v33, %v3376_v44 }
 0x652   :  { %v3385_v53 = vrot.slane %v3381_v43, 7 }
 0x654   :  { %v3387_v45 = vsel %vm3386_vm11, %v3366_v54, %v3385_v53 }
 0x655   :  { %3393 = vst.msk [vmem:[%s5186_s11] sm:$0x3] %vm3391_vm13, %v3387_v45 }
 0x656   :  { %3398 = vsyncpa [#allocation4], 1 }
 0x657   :  { %3399 = vsyncpa [#allocation6], 1 }
 0x658   :  { %3400 = vsyncpa [#allocation9], 1 }
 0x659   :  { %3401 = vsyncpa [#allocation12], 1 }

</bundles_post_ra>
